<compile_context>
chip_gen: v6e
topology: v6e:2x2x1
jax: 0.10.0
libtpu: 0.0.40
codegen_flags: <defaults>
</compile_context>

<pallas_src>
import functools

import jax
import jax.numpy as jnp
import numpy as np
from jax.experimental import pallas as pl
from jax.experimental.pallas import tpu as pltpu


# ----------------------------- small helpers -----------------------------

def _pad_axis_to(a, axis, target):
    pad = target - a.shape[axis]
    if pad <= 0:
        return a
    widths = [(0, 0)] * a.ndim
    widths[axis] = (0, pad)
    return jnp.pad(a, widths)


def _im2col_shifts(x_nchw):
    """3x3 same-padded shifted views (pure-JAX reference only)."""
    _, _, H, W = x_nchw.shape
    xp = jnp.pad(x_nchw, ((0, 0), (0, 0), (1, 1), (1, 1)))
    shifts = [xp[:, :, ky:ky + H, kx:kx + W] for ky in range(3) for kx in range(3)]
    return jnp.stack(shifts, axis=1)


# ----------------------------- fused Pallas kernel -----------------------------

# rows of the (4, S) edge-mask input
_NOT_FIRST_COL, _NOT_LAST_COL, _NOT_FIRST_ROW, _NOT_LAST_ROW = 0, 1, 2, 3


def _abn_fused_kernel(x_ref, masks_ref, w1_ref, b1_ref, watt_ref, batt_ref,
                      wcls_ref, bcls_ref, wp_ref, bp_ref, wfc_ref, bfc_ref,
                      att_ref, ab_ref, feats_ref, pb_ref, *, width, inv_s):
    """Whole AttentionBranchNetwork forward for one image (channel-first layout).

    x_ref:     (1, Cp, S) f32  image, channels on sublanes, spatial S=H*W on lanes
    masks_ref: (4, S)     f32  0/1 edge masks (same-padding for rolled taps)
    w1_ref:    (9, Ch, Cp) bf16  attention conv taps        b1_ref:  (Ch, 1) f32
    watt_ref:  (Ch, 1) f32  1x1 attention-map head weight   batt_ref:(1, 1) f32 (SMEM)
    wcls_ref:  (Ch, nc) f32 class head weight               bcls_ref:(1, nc) f32
    wp_ref:    (9, Cf, Cp) bf16  perception conv taps       bp_ref:  (Cf, 1) f32
    wfc_ref:   (Cf, nc) f32 perception FC weight            bfc_ref: (1, nc) f32
    outputs:
    att_ref:   (1, 1, S)  f32  attention map (lane-dense)
    ab_ref:    (1, 1, nc) f32  attention-branch logits
    feats_ref: (1, Cf, 1) f32  pooled perception features (tiny column)
    pb_ref:    (1, 1, nc) f32  perception-branch logits
    """
    x = x_ref[0]                          # (Cp, S) f32
    masks = masks_ref[...]                # (4, S)  f32
    S = x.shape[1]

    def shifted_tap(v, dy, dx):
        """v[:, y*W+x] -> v[:, (y+dy)*W + (x+dx)] with 'same'-padding zeros (bf16)."""
        shift = (-(dy * width + dx)) % S
        t = pltpu.roll(v, shift=shift, axis=1) if shift else v
        if dx == -1:
            t = t * masks[_NOT_FIRST_COL:_NOT_FIRST_COL + 1, :]
        elif dx == 1:
            t = t * masks[_NOT_LAST_COL:_NOT_LAST_COL + 1, :]
        if dy == -1:
            t = t * masks[_NOT_FIRST_ROW:_NOT_FIRST_ROW + 1, :]
        elif dy == 1:
            t = t * masks[_NOT_LAST_ROW:_NOT_LAST_ROW + 1, :]
        return t.astype(jnp.bfloat16)

    def conv3x3_relu(v, w_taps_ref, bias_col):
        """3x3 'same' conv as 9 accumulating MXU matmuls (bf16 in, f32 acc) + ReLU."""
        acc = None
        t = 0
        for dy in (-1, 0, 1):
            for dx in (-1, 0, 1):
                part = jnp.dot(w_taps_ref[t], shifted_tap(v, dy, dx),
                               preferred_element_type=jnp.float32)
                acc = part if acc is None else acc + part
                t += 1
        return jnp.maximum(acc + bias_col, 0.0)

    # ---------------- attention branch ----------------
    h = conv3x3_relu(x, w1_ref, b1_ref[...])                              # (Ch, S)
    att = jax.nn.sigmoid(
        jnp.sum(h * watt_ref[...], axis=0, keepdims=True) + batt_ref[0, 0])  # (1, S)
    att_ref[0] = att
    # Class head folded in: GAP commutes with the linear head, so the (S, nc)
    # class map never exists and only (1, nc) leaves the kernel.
    hsum = jnp.sum(h, axis=1, keepdims=True)                              # (Ch, 1)
    ab_ref[0] = (jnp.sum(hsum * wcls_ref[...], axis=0, keepdims=True) * inv_s
                 + bcls_ref[...])                                         # (1, nc)

    # ---------- gating + perception branch (x2 never leaves VMEM) ----------
    x2 = (1.0 + att) * x                                                  # (Cp, S)
    pf = conv3x3_relu(x2, wp_ref, bp_ref[...])                            # (Cf, S)
    feats_col = jnp.sum(pf, axis=1, keepdims=True) * inv_s                # (Cf, 1)
    feats_ref[0] = feats_col
    pb_ref[0] = jnp.sum(feats_col * wfc_ref[...], axis=0, keepdims=True) + bfc_ref[...]


def _abn_fused(x_cs, masks, w1, b1, watt, batt, wcls, bcls, wp, bp, wfc, bfc, *, width):
    B, Cp, S = x_cs.shape
    Ch = w1.shape[1]
    Cf = wp.shape[1]
    nc = wcls.shape[1]
    kernel = functools.partial(_abn_fused_kernel, width=width, inv_s=1.0 / S)

    const2 = lambda b: (0, 0)
    const3 = lambda b: (0, 0, 0)
    out_shape = (
        jax.ShapeDtypeStruct((B, 1, S), jnp.float32),    # attention map
        jax.ShapeDtypeStruct((B, 1, nc), jnp.float32),   # ab_output
        jax.ShapeDtypeStruct((B, Cf, 1), jnp.float32),   # feats column
        jax.ShapeDtypeStruct((B, 1, nc), jnp.float32),   # pb_output
    )
    return pl.pallas_call(
        kernel,
        out_shape=out_shape,
        grid=(B,),                         # one image per step; steps independent
        in_specs=[
            pl.BlockSpec((1, Cp, S), lambda b: (b, 0, 0)),      # x (per image)
            pl.BlockSpec((4, S), const2),                       # edge masks
            pl.BlockSpec((9, Ch, Cp), const3),                  # attention conv taps
            pl.BlockSpec((Ch, 1), const2),                      # attention conv bias
            pl.BlockSpec((Ch, 1), const2),                      # attention-map head w
            pl.BlockSpec(memory_space=pltpu.MemorySpace.SMEM),  # attention-map head b
            pl.BlockSpec((Ch, nc), const2),                     # class head weight
            pl.BlockSpec((1, nc), const2),                      # class head bias
            pl.BlockSpec((9, Cf, Cp), const3),                  # perception conv taps
            pl.BlockSpec((Cf, 1), const2),                      # perception conv bias
            pl.BlockSpec((Cf, nc), const2),                     # perception FC weight
            pl.BlockSpec((1, nc), const2),                      # perception FC bias
        ],
        out_specs=(
            pl.BlockSpec((1, 1, S), lambda b: (b, 0, 0)),
            pl.BlockSpec((1, 1, nc), lambda b: (b, 0, 0)),
            pl.BlockSpec((1, Cf, 1), lambda b: (b, 0, 0)),
            pl.BlockSpec((1, 1, nc), lambda b: (b, 0, 0)),
        ),
        compiler_params=pltpu.CompilerParams(dimension_semantics=("parallel",)),
    )(x_cs, masks, w1, b1, watt, batt, wcls, bcls, wp, bp, wfc, bfc)


# ----------------------------- params & forward -----------------------------

def init_params(key, cin, ch, cf, nc):
    ks = jax.random.split(key, 5)
    s = 0.1
    return {
        # attention branch: conv3x3 stem, 1x1 attention-map head, class head
        "a_conv1_w": s * jax.random.normal(ks[0], (ch, cin, 3, 3), jnp.float32),
        "a_conv1_b": jnp.zeros((ch,), jnp.float32),
        "a_att_w":   s * jax.random.normal(ks[1], (ch, 1), jnp.float32),
        "a_att_b":   jnp.zeros((1,), jnp.float32),
        "a_cls_w":   s * jax.random.normal(ks[2], (ch, nc), jnp.float32),
        "a_cls_b":   jnp.zeros((nc,), jnp.float32),
        # perception branch: conv3x3 stem, global pool, FC head
        "p_conv_w":  s * jax.random.normal(ks[3], (cf, cin, 3, 3), jnp.float32),
        "p_conv_b":  jnp.zeros((cf,), jnp.float32),
        "p_fc_w":    s * jax.random.normal(ks[4], (cf, nc), jnp.float32),
        "p_fc_b":    jnp.zeros((nc,), jnp.float32),
    }


def attention_branch_network(params, x_nchw):
    """Forward pass matching the PyTorch module's structure (single fused kernel)."""
    B, Cin, H, W = x_nchw.shape
    S = H * W
    Ch = params["a_conv1_w"].shape[0]
    Cf = params["p_conv_w"].shape[0]
    nc = params["a_cls_w"].shape[1]
    # pad channel rows to a multiple of 16 (bf16 packs 2 rows/sublane)
    Cp = -(-Cin // 16) * 16

    # Channel-first slab: the ONLY host-side data prep is this reshape + tiny pad.
    x_cs = _pad_axis_to(x_nchw.reshape(B, Cin, S), 1, Cp)                  # (B, Cp, S) f32

    # 0/1 edge masks recreating 'same' padding for the in-kernel rolled taps.
    col = jnp.arange(S, dtype=jnp.int32) % W
    row = jnp.arange(S, dtype=jnp.int32) // W
    masks = jnp.stack([col != 0, col != W - 1, row != 0, row != H - 1]
                      ).astype(jnp.float32)                                # (4, S)

    def conv_taps(w):  # (Cout, Cin, 3, 3) -> (9, Cout, Cp) bf16, tap order (ky, kx)
        t = jnp.transpose(w, (2, 3, 0, 1)).reshape(9, w.shape[0], Cin)
        return _pad_axis_to(t, 2, Cp).astype(jnp.bfloat16)

    att, ab, feats_col, pb = _abn_fused(
        x_cs, masks,
        conv_taps(params["a_conv1_w"]), params["a_conv1_b"].reshape(Ch, 1),
        params["a_att_w"].reshape(Ch, 1), params["a_att_b"].reshape(1, 1),
        params["a_cls_w"], params["a_cls_b"].reshape(1, nc),
        conv_taps(params["p_conv_w"]), params["p_conv_b"].reshape(Cf, 1),
        params["p_fc_w"], params["p_fc_b"].reshape(1, nc),
        width=W)

    attention_maps = att.reshape(B, 1, H, W)     # pure reshape, lane-dense store
    ab_output = ab[:, 0, :]                      # (B, nc)
    feats = feats_col[:, :, 0]                   # (B, Cf)
    pb_output = pb[:, 0, :]                      # (B, nc)
    return ((feats, pb_output), ab_output, attention_maps)


# ----------------------------- pure-JAX reference -----------------------------

def _reference_forward(params, x_nchw):
    """f32 reference with the ORIGINAL op order (class map computed then pooled)."""
    B, Cin, H, W = x_nchw.shape
    S = H * W
    K = 9 * Cin

    def conv3x3(x, w, b):  # x: (B,Cin,H,W), w: (Cout,Cin,3,3) -> (B, S, Cout)
        patches = _im2col_shifts(x).transpose(0, 3, 4, 1, 2).reshape(B, S, K)
        wm = w.transpose(2, 3, 1, 0).reshape(K, -1)
        return patches @ wm + b

    h = jnp.maximum(conv3x3(x_nchw, params["a_conv1_w"], params["a_conv1_b"]), 0.0)
    att = jax.nn.sigmoid(h @ params["a_att_w"] + params["a_att_b"])    # (B, S, 1)
    cls_map = h @ params["a_cls_w"] + params["a_cls_b"]                # (B, S, nc)
    ab_output = jnp.mean(cls_map, axis=1)                              # (B, nc)
    attention_maps = att.reshape(B, 1, H, W)
    x2 = (1.0 + attention_maps) * x_nchw
    pf = jnp.maximum(conv3x3(x2, params["p_conv_w"], params["p_conv_b"]), 0.0)
    feats = jnp.mean(pf, axis=1)                                       # (B, Cf)
    pb_output = feats @ params["p_fc_w"] + params["p_fc_b"]
    return ((feats, pb_output), ab_output, attention_maps)


# ----------------------------- driver -----------------------------

if __name__ == "__main__":
    key = jax.random.PRNGKey(0)
    kx, kprm = jax.random.split(key)

    B, Cin, H, W = 2, 4, 16, 16        # small synthetic image-like input
    Ch, Cf, NC = 128, 128, 2           # channel widths chosen as lane/MXU multiples

    x = jax.random.normal(kx, (B, Cin, H, W), jnp.float32)
    params = init_params(kprm, Cin, Ch, Cf, NC)

    fwd = jax.jit(functools.partial(attention_branch_network, params))
    (feats, pb_output), ab_output, attention_maps = fwd(x)
    jax.block_until_ready((feats, pb_output, ab_output, attention_maps))

    assert feats.shape == (B, Cf)
    assert pb_output.shape == (B, NC)
    assert ab_output.shape == (B, NC)
    assert attention_maps.shape == (B, 1, H, W)

    # Correctness vs. pure-JAX f32 reference (bf16 MXU operands -> loose tolerance).
    (rf, rpb), rab, ratt = _reference_forward(params, x)
    np.testing.assert_allclose(np.asarray(attention_maps), np.asarray(ratt), atol=5e-2, rtol=5e-2)
    np.testing.assert_allclose(np.asarray(ab_output), np.asarray(rab), atol=5e-2, rtol=5e-2)
    np.testing.assert_allclose(np.asarray(feats), np.asarray(rf), atol=5e-2, rtol=5e-2)
    np.testing.assert_allclose(np.asarray(pb_output), np.asarray(rpb), atol=5e-2, rtol=5e-2)

    print("KERNEL_OK")
</pallas_src>

<mosaic_0001>
module attributes {stable_mosaic.version = 11 : i64} {
  func.func @_abn_fused_kernel(%arg0: i32, %arg1: memref<1x16x256xf32, #tpu.memory_space<vmem>>, %arg2: memref<4x256xf32, #tpu.memory_space<vmem>>, %arg3: memref<9x128x16xbf16, #tpu.memory_space<vmem>>, %arg4: memref<128x1xf32, #tpu.memory_space<vmem>>, %arg5: memref<128x1xf32, #tpu.memory_space<vmem>>, %arg6: memref<1x1xf32, #tpu.memory_space<smem>>, %arg7: memref<128x2xf32, #tpu.memory_space<vmem>>, %arg8: memref<1x2xf32, #tpu.memory_space<vmem>>, %arg9: memref<9x128x16xbf16, #tpu.memory_space<vmem>>, %arg10: memref<128x1xf32, #tpu.memory_space<vmem>>, %arg11: memref<128x2xf32, #tpu.memory_space<vmem>>, %arg12: memref<1x2xf32, #tpu.memory_space<vmem>>, %arg13: memref<1x1x256xf32, #tpu.memory_space<vmem>>, %arg14: memref<1x1x2xf32, #tpu.memory_space<vmem>>, %arg15: memref<1x128x1xf32, #tpu.memory_space<vmem>>, %arg16: memref<1x1x2xf32, #tpu.memory_space<vmem>>) attributes {dimension_semantics = [#tpu.dimension_semantics<parallel>], iteration_bounds = array<i64: 2>, scalar_prefetch = 0 : i64, scratch_operands = 0 : i64, tpu.core_type = #tpu.core_type<tc>, window_params = [{transform_indices = @transform_0, window_bounds = array<i64: 1, 16, 256>}, {pipeline_mode = #tpu.pipeline_mode<synchronous>, transform_indices = @transform_1, window_bounds = array<i64: 4, 256>}, {pipeline_mode = #tpu.pipeline_mode<synchronous>, transform_indices = @transform_2, window_bounds = array<i64: 9, 128, 16>}, {pipeline_mode = #tpu.pipeline_mode<synchronous>, transform_indices = @transform_3, window_bounds = array<i64: 128, 1>}, {pipeline_mode = #tpu.pipeline_mode<synchronous>, transform_indices = @transform_4, window_bounds = array<i64: 128, 1>}, {transform_indices = @transform_5, window_bounds = array<i64: 1, 1>}, {pipeline_mode = #tpu.pipeline_mode<synchronous>, transform_indices = @transform_6, window_bounds = array<i64: 128, 2>}, {pipeline_mode = #tpu.pipeline_mode<synchronous>, transform_indices = @transform_7, window_bounds = array<i64: 1, 2>}, {pipeline_mode = #tpu.pipeline_mode<synchronous>, transform_indices = @transform_8, window_bounds = array<i64: 9, 128, 16>}, {pipeline_mode = #tpu.pipeline_mode<synchronous>, transform_indices = @transform_9, window_bounds = array<i64: 128, 1>}, {pipeline_mode = #tpu.pipeline_mode<synchronous>, transform_indices = @transform_10, window_bounds = array<i64: 128, 2>}, {pipeline_mode = #tpu.pipeline_mode<synchronous>, transform_indices = @transform_11, window_bounds = array<i64: 1, 2>}, {transform_indices = @transform_12, window_bounds = array<i64: 1, 1, 256>}, {transform_indices = @transform_13, window_bounds = array<i64: 1, 1, 2>}, {transform_indices = @transform_14, window_bounds = array<i64: 1, 128, 1>}, {transform_indices = @transform_15, window_bounds = array<i64: 1, 1, 2>}]} {
    %c0 = arith.constant 0 : index
    %c0_0 = arith.constant 0 : index
    %c0_1 = arith.constant 0 : index
    %0 = vector.load %arg1[%c0, %c0_0, %c0_1] : memref<1x16x256xf32, #tpu.memory_space<vmem>>, vector<1x16x256xf32>
    %1 = vector.shape_cast %0 : vector<1x16x256xf32> to vector<16x256xf32>
    %c0_2 = arith.constant 0 : index
    %c0_3 = arith.constant 0 : index
    %2 = vector.load %arg2[%c0_2, %c0_3] : memref<4x256xf32, #tpu.memory_space<vmem>>, vector<4x256xf32>
    %c0_4 = arith.constant 0 : index
    %c0_5 = arith.constant 0 : index
    %3 = vector.load %arg4[%c0_4, %c0_5] : memref<128x1xf32, #tpu.memory_space<vmem>>, vector<128x1xf32>
    %c0_6 = arith.constant 0 : index
    %c0_7 = arith.constant 0 : index
    %c0_8 = arith.constant 0 : index
    %4 = vector.load %arg3[%c0_6, %c0_7, %c0_8] : memref<9x128x16xbf16, #tpu.memory_space<vmem>>, vector<1x128x16xbf16>
    %5 = vector.shape_cast %4 : vector<1x128x16xbf16> to vector<128x16xbf16>
    %c17_i32 = arith.constant 17 : i32
    %6 = tpu.dynamic_rotate %1 by %c17_i32 dim 1 : vector<16x256xf32>, i32 -> vector<16x256xf32>
    %7 = vector.extract_strided_slice %2 {offsets = [0, 0], sizes = [1, 256], strides = [1, 1]} : vector<4x256xf32> to vector<1x256xf32>
    %8 = vector.broadcast %7 : vector<1x256xf32> to vector<16x256xf32>
    %9 = arith.mulf %6, %8 : vector<16x256xf32>
    %10 = vector.extract_strided_slice %2 {offsets = [2, 0], sizes = [1, 256], strides = [1, 1]} : vector<4x256xf32> to vector<1x256xf32>
    %11 = vector.broadcast %10 : vector<1x256xf32> to vector<16x256xf32>
    %12 = arith.mulf %9, %11 : vector<16x256xf32>
    %13 = arith.truncf %12 : vector<16x256xf32> to vector<16x256xbf16>
    %cst = arith.constant dense<0.000000e+00> : vector<128x256xf32>
    %14 = tpu.matmul %5, %13, %cst {dimension_numbers = #tpu.dot_dimension_numbers<[1], [0], [0], [1], [0, 0, 1, 1], [], []>} : vector<128x16xbf16>, vector<16x256xbf16>, vector<128x256xf32> -> vector<128x256xf32>
    %c1 = arith.constant 1 : index
    %c0_9 = arith.constant 0 : index
    %c0_10 = arith.constant 0 : index
    %15 = vector.load %arg3[%c1, %c0_9, %c0_10] : memref<9x128x16xbf16, #tpu.memory_space<vmem>>, vector<1x128x16xbf16>
    %16 = vector.shape_cast %15 : vector<1x128x16xbf16> to vector<128x16xbf16>
    %c16_i32 = arith.constant 16 : i32
    %17 = tpu.dynamic_rotate %1 by %c16_i32 dim 1 : vector<16x256xf32>, i32 -> vector<16x256xf32>
    %18 = vector.extract_strided_slice %2 {offsets = [2, 0], sizes = [1, 256], strides = [1, 1]} : vector<4x256xf32> to vector<1x256xf32>
    %19 = vector.broadcast %18 : vector<1x256xf32> to vector<16x256xf32>
    %20 = arith.mulf %17, %19 : vector<16x256xf32>
    %21 = arith.truncf %20 : vector<16x256xf32> to vector<16x256xbf16>
    %cst_11 = arith.constant dense<0.000000e+00> : vector<128x256xf32>
    %22 = tpu.matmul %16, %21, %cst_11 {dimension_numbers = #tpu.dot_dimension_numbers<[1], [0], [0], [1], [0, 0, 1, 1], [], []>} : vector<128x16xbf16>, vector<16x256xbf16>, vector<128x256xf32> -> vector<128x256xf32>
    %23 = arith.addf %14, %22 : vector<128x256xf32>
    %c2 = arith.constant 2 : index
    %c0_12 = arith.constant 0 : index
    %c0_13 = arith.constant 0 : index
    %24 = vector.load %arg3[%c2, %c0_12, %c0_13] : memref<9x128x16xbf16, #tpu.memory_space<vmem>>, vector<1x128x16xbf16>
    %25 = vector.shape_cast %24 : vector<1x128x16xbf16> to vector<128x16xbf16>
    %c15_i32 = arith.constant 15 : i32
    %26 = tpu.dynamic_rotate %1 by %c15_i32 dim 1 : vector<16x256xf32>, i32 -> vector<16x256xf32>
    %27 = vector.extract_strided_slice %2 {offsets = [1, 0], sizes = [1, 256], strides = [1, 1]} : vector<4x256xf32> to vector<1x256xf32>
    %28 = vector.broadcast %27 : vector<1x256xf32> to vector<16x256xf32>
    %29 = arith.mulf %26, %28 : vector<16x256xf32>
    %30 = vector.extract_strided_slice %2 {offsets = [2, 0], sizes = [1, 256], strides = [1, 1]} : vector<4x256xf32> to vector<1x256xf32>
    %31 = vector.broadcast %30 : vector<1x256xf32> to vector<16x256xf32>
    %32 = arith.mulf %29, %31 : vector<16x256xf32>
    %33 = arith.truncf %32 : vector<16x256xf32> to vector<16x256xbf16>
    %cst_14 = arith.constant dense<0.000000e+00> : vector<128x256xf32>
    %34 = tpu.matmul %25, %33, %cst_14 {dimension_numbers = #tpu.dot_dimension_numbers<[1], [0], [0], [1], [0, 0, 1, 1], [], []>} : vector<128x16xbf16>, vector<16x256xbf16>, vector<128x256xf32> -> vector<128x256xf32>
    %35 = arith.addf %23, %34 : vector<128x256xf32>
    %c3 = arith.constant 3 : index
    %c0_15 = arith.constant 0 : index
    %c0_16 = arith.constant 0 : index
    %36 = vector.load %arg3[%c3, %c0_15, %c0_16] : memref<9x128x16xbf16, #tpu.memory_space<vmem>>, vector<1x128x16xbf16>
    %37 = vector.shape_cast %36 : vector<1x128x16xbf16> to vector<128x16xbf16>
    %c1_i32 = arith.constant 1 : i32
    %38 = tpu.dynamic_rotate %1 by %c1_i32 dim 1 : vector<16x256xf32>, i32 -> vector<16x256xf32>
    %39 = vector.extract_strided_slice %2 {offsets = [0, 0], sizes = [1, 256], strides = [1, 1]} : vector<4x256xf32> to vector<1x256xf32>
    %40 = vector.broadcast %39 : vector<1x256xf32> to vector<16x256xf32>
    %41 = arith.mulf %38, %40 : vector<16x256xf32>
    %42 = arith.truncf %41 : vector<16x256xf32> to vector<16x256xbf16>
    %cst_17 = arith.constant dense<0.000000e+00> : vector<128x256xf32>
    %43 = tpu.matmul %37, %42, %cst_17 {dimension_numbers = #tpu.dot_dimension_numbers<[1], [0], [0], [1], [0, 0, 1, 1], [], []>} : vector<128x16xbf16>, vector<16x256xbf16>, vector<128x256xf32> -> vector<128x256xf32>
    %44 = arith.addf %35, %43 : vector<128x256xf32>
    %c4 = arith.constant 4 : index
    %c0_18 = arith.constant 0 : index
    %c0_19 = arith.constant 0 : index
    %45 = vector.load %arg3[%c4, %c0_18, %c0_19] : memref<9x128x16xbf16, #tpu.memory_space<vmem>>, vector<1x128x16xbf16>
    %46 = vector.shape_cast %45 : vector<1x128x16xbf16> to vector<128x16xbf16>
    %47 = arith.truncf %1 : vector<16x256xf32> to vector<16x256xbf16>
    %cst_20 = arith.constant dense<0.000000e+00> : vector<128x256xf32>
    %48 = tpu.matmul %46, %47, %cst_20 {dimension_numbers = #tpu.dot_dimension_numbers<[1], [0], [0], [1], [0, 0, 1, 1], [], []>} : vector<128x16xbf16>, vector<16x256xbf16>, vector<128x256xf32> -> vector<128x256xf32>
    %49 = arith.addf %44, %48 : vector<128x256xf32>
    %c5 = arith.constant 5 : index
    %c0_21 = arith.constant 0 : index
    %c0_22 = arith.constant 0 : index
    %50 = vector.load %arg3[%c5, %c0_21, %c0_22] : memref<9x128x16xbf16, #tpu.memory_space<vmem>>, vector<1x128x16xbf16>
    %51 = vector.shape_cast %50 : vector<1x128x16xbf16> to vector<128x16xbf16>
    %c255_i32 = arith.constant 255 : i32
    %52 = tpu.dynamic_rotate %1 by %c255_i32 dim 1 : vector<16x256xf32>, i32 -> vector<16x256xf32>
    %53 = vector.extract_strided_slice %2 {offsets = [1, 0], sizes = [1, 256], strides = [1, 1]} : vector<4x256xf32> to vector<1x256xf32>
    %54 = vector.broadcast %53 : vector<1x256xf32> to vector<16x256xf32>
    %55 = arith.mulf %52, %54 : vector<16x256xf32>
    %56 = arith.truncf %55 : vector<16x256xf32> to vector<16x256xbf16>
    %cst_23 = arith.constant dense<0.000000e+00> : vector<128x256xf32>
    %57 = tpu.matmul %51, %56, %cst_23 {dimension_numbers = #tpu.dot_dimension_numbers<[1], [0], [0], [1], [0, 0, 1, 1], [], []>} : vector<128x16xbf16>, vector<16x256xbf16>, vector<128x256xf32> -> vector<128x256xf32>
    %58 = arith.addf %49, %57 : vector<128x256xf32>
    %c6 = arith.constant 6 : index
    %c0_24 = arith.constant 0 : index
    %c0_25 = arith.constant 0 : index
    %59 = vector.load %arg3[%c6, %c0_24, %c0_25] : memref<9x128x16xbf16, #tpu.memory_space<vmem>>, vector<1x128x16xbf16>
    %60 = vector.shape_cast %59 : vector<1x128x16xbf16> to vector<128x16xbf16>
    %c241_i32 = arith.constant 241 : i32
    %61 = tpu.dynamic_rotate %1 by %c241_i32 dim 1 : vector<16x256xf32>, i32 -> vector<16x256xf32>
    %62 = vector.extract_strided_slice %2 {offsets = [0, 0], sizes = [1, 256], strides = [1, 1]} : vector<4x256xf32> to vector<1x256xf32>
    %63 = vector.broadcast %62 : vector<1x256xf32> to vector<16x256xf32>
    %64 = arith.mulf %61, %63 : vector<16x256xf32>
    %65 = vector.extract_strided_slice %2 {offsets = [3, 0], sizes = [1, 256], strides = [1, 1]} : vector<4x256xf32> to vector<1x256xf32>
    %66 = vector.broadcast %65 : vector<1x256xf32> to vector<16x256xf32>
    %67 = arith.mulf %64, %66 : vector<16x256xf32>
    %68 = arith.truncf %67 : vector<16x256xf32> to vector<16x256xbf16>
    %cst_26 = arith.constant dense<0.000000e+00> : vector<128x256xf32>
    %69 = tpu.matmul %60, %68, %cst_26 {dimension_numbers = #tpu.dot_dimension_numbers<[1], [0], [0], [1], [0, 0, 1, 1], [], []>} : vector<128x16xbf16>, vector<16x256xbf16>, vector<128x256xf32> -> vector<128x256xf32>
    %70 = arith.addf %58, %69 : vector<128x256xf32>
    %c7 = arith.constant 7 : index
    %c0_27 = arith.constant 0 : index
    %c0_28 = arith.constant 0 : index
    %71 = vector.load %arg3[%c7, %c0_27, %c0_28] : memref<9x128x16xbf16, #tpu.memory_space<vmem>>, vector<1x128x16xbf16>
    %72 = vector.shape_cast %71 : vector<1x128x16xbf16> to vector<128x16xbf16>
    %c240_i32 = arith.constant 240 : i32
    %73 = tpu.dynamic_rotate %1 by %c240_i32 dim 1 : vector<16x256xf32>, i32 -> vector<16x256xf32>
    %74 = vector.extract_strided_slice %2 {offsets = [3, 0], sizes = [1, 256], strides = [1, 1]} : vector<4x256xf32> to vector<1x256xf32>
    %75 = vector.broadcast %74 : vector<1x256xf32> to vector<16x256xf32>
    %76 = arith.mulf %73, %75 : vector<16x256xf32>
    %77 = arith.truncf %76 : vector<16x256xf32> to vector<16x256xbf16>
    %cst_29 = arith.constant dense<0.000000e+00> : vector<128x256xf32>
    %78 = tpu.matmul %72, %77, %cst_29 {dimension_numbers = #tpu.dot_dimension_numbers<[1], [0], [0], [1], [0, 0, 1, 1], [], []>} : vector<128x16xbf16>, vector<16x256xbf16>, vector<128x256xf32> -> vector<128x256xf32>
    %79 = arith.addf %70, %78 : vector<128x256xf32>
    %c8 = arith.constant 8 : index
    %c0_30 = arith.constant 0 : index
    %c0_31 = arith.constant 0 : index
    %80 = vector.load %arg3[%c8, %c0_30, %c0_31] : memref<9x128x16xbf16, #tpu.memory_space<vmem>>, vector<1x128x16xbf16>
    %81 = vector.shape_cast %80 : vector<1x128x16xbf16> to vector<128x16xbf16>
    %c239_i32 = arith.constant 239 : i32
    %82 = tpu.dynamic_rotate %1 by %c239_i32 dim 1 : vector<16x256xf32>, i32 -> vector<16x256xf32>
    %83 = vector.extract_strided_slice %2 {offsets = [1, 0], sizes = [1, 256], strides = [1, 1]} : vector<4x256xf32> to vector<1x256xf32>
    %84 = vector.broadcast %83 : vector<1x256xf32> to vector<16x256xf32>
    %85 = arith.mulf %82, %84 : vector<16x256xf32>
    %86 = vector.extract_strided_slice %2 {offsets = [3, 0], sizes = [1, 256], strides = [1, 1]} : vector<4x256xf32> to vector<1x256xf32>
    %87 = vector.broadcast %86 : vector<1x256xf32> to vector<16x256xf32>
    %88 = arith.mulf %85, %87 : vector<16x256xf32>
    %89 = arith.truncf %88 : vector<16x256xf32> to vector<16x256xbf16>
    %cst_32 = arith.constant dense<0.000000e+00> : vector<128x256xf32>
    %90 = tpu.matmul %81, %89, %cst_32 {dimension_numbers = #tpu.dot_dimension_numbers<[1], [0], [0], [1], [0, 0, 1, 1], [], []>} : vector<128x16xbf16>, vector<16x256xbf16>, vector<128x256xf32> -> vector<128x256xf32>
    %91 = arith.addf %79, %90 : vector<128x256xf32>
    %92 = vector.broadcast %3 : vector<128x1xf32> to vector<128x256xf32>
    %93 = arith.addf %91, %92 : vector<128x256xf32>
    %cst_33 = arith.constant 0.000000e+00 : f32
    %94 = vector.broadcast %cst_33 : f32 to vector<128x256xf32>
    %95 = arith.maximumf %93, %94 : vector<128x256xf32>
    %c0_34 = arith.constant 0 : index
    %c0_35 = arith.constant 0 : index
    %96 = vector.load %arg5[%c0_34, %c0_35] : memref<128x1xf32, #tpu.memory_space<vmem>>, vector<128x1xf32>
    %97 = vector.broadcast %96 : vector<128x1xf32> to vector<128x256xf32>
    %98 = arith.mulf %95, %97 : vector<128x256xf32>
    %cst_36 = arith.constant dense<0.000000e+00> : vector<256xf32>
    %99 = vector.multi_reduction <add>, %98, %cst_36 [0] : vector<128x256xf32> to vector<256xf32>
    %100 = vector.shape_cast %99 : vector<256xf32> to vector<1x256xf32>
    %c0_37 = arith.constant 0 : index
    %c0_38 = arith.constant 0 : index
    %101 = memref.load %arg6[%c0_37, %c0_38] : memref<1x1xf32, #tpu.memory_space<smem>>
    %102 = vector.broadcast %101 : f32 to vector<1x256xf32>
    %103 = arith.addf %100, %102 : vector<1x256xf32>
    %104 = arith.negf %103 : vector<1x256xf32>
    %105 = math.exp %104 : vector<1x256xf32>
    %cst_39 = arith.constant 1.000000e+00 : f32
    %106 = vector.broadcast %cst_39 : f32 to vector<1x256xf32>
    %107 = arith.addf %106, %105 : vector<1x256xf32>
    %108 = arith.divf %106, %107 : vector<1x256xf32>
    %c0_40 = arith.constant 0 : index
    %c0_41 = arith.constant 0 : index
    %c0_42 = arith.constant 0 : index
    %109 = vector.load %arg13[%c0_40, %c0_41, %c0_42] : memref<1x1x256xf32, #tpu.memory_space<vmem>>, vector<1x1x256xf32>
    %110 = vector.shape_cast %109 : vector<1x1x256xf32> to vector<1x256xf32>
    %111 = vector.shape_cast %108 : vector<1x256xf32> to vector<1x1x256xf32>
    tpu.vector_store %arg13[%c0_40, %c0_41, %c0_42], %111 {strides = array<i32>} : memref<1x1x256xf32, #tpu.memory_space<vmem>>, vector<1x1x256xf32>,
    %cst_43 = arith.constant dense<0.000000e+00> : vector<128xf32>
    %112 = vector.multi_reduction <add>, %95, %cst_43 [1] : vector<128x256xf32> to vector<128xf32>
    %113 = vector.shape_cast %112 : vector<128xf32> to vector<128x1xf32>
    %c0_44 = arith.constant 0 : index
    %c0_45 = arith.constant 0 : index
    %114 = vector.load %arg7[%c0_44, %c0_45] : memref<128x2xf32, #tpu.memory_space<vmem>>, vector<128x2xf32>
    %115 = vector.broadcast %113 : vector<128x1xf32> to vector<128x2xf32>
    %116 = arith.mulf %115, %114 : vector<128x2xf32>
    %cst_46 = arith.constant dense<0.000000e+00> : vector<2xf32>
    %117 = vector.multi_reduction <add>, %116, %cst_46 [0] : vector<128x2xf32> to vector<2xf32>
    %118 = vector.shape_cast %117 : vector<2xf32> to vector<1x2xf32>
    %cst_47 = arith.constant 3.906250e-03 : f32
    %119 = vector.broadcast %cst_47 : f32 to vector<1x2xf32>
    %120 = arith.mulf %118, %119 : vector<1x2xf32>
    %c0_48 = arith.constant 0 : index
    %c0_49 = arith.constant 0 : index
    %121 = vector.load %arg8[%c0_48, %c0_49] : memref<1x2xf32, #tpu.memory_space<vmem>>, vector<1x2xf32>
    %122 = arith.addf %120, %121 : vector<1x2xf32>
    %c0_50 = arith.constant 0 : index
    %c0_51 = arith.constant 0 : index
    %c0_52 = arith.constant 0 : index
    %123 = vector.load %arg14[%c0_50, %c0_51, %c0_52] : memref<1x1x2xf32, #tpu.memory_space<vmem>>, vector<1x1x2xf32>
    %124 = vector.shape_cast %123 : vector<1x1x2xf32> to vector<1x2xf32>
    %125 = vector.shape_cast %122 : vector<1x2xf32> to vector<1x1x2xf32>
    tpu.vector_store %arg14[%c0_50, %c0_51, %c0_52], %125 {strides = array<i32>} : memref<1x1x2xf32, #tpu.memory_space<vmem>>, vector<1x1x2xf32>,
    %cst_53 = arith.constant 1.000000e+00 : f32
    %126 = vector.broadcast %cst_53 : f32 to vector<1x256xf32>
    %127 = arith.addf %126, %108 : vector<1x256xf32>
    %128 = vector.broadcast %127 : vector<1x256xf32> to vector<16x256xf32>
    %129 = arith.mulf %128, %1 : vector<16x256xf32>
    %c0_54 = arith.constant 0 : index
    %c0_55 = arith.constant 0 : index
    %130 = vector.load %arg10[%c0_54, %c0_55] : memref<128x1xf32, #tpu.memory_space<vmem>>, vector<128x1xf32>
    %c0_56 = arith.constant 0 : index
    %c0_57 = arith.constant 0 : index
    %c0_58 = arith.constant 0 : index
    %131 = vector.load %arg9[%c0_56, %c0_57, %c0_58] : memref<9x128x16xbf16, #tpu.memory_space<vmem>>, vector<1x128x16xbf16>
    %132 = vector.shape_cast %131 : vector<1x128x16xbf16> to vector<128x16xbf16>
    %c17_i32_59 = arith.constant 17 : i32
    %133 = tpu.dynamic_rotate %129 by %c17_i32_59 dim 1 : vector<16x256xf32>, i32 -> vector<16x256xf32>
    %134 = vector.extract_strided_slice %2 {offsets = [0, 0], sizes = [1, 256], strides = [1, 1]} : vector<4x256xf32> to vector<1x256xf32>
    %135 = vector.broadcast %134 : vector<1x256xf32> to vector<16x256xf32>
    %136 = arith.mulf %133, %135 : vector<16x256xf32>
    %137 = vector.extract_strided_slice %2 {offsets = [2, 0], sizes = [1, 256], strides = [1, 1]} : vector<4x256xf32> to vector<1x256xf32>
    %138 = vector.broadcast %137 : vector<1x256xf32> to vector<16x256xf32>
    %139 = arith.mulf %136, %138 : vector<16x256xf32>
    %140 = arith.truncf %139 : vector<16x256xf32> to vector<16x256xbf16>
    %cst_60 = arith.constant dense<0.000000e+00> : vector<128x256xf32>
    %141 = tpu.matmul %132, %140, %cst_60 {dimension_numbers = #tpu.dot_dimension_numbers<[1], [0], [0], [1], [0, 0, 1, 1], [], []>} : vector<128x16xbf16>, vector<16x256xbf16>, vector<128x256xf32> -> vector<128x256xf32>
    %c1_61 = arith.constant 1 : index
    %c0_62 = arith.constant 0 : index
    %c0_63 = arith.constant 0 : index
    %142 = vector.load %arg9[%c1_61, %c0_62, %c0_63] : memref<9x128x16xbf16, #tpu.memory_space<vmem>>, vector<1x128x16xbf16>
    %143 = vector.shape_cast %142 : vector<1x128x16xbf16> to vector<128x16xbf16>
    %c16_i32_64 = arith.constant 16 : i32
    %144 = tpu.dynamic_rotate %129 by %c16_i32_64 dim 1 : vector<16x256xf32>, i32 -> vector<16x256xf32>
    %145 = vector.extract_strided_slice %2 {offsets = [2, 0], sizes = [1, 256], strides = [1, 1]} : vector<4x256xf32> to vector<1x256xf32>
    %146 = vector.broadcast %145 : vector<1x256xf32> to vector<16x256xf32>
    %147 = arith.mulf %144, %146 : vector<16x256xf32>
    %148 = arith.truncf %147 : vector<16x256xf32> to vector<16x256xbf16>
    %cst_65 = arith.constant dense<0.000000e+00> : vector<128x256xf32>
    %149 = tpu.matmul %143, %148, %cst_65 {dimension_numbers = #tpu.dot_dimension_numbers<[1], [0], [0], [1], [0, 0, 1, 1], [], []>} : vector<128x16xbf16>, vector<16x256xbf16>, vector<128x256xf32> -> vector<128x256xf32>
    %150 = arith.addf %141, %149 : vector<128x256xf32>
    %c2_66 = arith.constant 2 : index
    %c0_67 = arith.constant 0 : index
    %c0_68 = arith.constant 0 : index
    %151 = vector.load %arg9[%c2_66, %c0_67, %c0_68] : memref<9x128x16xbf16, #tpu.memory_space<vmem>>, vector<1x128x16xbf16>
    %152 = vector.shape_cast %151 : vector<1x128x16xbf16> to vector<128x16xbf16>
    %c15_i32_69 = arith.constant 15 : i32
    %153 = tpu.dynamic_rotate %129 by %c15_i32_69 dim 1 : vector<16x256xf32>, i32 -> vector<16x256xf32>
    %154 = vector.extract_strided_slice %2 {offsets = [1, 0], sizes = [1, 256], strides = [1, 1]} : vector<4x256xf32> to vector<1x256xf32>
    %155 = vector.broadcast %154 : vector<1x256xf32> to vector<16x256xf32>
    %156 = arith.mulf %153, %155 : vector<16x256xf32>
    %157 = vector.extract_strided_slice %2 {offsets = [2, 0], sizes = [1, 256], strides = [1, 1]} : vector<4x256xf32> to vector<1x256xf32>
    %158 = vector.broadcast %157 : vector<1x256xf32> to vector<16x256xf32>
    %159 = arith.mulf %156, %158 : vector<16x256xf32>
    %160 = arith.truncf %159 : vector<16x256xf32> to vector<16x256xbf16>
    %cst_70 = arith.constant dense<0.000000e+00> : vector<128x256xf32>
    %161 = tpu.matmul %152, %160, %cst_70 {dimension_numbers = #tpu.dot_dimension_numbers<[1], [0], [0], [1], [0, 0, 1, 1], [], []>} : vector<128x16xbf16>, vector<16x256xbf16>, vector<128x256xf32> -> vector<128x256xf32>
    %162 = arith.addf %150, %161 : vector<128x256xf32>
    %c3_71 = arith.constant 3 : index
    %c0_72 = arith.constant 0 : index
    %c0_73 = arith.constant 0 : index
    %163 = vector.load %arg9[%c3_71, %c0_72, %c0_73] : memref<9x128x16xbf16, #tpu.memory_space<vmem>>, vector<1x128x16xbf16>
    %164 = vector.shape_cast %163 : vector<1x128x16xbf16> to vector<128x16xbf16>
    %c1_i32_74 = arith.constant 1 : i32
    %165 = tpu.dynamic_rotate %129 by %c1_i32_74 dim 1 : vector<16x256xf32>, i32 -> vector<16x256xf32>
    %166 = vector.extract_strided_slice %2 {offsets = [0, 0], sizes = [1, 256], strides = [1, 1]} : vector<4x256xf32> to vector<1x256xf32>
    %167 = vector.broadcast %166 : vector<1x256xf32> to vector<16x256xf32>
    %168 = arith.mulf %165, %167 : vector<16x256xf32>
    %169 = arith.truncf %168 : vector<16x256xf32> to vector<16x256xbf16>
    %cst_75 = arith.constant dense<0.000000e+00> : vector<128x256xf32>
    %170 = tpu.matmul %164, %169, %cst_75 {dimension_numbers = #tpu.dot_dimension_numbers<[1], [0], [0], [1], [0, 0, 1, 1], [], []>} : vector<128x16xbf16>, vector<16x256xbf16>, vector<128x256xf32> -> vector<128x256xf32>
    %171 = arith.addf %162, %170 : vector<128x256xf32>
    %c4_76 = arith.constant 4 : index
    %c0_77 = arith.constant 0 : index
    %c0_78 = arith.constant 0 : index
    %172 = vector.load %arg9[%c4_76, %c0_77, %c0_78] : memref<9x128x16xbf16, #tpu.memory_space<vmem>>, vector<1x128x16xbf16>
    %173 = vector.shape_cast %172 : vector<1x128x16xbf16> to vector<128x16xbf16>
    %174 = arith.truncf %129 : vector<16x256xf32> to vector<16x256xbf16>
    %cst_79 = arith.constant dense<0.000000e+00> : vector<128x256xf32>
    %175 = tpu.matmul %173, %174, %cst_79 {dimension_numbers = #tpu.dot_dimension_numbers<[1], [0], [0], [1], [0, 0, 1, 1], [], []>} : vector<128x16xbf16>, vector<16x256xbf16>, vector<128x256xf32> -> vector<128x256xf32>
    %176 = arith.addf %171, %175 : vector<128x256xf32>
    %c5_80 = arith.constant 5 : index
    %c0_81 = arith.constant 0 : index
    %c0_82 = arith.constant 0 : index
    %177 = vector.load %arg9[%c5_80, %c0_81, %c0_82] : memref<9x128x16xbf16, #tpu.memory_space<vmem>>, vector<1x128x16xbf16>
    %178 = vector.shape_cast %177 : vector<1x128x16xbf16> to vector<128x16xbf16>
    %c255_i32_83 = arith.constant 255 : i32
    %179 = tpu.dynamic_rotate %129 by %c255_i32_83 dim 1 : vector<16x256xf32>, i32 -> vector<16x256xf32>
    %180 = vector.extract_strided_slice %2 {offsets = [1, 0], sizes = [1, 256], strides = [1, 1]} : vector<4x256xf32> to vector<1x256xf32>
    %181 = vector.broadcast %180 : vector<1x256xf32> to vector<16x256xf32>
    %182 = arith.mulf %179, %181 : vector<16x256xf32>
    %183 = arith.truncf %182 : vector<16x256xf32> to vector<16x256xbf16>
    %cst_84 = arith.constant dense<0.000000e+00> : vector<128x256xf32>
    %184 = tpu.matmul %178, %183, %cst_84 {dimension_numbers = #tpu.dot_dimension_numbers<[1], [0], [0], [1], [0, 0, 1, 1], [], []>} : vector<128x16xbf16>, vector<16x256xbf16>, vector<128x256xf32> -> vector<128x256xf32>
    %185 = arith.addf %176, %184 : vector<128x256xf32>
    %c6_85 = arith.constant 6 : index
    %c0_86 = arith.constant 0 : index
    %c0_87 = arith.constant 0 : index
    %186 = vector.load %arg9[%c6_85, %c0_86, %c0_87] : memref<9x128x16xbf16, #tpu.memory_space<vmem>>, vector<1x128x16xbf16>
    %187 = vector.shape_cast %186 : vector<1x128x16xbf16> to vector<128x16xbf16>
    %c241_i32_88 = arith.constant 241 : i32
    %188 = tpu.dynamic_rotate %129 by %c241_i32_88 dim 1 : vector<16x256xf32>, i32 -> vector<16x256xf32>
    %189 = vector.extract_strided_slice %2 {offsets = [0, 0], sizes = [1, 256], strides = [1, 1]} : vector<4x256xf32> to vector<1x256xf32>
    %190 = vector.broadcast %189 : vector<1x256xf32> to vector<16x256xf32>
    %191 = arith.mulf %188, %190 : vector<16x256xf32>
    %192 = vector.extract_strided_slice %2 {offsets = [3, 0], sizes = [1, 256], strides = [1, 1]} : vector<4x256xf32> to vector<1x256xf32>
    %193 = vector.broadcast %192 : vector<1x256xf32> to vector<16x256xf32>
    %194 = arith.mulf %191, %193 : vector<16x256xf32>
    %195 = arith.truncf %194 : vector<16x256xf32> to vector<16x256xbf16>
    %cst_89 = arith.constant dense<0.000000e+00> : vector<128x256xf32>
    %196 = tpu.matmul %187, %195, %cst_89 {dimension_numbers = #tpu.dot_dimension_numbers<[1], [0], [0], [1], [0, 0, 1, 1], [], []>} : vector<128x16xbf16>, vector<16x256xbf16>, vector<128x256xf32> -> vector<128x256xf32>
    %197 = arith.addf %185, %196 : vector<128x256xf32>
    %c7_90 = arith.constant 7 : index
    %c0_91 = arith.constant 0 : index
    %c0_92 = arith.constant 0 : index
    %198 = vector.load %arg9[%c7_90, %c0_91, %c0_92] : memref<9x128x16xbf16, #tpu.memory_space<vmem>>, vector<1x128x16xbf16>
    %199 = vector.shape_cast %198 : vector<1x128x16xbf16> to vector<128x16xbf16>
    %c240_i32_93 = arith.constant 240 : i32
    %200 = tpu.dynamic_rotate %129 by %c240_i32_93 dim 1 : vector<16x256xf32>, i32 -> vector<16x256xf32>
    %201 = vector.extract_strided_slice %2 {offsets = [3, 0], sizes = [1, 256], strides = [1, 1]} : vector<4x256xf32> to vector<1x256xf32>
    %202 = vector.broadcast %201 : vector<1x256xf32> to vector<16x256xf32>
    %203 = arith.mulf %200, %202 : vector<16x256xf32>
    %204 = arith.truncf %203 : vector<16x256xf32> to vector<16x256xbf16>
    %cst_94 = arith.constant dense<0.000000e+00> : vector<128x256xf32>
    %205 = tpu.matmul %199, %204, %cst_94 {dimension_numbers = #tpu.dot_dimension_numbers<[1], [0], [0], [1], [0, 0, 1, 1], [], []>} : vector<128x16xbf16>, vector<16x256xbf16>, vector<128x256xf32> -> vector<128x256xf32>
    %206 = arith.addf %197, %205 : vector<128x256xf32>
    %c8_95 = arith.constant 8 : index
    %c0_96 = arith.constant 0 : index
    %c0_97 = arith.constant 0 : index
    %207 = vector.load %arg9[%c8_95, %c0_96, %c0_97] : memref<9x128x16xbf16, #tpu.memory_space<vmem>>, vector<1x128x16xbf16>
    %208 = vector.shape_cast %207 : vector<1x128x16xbf16> to vector<128x16xbf16>
    %c239_i32_98 = arith.constant 239 : i32
    %209 = tpu.dynamic_rotate %129 by %c239_i32_98 dim 1 : vector<16x256xf32>, i32 -> vector<16x256xf32>
    %210 = vector.extract_strided_slice %2 {offsets = [1, 0], sizes = [1, 256], strides = [1, 1]} : vector<4x256xf32> to vector<1x256xf32>
    %211 = vector.broadcast %210 : vector<1x256xf32> to vector<16x256xf32>
    %212 = arith.mulf %209, %211 : vector<16x256xf32>
    %213 = vector.extract_strided_slice %2 {offsets = [3, 0], sizes = [1, 256], strides = [1, 1]} : vector<4x256xf32> to vector<1x256xf32>
    %214 = vector.broadcast %213 : vector<1x256xf32> to vector<16x256xf32>
    %215 = arith.mulf %212, %214 : vector<16x256xf32>
    %216 = arith.truncf %215 : vector<16x256xf32> to vector<16x256xbf16>
    %cst_99 = arith.constant dense<0.000000e+00> : vector<128x256xf32>
    %217 = tpu.matmul %208, %216, %cst_99 {dimension_numbers = #tpu.dot_dimension_numbers<[1], [0], [0], [1], [0, 0, 1, 1], [], []>} : vector<128x16xbf16>, vector<16x256xbf16>, vector<128x256xf32> -> vector<128x256xf32>
    %218 = arith.addf %206, %217 : vector<128x256xf32>
    %219 = vector.broadcast %130 : vector<128x1xf32> to vector<128x256xf32>
    %220 = arith.addf %218, %219 : vector<128x256xf32>
    %cst_100 = arith.constant 0.000000e+00 : f32
    %221 = vector.broadcast %cst_100 : f32 to vector<128x256xf32>
    %222 = arith.maximumf %220, %221 : vector<128x256xf32>
    %cst_101 = arith.constant dense<0.000000e+00> : vector<128xf32>
    %223 = vector.multi_reduction <add>, %222, %cst_101 [1] : vector<128x256xf32> to vector<128xf32>
    %224 = vector.shape_cast %223 : vector<128xf32> to vector<128x1xf32>
    %cst_102 = arith.constant 3.906250e-03 : f32
    %225 = vector.broadcast %cst_102 : f32 to vector<128x1xf32>
    %226 = arith.mulf %224, %225 : vector<128x1xf32>
    %c0_103 = arith.constant 0 : index
    %c0_104 = arith.constant 0 : index
    %c0_105 = arith.constant 0 : index
    %227 = vector.load %arg15[%c0_103, %c0_104, %c0_105] : memref<1x128x1xf32, #tpu.memory_space<vmem>>, vector<1x128x1xf32>
    %228 = vector.shape_cast %227 : vector<1x128x1xf32> to vector<128x1xf32>
    %229 = vector.shape_cast %226 : vector<128x1xf32> to vector<1x128x1xf32>
    tpu.vector_store %arg15[%c0_103, %c0_104, %c0_105], %229 {strides = array<i32>} : memref<1x128x1xf32, #tpu.memory_space<vmem>>, vector<1x128x1xf32>,
    %c0_106 = arith.constant 0 : index
    %c0_107 = arith.constant 0 : index
    %230 = vector.load %arg11[%c0_106, %c0_107] : memref<128x2xf32, #tpu.memory_space<vmem>>, vector<128x2xf32>
    %231 = vector.broadcast %226 : vector<128x1xf32> to vector<128x2xf32>
    %232 = arith.mulf %231, %230 : vector<128x2xf32>
    %cst_108 = arith.constant dense<0.000000e+00> : vector<2xf32>
    %233 = vector.multi_reduction <add>, %232, %cst_108 [0] : vector<128x2xf32> to vector<2xf32>
    %234 = vector.shape_cast %233 : vector<2xf32> to vector<1x2xf32>
    %c0_109 = arith.constant 0 : index
    %c0_110 = arith.constant 0 : index
    %235 = vector.load %arg12[%c0_109, %c0_110] : memref<1x2xf32, #tpu.memory_space<vmem>>, vector<1x2xf32>
    %236 = arith.addf %234, %235 : vector<1x2xf32>
    %c0_111 = arith.constant 0 : index
    %c0_112 = arith.constant 0 : index
    %c0_113 = arith.constant 0 : index
    %237 = vector.load %arg16[%c0_111, %c0_112, %c0_113] : memref<1x1x2xf32, #tpu.memory_space<vmem>>, vector<1x1x2xf32>
    %238 = vector.shape_cast %237 : vector<1x1x2xf32> to vector<1x2xf32>
    %239 = vector.shape_cast %236 : vector<1x2xf32> to vector<1x1x2xf32>
    tpu.vector_store %arg16[%c0_111, %c0_112, %c0_113], %239 {strides = array<i32>} : memref<1x1x2xf32, #tpu.memory_space<vmem>>, vector<1x1x2xf32>,
    return
  }
  func.func @transform_0(%arg0: i32) -> (i32, i32, i32) {
    %c0_i32 = arith.constant 0 : i32
    %c0_i32_0 = arith.constant 0 : i32
    %c0_i32_1 = arith.constant 0 : i32
    return %arg0, %c0_i32, %c0_i32_0 : i32, i32, i32
  }
  func.func @transform_1(%arg0: i32) -> (i32, i32) {
    %c0_i32 = arith.constant 0 : i32
    %c0_i32_0 = arith.constant 0 : i32
    %c0_i32_1 = arith.constant 0 : i32
    return %c0_i32, %c0_i32_0 : i32, i32
  }
  func.func @transform_2(%arg0: i32) -> (i32, i32, i32) {
    %c0_i32 = arith.constant 0 : i32
    %c0_i32_0 = arith.constant 0 : i32
    %c0_i32_1 = arith.constant 0 : i32
    %c0_i32_2 = arith.constant 0 : i32
    return %c0_i32, %c0_i32_0, %c0_i32_1 : i32, i32, i32
  }
  func.func @transform_3(%arg0: i32) -> (i32, i32) {
    %c0_i32 = arith.constant 0 : i32
    %c0_i32_0 = arith.constant 0 : i32
    %c0_i32_1 = arith.constant 0 : i32
    return %c0_i32, %c0_i32_0 : i32, i32
  }
  func.func @transform_4(%arg0: i32) -> (i32, i32) {
    %c0_i32 = arith.constant 0 : i32
    %c0_i32_0 = arith.constant 0 : i32
    %c0_i32_1 = arith.constant 0 : i32
    return %c0_i32, %c0_i32_0 : i32, i32
  }
  func.func @transform_5(%arg0: i32) -> (i32, i32) {
    %c0_i32 = arith.constant 0 : i32
    %c0_i32_0 = arith.constant 0 : i32
    %c0_i32_1 = arith.constant 0 : i32
    return %c0_i32, %c0_i32_0 : i32, i32
  }
  func.func @transform_6(%arg0: i32) -> (i32, i32) {
    %c0_i32 = arith.constant 0 : i32
    %c0_i32_0 = arith.constant 0 : i32
    %c0_i32_1 = arith.constant 0 : i32
    return %c0_i32, %c0_i32_0 : i32, i32
  }
  func.func @transform_7(%arg0: i32) -> (i32, i32) {
    %c0_i32 = arith.constant 0 : i32
    %c0_i32_0 = arith.constant 0 : i32
    %c0_i32_1 = arith.constant 0 : i32
    return %c0_i32, %c0_i32_0 : i32, i32
  }
  func.func @transform_8(%arg0: i32) -> (i32, i32, i32) {
    %c0_i32 = arith.constant 0 : i32
    %c0_i32_0 = arith.constant 0 : i32
    %c0_i32_1 = arith.constant 0 : i32
    %c0_i32_2 = arith.constant 0 : i32
    return %c0_i32, %c0_i32_0, %c0_i32_1 : i32, i32, i32
  }
  func.func @transform_9(%arg0: i32) -> (i32, i32) {
    %c0_i32 = arith.constant 0 : i32
    %c0_i32_0 = arith.constant 0 : i32
    %c0_i32_1 = arith.constant 0 : i32
    return %c0_i32, %c0_i32_0 : i32, i32
  }
  func.func @transform_10(%arg0: i32) -> (i32, i32) {
    %c0_i32 = arith.constant 0 : i32
    %c0_i32_0 = arith.constant 0 : i32
    %c0_i32_1 = arith.constant 0 : i32
    return %c0_i32, %c0_i32_0 : i32, i32
  }
  func.func @transform_11(%arg0: i32) -> (i32, i32) {
    %c0_i32 = arith.constant 0 : i32
    %c0_i32_0 = arith.constant 0 : i32
    %c0_i32_1 = arith.constant 0 : i32
    return %c0_i32, %c0_i32_0 : i32, i32
  }
  func.func @transform_12(%arg0: i32) -> (i32, i32, i32) {
    %c0_i32 = arith.constant 0 : i32
    %c0_i32_0 = arith.constant 0 : i32
    %c0_i32_1 = arith.constant 0 : i32
    return %arg0, %c0_i32, %c0_i32_0 : i32, i32, i32
  }
  func.func @transform_13(%arg0: i32) -> (i32, i32, i32) {
    %c0_i32 = arith.constant 0 : i32
    %c0_i32_0 = arith.constant 0 : i32
    %c0_i32_1 = arith.constant 0 : i32
    return %arg0, %c0_i32, %c0_i32_0 : i32, i32, i32
  }
  func.func @transform_14(%arg0: i32) -> (i32, i32, i32) {
    %c0_i32 = arith.constant 0 : i32
    %c0_i32_0 = arith.constant 0 : i32
    %c0_i32_1 = arith.constant 0 : i32
    return %arg0, %c0_i32, %c0_i32_0 : i32, i32, i32
  }
  func.func @transform_15(%arg0: i32) -> (i32, i32, i32) {
    %c0_i32 = arith.constant 0 : i32
    %c0_i32_0 = arith.constant 0 : i32
    %c0_i32_1 = arith.constant 0 : i32
    return %arg0, %c0_i32, %c0_i32_0 : i32, i32, i32
  }
}

</mosaic_0001>

<bundles_post_ra>
// kernel: attention_branch_network.1
= control target key start
LH: loop header
LB: loop body
LE: loop exit
PB: predicated region body
PF: predicated region fallthrough
CT: control target
= control target key end

     0   :  { %s9293_s0 = inlined_call_operand.vmem [shape: f32[2,16,256], index: 0, kind: input, shape index: {}]   ;;  %s9294_s1 = inlined_call_operand.vmem [shape: f32[4,256], index: 1, kind: input, shape index: {}]   ;;  %s9295_s2 = inlined_call_operand.hbm [shape: bf16[9,128,16], index: 2, kind: input, shape index: {}]   ;;  %s9296_s3 = inlined_call_operand.vmem [shape: f32[128,1], index: 3, kind: input, shape index: {}, may-alias: {3,9}]   ;;  %s9297_s4 = inlined_call_operand.vmem [shape: f32[128,1], index: 4, kind: input, shape index: {}]   ;;  %s9298_s5 = inlined_call_operand.<no memory space> [shape: f32[1,1], index: 5, kind: input, shape index: {}]   ;;  %s9299_s6 = inlined_call_operand.vmem [shape: f32[128,2], index: 6, kind: input, shape index: {}]   ;;  %s9300_s7 = inlined_call_operand.vmem [shape: f32[1,2], index: 7, kind: input, shape index: {}, may-alias: {7,11}]   ;;  %s9301_s8 = inlined_call_operand.hbm [shape: bf16[9,128,16], index: 8, kind: input, shape index: {}]   ;;  %s9302_s9 = inlined_call_operand.vmem [shape: f32[128,1], index: 9, kind: input, shape index: {}, may-alias: {3,9}]   ;;  %s9303_s10 = inlined_call_operand.vmem [shape: f32[128,2], index: 10, kind: input, shape index: {}]   ;;  %s9304_s11 = inlined_call_operand.vmem [shape: f32[1,2], index: 11, kind: input, shape index: {}, may-alias: {7,11}]   ;;  %s9305_s12 = inlined_call_operand.vmem [shape: f32[2,1,256], index: 12, kind: output, shape index: {0}]   ;;  %s9306_s13 = inlined_call_operand.hbm [shape: f32[2,1,2], index: 13, kind: output, shape index: {1}]   ;;  %s9307_s14 = inlined_call_operand.vmem [shape: f32[2,128,1], index: 14, kind: output, shape index: {2}]   ;;  %s9308_s15 = inlined_call_operand.hbm [shape: f32[2,1,2], index: 15, kind: output, shape index: {3}]  }
   0x1   :  { %9350 = sst [smem:[#allocation86_spill]] %s9293_s0 }
   0x2   :  { %9351 = sst [smem:[#allocation87_spill]] %s9294_s1 }
   0x3   :  { %9352 = sst [smem:[#allocation88_spill]] %s9295_s2 }
   0x4   :  { %21 = sst [smem:[#allocation2]] %s9298_s5 }
   0x5   :  { %22 = vsyncpa [#allocation4], 0 }
   0x6   :  { %23 = vsyncpa [#allocation7], 0 }
   0x7   :  { %24 = vsyncpa [#allocation5], 0 }
   0x8   :  { %26 = vsyncpa [#allocation5 + $0x1], 0 }
   0x9   :  { %27 = vsyncpa [#allocation10], 0 }
   0xa   :  { %29 = vsyncpa [#allocation10 + $0x1], 0  ;;  %s6712_s20 = smov 0   ;;  %s6714_s21 = smov 0  }
   0xb   :  { %s6716_s22 = smov 0   ;;  %s6718_s23 = smov 0  }
   0xc LB: > { %9353 = sst [smem:[#allocation15_spill]] %s6607_s22  ;;  %s6733_s5 = sadd.s32 4294967295, %s6611_s23   ;;  %s6611_s23 = sphi %s6718_s23, %s9637_s23   ;;  %s6607_s22 = sphi %s6716_s22, %s9639_s22   ;;  %s6603_s21 = sphi %s6714_s21, %s9641_s21   ;;  %s6599_s20 = sphi %s6712_s20, %s9640_s20  }
   0xd   : > { %s5917_s24 = sadd.s32 4294967294, %s6611_s23   ;;  %s6737_s25 = sadd.s32 1, %s6611_s23  }
   0xe   : > { %9354 = sst [smem:[#allocation16_spill]] %s6737_s25  ;;  %s325_s26 = sadd.s32 1, %s6607_s22 }
   0xf   : > { %s322_s27 = ssub.s32 %s6611_s23, %s6737_s25  ;;  %p335_p0 = scmp.ne.s32.totalorder %s6607_s22, %s6603_s21 }
  0x10   : > { %p323_p1 = scmp.eq.s32.totalorder %s322_s27, 0  ;;  %p336_p2 = scmp.eq.s32.totalorder %s6733_s5, 1 }
  0x11   : > { %p341_p3 = scmp.ne.s32.totalorder %s6603_s21, %s6599_s20  ;;  %p342_p4 = scmp.eq.s32.totalorder %s5917_s24, 1 }
  0x12   : > { %s6748_s28 = scalar_select %p323_p1, %s6607_s22, %s325_s26  }
  0x13   : > { %p6750_p5 = por %p336_p2, %p335_p0  ;;  %p6754_p6 = por %p342_p4, %p341_p3 }
  0x14   : > { %9355 = sst [smem:[#allocation17_spill]] %s6748_s28  ;;  %p5918_p7 = scmp.ge.s32.totalorder %s6611_s23, 1 }
  0x15   : > { %s9357_s30 = scalar_select %p6754_p6, 1, 0 }
  0x16   : > { %p401_p8 = scmp.lt.s32.totalorder %s6611_s23, 3  ;;  %p9312_p9 = scmp.eq.s32.totalorder %s6733_s5, 0 }
  0x17   : > { %9358 = sst [smem:[#allocation18_spill]] %s9357_s30  ;;  %s6613_s17 = smov [#allocation3]  }
  0x18   : > { %p6761_p10 = pnand %p5918_p7, %p401_p8  ;;  %s416_s18 = sshll.u32 %s6613_s17, 4  ;;  %s417_s18 = int_to_ptr.vmem [resolvable:$true] %s416_s18 }
  0x19   : > { %s6614_s24 = smov [#allocation6]   ;;  %s6472_s27 = scalar_lea.vmem %s417_s18, 9216 }
  0x1a   : > { %p6238_p11 = pneg %p6761_p10  ;;  %s444_s26 = sshll.u32 %s6614_s24, 4  ;;  %s445_s26 = int_to_ptr.vmem [resolvable:$true] %s444_s26 }
  0x1b   : > { %p6473_p0 = scmp.ne.s32.totalorder %s417_s18, %s6472_s27  ;;  %p6480_p3 = scmp.lt.s32.totalorder %s417_s18, %s417_s18 }
  0x1c   : > { %p6769_p12 = pnand %p9312_p9, %p6238_p11  ;;  %p6481_p4 = scmp.lt.s32.totalorder %s6472_s27, %s6472_s27 }
  0x1e   : > { %p6463_p13 = pneg %p6769_p12  ;;  %p6482_p7 = por %p6481_p4, %p6480_p3 }
  0x20   : > { %p6475_p1 = pnand %p6473_p0, %p6463_p13 }
  0x22   : > { %p6476_p2 = pneg %p6475_p1 }
  0x24   : > { %p6483_p8 = pnand %p6482_p7, %p6476_p2 }
  0x26   : > { %6486 = shalt.err (!%p6483_p8)
}
  0x27   : > { %s6615_s17 = smov 64   ;;  %s6616_s28 = smov 4  }
  0x28   : > { %s9361_s2 = sld [smem:[#allocation88_spill]]  ;;  %s6498_s25 = scalar_lea.vmem %s445_s26, 9216 }
  0x29   : > { %p6499_p11 = scmp.ne.s32.totalorder %s445_s26, %s6498_s25  ;;  %p6506_p9 = scmp.lt.s32.totalorder %s445_s26, %s445_s26 }
  0x2a   : > { %p6507_p6 = scmp.lt.s32.totalorder %s6498_s25, %s6498_s25 }
  0x2b   : > { %p6501_p0 = pnand %p6499_p11, %p6463_p13 }
  0x2c   : > { %p6508_p3 = por %p6507_p6, %p6506_p9 }
  0x2d   : > { %p6502_p1 = pneg %p6501_p0 }
  0x2e   : > { %6241 = dma.hbm_to_vmem [thread:$0]  (!%p6769_p12), %s9361_s2, 9216, %s417_s18, [#allocation4], %s6615_s17, %s6615_s17, %s6616_s28  }
  0x2f   : > { %p6509_p2 = pnand %p6508_p3, %p6502_p1 }
  0x31   : > { %6512 = shalt.err (!%p6509_p2)
}
  0x32   : > { %6244 = dma.hbm_to_vmem [thread:$0]  (!%p6769_p12), %s9301_s8, 9216, %s445_s26, [#allocation7], %s6615_s17, %s6615_s17, %s6616_s28  }
  0x33   : > { %477 = sbr.rel (%p6761_p10) target bundleno = 1599 (0x63f), region = 68 }
  0x38   : > { %p9362_p4 = scmp.eq.s32.totalorder %s6733_s5, 0 }
  0x3a   : > { %6582 = dma.done.wait (%p9362_p4), [#allocation4], 9216   ;;  %p9363_p13 = pmov %p9362_p4 }
  0x3b   : > { %p9364_p7 = pmov %p9362_p4 }
  0x3c   : > { %6584 = vsyncadd (%p9363_p13), [#allocation4], 4294958080 }
  0x3d   : > { %6586 = dma.done.wait (%p9364_p7), [#allocation7], 9216   ;;  %p9365_p6 = pmov %p9362_p4 }
  0x3e   : > { %p541_p9 = scmp.lt.s32.totalorder %s6733_s5, 1  ;;  %s9366_s0 = sld [smem:[#allocation86_spill]]  ;;  %v9337_v2 = vmov 0   ;;  %v9326_v5 = vlaneseq  ;;  %v6305_v38 = vld [vmem:[#allocation3 + $0x40] sm:$0xff]   ;;  %vm731_vm2 = vcmask 130048   ;;  %v6306_v60 = vld [vmem:[#allocation3 + $0x48] sm:$0xff]  }
  0x3f   : > { %6588 = vsyncadd (%p9365_p6), [#allocation7], 4294958080  ;;  %788 = vmatprep.mubr.bf16.mxu0 %v9337_v2  ;;  %965 = vmatprep.mubr.bf16.mxu1 %v9337_v2  ;;  %s6618_s18 = smov 16   ;;  %s6619_s19 = smov 17   ;;  %v6307_v63 = vld [vmem:[#allocation3] sm:$0xff]   ;;  %vm3225_vm10 = vcmask 15360  }
  0x40   : > { %s6803_s22 = scalar_select %p541_p9, %s6733_s5, 1  ;;  %6304 = vset.pattern.permute.xlu1 %v9337_v2  ;;  %6303 = vset.pattern.permute.xlu0 %v9337_v2  ;;  %v6884_v6 = vshrl.u32 %v9326_v5, 7  ;;  %v6894_v10 = vand.u32 127, %v9326_v5  ;;  %vm5629_vm11 = vcmask 7168   ;;  %vm3266_vm12 = vcmask 8192  }
  0x41   : > { %s9324_s26 = smov 15   ;;  %s9322_s17 = smov 1  }
  0x42   : > { %s6224_s25 = sshll.u32 %s6803_s22, 5  ;;  %s9320_s24 = smov 127   ;;  %9367 = vst [vmem:[#allocation19_spill] sm:$0xff] %v6884_v6  ;;  %v633_v7 = vsub.s32 2, %v6884_v6  ;;  %v637_v8 = vsub.s32 6, %v6884_v6  ;;  %9369 = vst [vmem:[#allocation20_spill] sm:$0xff] %v6894_v10 }
  0x43   : > { %s9318_s27 = smov 113   ;;  %s9368_s1 = sld [smem:[#allocation87_spill]]  ;;  %vm680_vm0 = vcmp.lt.s32.totalorder %v6894_v10, 16  ;;  %v611_v15 = vsub.s32 0, %v6884_v6  ;;  %v615_v16 = vsub.s32 4, %v6884_v6  ;;  %v1078_v35 = vsub.s32 1, %v6884_v6 }
  0x44   : > { %s6809_s16 = scalar_lea.vmem %s9366_s0, %s6224_s25  ;;  %s9316_s25 = smov 112   ;;  %v1082_v36 = vsub.s32 5, %v6884_v6  ;;  %vm603_vm1 = vcmp.lt.s32.totalorder %v6894_v10, 17  ;;  %vm1071_vm3 = vcmp.lt.s32.totalorder %v6894_v10, 15  ;;  %vm1338_vm4 = vcmp.lt.s32.totalorder %v6894_v10, 1 }
  0x45   : > { %v6812_v0 = vld [vmem:[%s6809_s16 + $0x8] sm:$0xff]  ;;  %v6815_v1 = vld [vmem:[%s6809_s16] sm:$0xff]  ;;  %v6824_v3 = vld [vmem:[%s6809_s16 + $0x18] sm:$0xff]  ;;  %s9314_s28 = smov 111   ;;  %vm1811_vm5 = vcmp.lt.s32.totalorder %v6894_v10, 127  ;;  %vm2056_vm6 = vcmp.lt.s32.totalorder %v6894_v10, 113 }
  0x46   : > { %676 = vrot.lane.b32.xlu1 %v6812_v0, %s6618_s18  ;;  %672 = vrot.lane.b32.xlu0 %v6815_v1, %s6618_s18  ;;  %v6827_v4 = vld [vmem:[%s6809_s16 + $0x10] sm:$0xff]  ;;  %vm2323_vm7 = vcmp.lt.s32.totalorder %v6894_v10, 112  ;;  %vm2568_vm8 = vcmp.lt.s32.totalorder %v6894_v10, 111  ;;  %s9493_s30 = smov 112  }
  0x49   : > { %v6891_v9 = vld [vmem:[%s9368_s1] sm:$0xff] }
  0x4a   : > { %678 = vrot.lane.b32.xlu1 %v6824_v3, %s6618_s18  ;;  %674 = vrot.lane.b32.xlu0 %v6827_v4, %s6618_s18  ;;  %v638_v11 = vrot.slane %v6891_v9, %v637_v8  ;;  %v634_v12 = vrot.slane %v6891_v9, %v633_v7  ;;  %v612_v25 = vrot.slane %v6891_v9, %v611_v15 }
  0x4b   : > { %v616_v26 = vrot.slane %v6891_v9, %v615_v16  ;;  %v1079_v42 = vrot.slane %v6891_v9, %v1078_v35  ;;  %v1083_v43 = vrot.slane %v6891_v9, %v1082_v36 }
  0x4c   : > { %v6901_v17 = vrot.slane %v638_v11, %v633_v7  ;;  %v6903_v18 = vrot.slane %v634_v12, %v633_v7  ;;  %v6926_v37 = vrot.slane %v612_v25, %v611_v15 }
  0x4d   : > { %v6928_v39 = vrot.slane %v616_v26, %v611_v15  ;;  %v6955_v61 = vrot.slane %v1079_v42, %v1078_v35  ;;  %v6957_v62 = vrot.slane %v1083_v43, %v1078_v35 }
  0x4e   : > { %595 = vrot.lane.b32.xlu1 %v6827_v4, %s6619_s19  ;;  %593 = vrot.lane.b32.xlu0 %v6815_v1, %s6619_s19  ;;  %9370 = vst [vmem:[#allocation21_spill] sm:$0xff] %v6901_v17  ;;  %9371 = vst [vmem:[#allocation22_spill] sm:$0xff] %v6903_v18 }
  0x4f   : > { %9372 = vst [vmem:[#allocation23_spill] sm:$0xff] %v6926_v37  ;;  %9373 = vst [vmem:[#allocation24_spill] sm:$0xff] %v6928_v39 }
  0x50   : > { %9374 = vst [vmem:[#allocation25_spill] sm:$0xff] %v6955_v61  ;;  %9375 = vst [vmem:[#allocation26_spill] sm:$0xff] %v6957_v62 }
  0x52   : > { %599 = vrot.lane.b32.xlu1 %v6824_v3, %s6619_s19  ;;  %597 = vrot.lane.b32.xlu0 %v6812_v0, %s6619_s19 }
  0x56   : > { %1065 = vrot.lane.b32.xlu1 %v6827_v4, %s9324_s26  ;;  %1063 = vrot.lane.b32.xlu0 %v6815_v1, %s9324_s26 }
  0x5a   : > { %1069 = vrot.lane.b32.xlu1 %v6824_v3, %s9324_s26  ;;  %1067 = vrot.lane.b32.xlu0 %v6812_v0, %s9324_s26 }
  0x5e   : > { %1332 = vrot.lane.b32.xlu1 %v6827_v4, %s9322_s17  ;;  %1330 = vrot.lane.b32.xlu0 %v6815_v1, %s9322_s17 }
  0x62   : > { %1336 = vrot.lane.b32.xlu1 %v6824_v3, %s9322_s17  ;;  %1334 = vrot.lane.b32.xlu0 %v6812_v0, %s9322_s17 }
  0x66   : > { %1805 = vrot.lane.b32.xlu1 %v6827_v4, %s9320_s24  ;;  %1803 = vrot.lane.b32.xlu0 %v6815_v1, %s9320_s24 }
  0x6a   : > { %1809 = vrot.lane.b32.xlu1 %v6824_v3, %s9320_s24  ;;  %1807 = vrot.lane.b32.xlu0 %v6812_v0, %s9320_s24 }
  0x6e   : > { %2050 = vrot.lane.b32.xlu1 %v6827_v4, %s9318_s27  ;;  %2048 = vrot.lane.b32.xlu0 %v6815_v1, %s9318_s27 }
  0x72   : > { %2054 = vrot.lane.b32.xlu1 %v6824_v3, %s9318_s27  ;;  %2052 = vrot.lane.b32.xlu0 %v6812_v0, %s9318_s27  ;;  %s3106_s27 = sld [smem:[#allocation2]] }
  0x76   : > { %2317 = vrot.lane.b32.xlu1 %v6827_v4, %s9316_s25  ;;  %2315 = vrot.lane.b32.xlu0 %v6815_v1, %s9316_s25 }
  0x7a   : > { %2321 = vrot.lane.b32.xlu1 %v6824_v3, %s9316_s25  ;;  %2319 = vrot.lane.b32.xlu0 %v6812_v0, %s9316_s25  ;;  %s5927_s25 = sshll.u32 %s6803_s22, 1 }
  0x7b   : > { %s549_s24 = scalar_lea.vmem %s9305_s12, %s5927_s25  ;;  %s6225_s25 = sshll.u32 %s6803_s22, 7 }
  0x7e   : > { %2562 = vrot.lane.b32.xlu1 %v6827_v4, %s9314_s28  ;;  %2560 = vrot.lane.b32.xlu0 %v6815_v1, %s9314_s28 }
  0x82   : > { %2566 = vrot.lane.b32.xlu1 %v6824_v3, %s9314_s28  ;;  %2564 = vrot.lane.b32.xlu0 %v6812_v0, %s9314_s28  ;;  %s9491_s28 = smov 127  }
  0xb8   : > { %v677_v13 = vpop.permute.xlu1 %676  ;;  %v673_v14 = vpop.permute.xlu0 %672 }
  0xb9   : > { %v683_v19 = vsel %vm680_vm0, %v677_v13, %v673_v14  ;;  %v681_v20 = vsel %vm680_vm0, %v673_v14, %v677_v13 }
  0xba   : > { %v686_v27 = vmul.f32 %v681_v20, %v6901_v17  ;;  %v685_v29 = vmul.f32 %v683_v19, %v6903_v18 }
  0xbc   : > { %v679_v21 = vpop.permute.xlu1 %678  ;;  %v675_v22 = vpop.permute.xlu0 %674 }
  0xbd   : > { %v684_v23 = vsel %vm680_vm0, %v679_v21, %v675_v22  ;;  %v682_v24 = vsel %vm680_vm0, %v675_v22, %v679_v21 }
  0xbe   : > { %v688_v28 = vmul.f32 %v682_v24, %v6901_v17  ;;  %v687_v30 = vmul.f32 %v684_v23, %v6903_v18 }
  0xc0   : > { %v596_v31 = vpop.permute.xlu1 %595  ;;  %v594_v32 = vpop.permute.xlu0 %593  ;;  %v690_v33 = vpack.c.bf16 %v688_v28, %v686_v27  ;;  %v689_v34 = vpack.c.bf16 %v687_v30, %v685_v29  ;;  %v6308_v27 = vld [vmem:[#allocation3 + $0x50] sm:$0xff]   ;;  %v1576_v30 = vpack.c.bf16 %v6824_v3, %v6812_v0 }
  0xc2   : > { %770 = vmatprep.subr.bf16.mxu0 %v690_v33 }
  0xc3   : > { %771 = vmatpush1.bf16.msra.mxu0 %v689_v34 }
  0xc4   : > { %v600_v40 = vpop.permute.xlu1 %599  ;;  %v598_v41 = vpop.permute.xlu0 %597 }
  0xc5   : > { %v605_v44 = vsel %vm603_vm1, %v596_v31, %v600_v40  ;;  %v607_v45 = vsel %vm603_vm1, %v600_v40, %v596_v31  ;;  %v604_v46 = vsel %vm603_vm1, %v594_v32, %v598_v41  ;;  %v606_v47 = vsel %vm603_vm1, %v598_v41, %v594_v32  ;;  %v6309_v31 = vld [vmem:[#allocation3 + $0x8] sm:$0xff]  }
  0xc6   : > { %v629_v48 = vmul.f32 %v6926_v37, %v607_v45  ;;  %v627_v49 = vmul.f32 %v6926_v37, %v606_v47  ;;  %5938 = vmatmul.mubr.msk.bf16.vlgmr.msra.gmra.mxu0 %vm731_vm2, %v6305_v38  ;;  %v628_v50 = vmul.f32 %v6928_v39, %v604_v46  ;;  %v630_v51 = vmul.f32 %v6928_v39, %v605_v44  ;;  %v6310_v46 = vld [vmem:[#allocation3 + $0x58] sm:$0xff]   ;;  %v6311_v47 = vld [vmem:[#allocation3 + $0x10] sm:$0xff]  }
  0xc7   : > { %798 = vmatprep.mubr.bf16.mxu0 %v9337_v2 }
  0xc8   : > { %v650_v52 = vmul.f32 %v6901_v17, %v628_v50  ;;  %v652_v53 = vmul.f32 %v6901_v17, %v630_v51  ;;  %v649_v54 = vmul.f32 %v6903_v18, %v627_v49  ;;  %v651_v55 = vmul.f32 %v6903_v18, %v629_v48  ;;  %v1066_v56 = vpop.permute.xlu1 %1065  ;;  %v1064_v57 = vpop.permute.xlu0 %1063 }
  0xca   : > { %v654_v58 = vpack.c.bf16 %v652_v53, %v650_v52  ;;  %v653_v59 = vpack.c.bf16 %v651_v55, %v649_v54  ;;  %v6312_v55 = vld [vmem:[#allocation3 + $0x60] sm:$0xff]  }
  0xcc   : > { %947 = vmatprep.subr.bf16.mxu1 %v654_v58  ;;  %v1070_v7 = vpop.permute.xlu1 %1069  ;;  %v1068_v8 = vpop.permute.xlu0 %1067  ;;  %v6315_v58 = vld [vmem:[#allocation3 + $0x20] sm:$0xff]  }
  0xcd   : > { %948 = vmatpush1.bf16.msra.mxu1 %v653_v59  ;;  %v1073_v11 = vsel %vm1071_vm3, %v1066_v56, %v1070_v7  ;;  %v1075_v12 = vsel %vm1071_vm3, %v1070_v7, %v1066_v56  ;;  %v1072_v13 = vsel %vm1071_vm3, %v1064_v57, %v1068_v8  ;;  %v1074_v14 = vsel %vm1071_vm3, %v1068_v8, %v1064_v57  ;;  %v6313_v56 = vld [vmem:[#allocation3 + $0x18] sm:$0xff]   ;;  %v6314_v57 = vld [vmem:[#allocation3 + $0x68] sm:$0xff]  }
  0xce   : > { %5939 = vmatmul.mubr.msk.bf16.gmra.mxu0 %vm731_vm2, %v6306_v60  ;;  %v1096_v15 = vmul.f32 %v6955_v61, %v1075_v12  ;;  %v1097_v16 = vmul.f32 %v6957_v62, %v1073_v11  ;;  %v1094_v19 = vmul.f32 %v6955_v61, %v1074_v14  ;;  %v1095_v20 = vmul.f32 %v6957_v62, %v1072_v13  ;;  %v6317_v7 = vld [vmem:[#allocation3 + $0x28] sm:$0xff]  }
  0xcf   : > { %808 = vmatprep.mubr.bf16.mxu0 %v9337_v2  ;;  %v2071_v8 = vsub.s32 7, %v6884_v6  ;;  %v7037_v13 = vsub.s32 3, %v6884_v6 }
  0xd0   : > { %5954 = vmatmul.mubr.msk.bf16.vlgmr.msra.gmra.mxu1 %vm731_vm2, %v6307_v63  ;;  %v1100_v21 = vmul.f32 %v1096_v15, %v6903_v18  ;;  %v1098_v22 = vmul.f32 %v1094_v19, %v6903_v18  ;;  %v1099_v23 = vmul.f32 %v1095_v20, %v6901_v17  ;;  %v1101_v24 = vmul.f32 %v1097_v16, %v6901_v17  ;;  %v1333_v25 = vpop.permute.xlu1 %1332  ;;  %v1331_v26 = vpop.permute.xlu0 %1330  ;;  %v6316_v63 = vld [vmem:[#allocation3 + $0x70] sm:$0xff]   ;;  %v6318_v19 = vld [vmem:[#allocation3 + $0x78] sm:$0xff]  }
  0xd1   : > { %975 = vmatprep.mubr.bf16.mxu1 %v9337_v2  ;;  %v2072_v14 = vrot.slane %v6891_v9, %v2071_v8  ;;  %v6319_v20 = vld [vmem:[#allocation3 + $0x30] sm:$0xff]  }
  0xd2   : > { %v1103_v28 = vpack.c.bf16 %v1101_v24, %v1099_v23  ;;  %v1102_v29 = vpack.c.bf16 %v1100_v21, %v1098_v22 }
  0xd3   : > { %v7052_v23 = vrot.slane %v2072_v14, %v7037_v13  ;;  %v6334_v14 = vld [vmem:[#allocation3 + $0xb8] sm:$0xff]  }
  0xd4   : > { %1182 = vmatprep.subr.bf16.mxu0 %v1103_v28  ;;  %v1337_v32 = vpop.permute.xlu1 %1336  ;;  %v1335_v33 = vpop.permute.xlu0 %1334  ;;  %v6320_v28 = vld [vmem:[#allocation3 + $0x80] sm:$0xff]  }
  0xd5   : > { %1183 = vmatpush1.bf16.msra.mxu0 %v1102_v29  ;;  %v1340_v34 = vsel %vm1338_vm4, %v1333_v25, %v1337_v32  ;;  %v1342_v35 = vsel %vm1338_vm4, %v1337_v32, %v1333_v25  ;;  %v1339_v36 = vsel %vm1338_vm4, %v1331_v26, %v1335_v33  ;;  %v1341_v38 = vsel %vm1338_vm4, %v1335_v33, %v1331_v26 }
  0xd6   : > { %5940 = vmatmul.mubr.msk.bf16.gmra.mxu0 %vm731_vm2, %v6308_v27  ;;  %v1345_v0 = vmul.f32 %v1342_v35, %v6926_v37  ;;  %v1346_v3 = vmul.f32 %v1340_v34, %v6928_v39  ;;  %v1343_v40 = vmul.f32 %v1341_v38, %v6926_v37  ;;  %v1344_v41 = vmul.f32 %v1339_v36, %v6928_v39 }
  0xd7   : > { %818 = vmatprep.mubr.bf16.mxu0 %v9337_v2  ;;  %1655 = vmatprep.subr.bf16.mxu0 %v1576_v30  ;;  %9376 = vst [vmem:[#allocation27_spill] sm:$0xff] %v7052_v23  ;;  %v1575_v29 = vpack.c.bf16 %v6827_v4, %v6815_v1  ;;  %v6321_v30 = vld [vmem:[#allocation3 + $0x38] sm:$0xff]  }
  0xd8   : > { %5955 = vmatmul.mubr.msk.bf16.gmra.mxu1 %vm731_vm2, %v6309_v31  ;;  %v1347_v42 = vpack.c.bf16 %v1345_v0, %v1343_v40  ;;  %v1348_v43 = vpack.c.bf16 %v1346_v3, %v1344_v41  ;;  %v6997_v44 = vpop.permute.xlu1 %1805  ;;  %v6999_v45 = vpop.permute.xlu0 %1803  ;;  %v6322_v0 = vld [vmem:[#allocation3 + $0x88] sm:$0xff]   ;;  %v6323_v41 = vld [vmem:[#allocation3 + $0xc0] sm:$0xff]  }
  0xd9   : > { %985 = vmatprep.mubr.bf16.mxu1 %v9337_v2 }
  0xda   : > { %1427 = vmatprep.subr.bf16.mxu1 %v1348_v43 }
  0xdb   : > { %1428 = vmatpush1.bf16.msra.mxu1 %v1347_v42 }
  0xdc   : > { %v1810_v48 = vpop.permute.xlu1 %1809  ;;  %v1808_v49 = vpop.permute.xlu0 %1807 }
  0xdd   : > { %v1815_v50 = vsel %vm1811_vm5, %v1810_v48, %v6997_v44  ;;  %v1814_v51 = vsel %vm1811_vm5, %v1808_v49, %v6999_v45  ;;  %v1813_v33 = vsel %vm1811_vm5, %v6997_v44, %v1810_v48  ;;  %v1812_v34 = vsel %vm1811_vm5, %v6999_v45, %v1808_v49  ;;  %v6324_v44 = vld [vmem:[#allocation3 + $0x90] sm:$0xff]   ;;  %v6325_v45 = vld [vmem:[#allocation3 + $0xc8] sm:$0xff]   ;;  %v6328_v48 = vld [vmem:[#allocation3 + $0xa0] sm:$0xff]  }
  0xde   : > { %5941 = vmatmul.mubr.msk.bf16.gmra.mxu0 %vm731_vm2, %v6310_v46  ;;  %v1819_v52 = vmul.f32 %v1815_v50, %v6957_v62  ;;  %v1817_v53 = vmul.f32 %v1814_v51, %v6957_v62  ;;  %v1818_v36 = vmul.f32 %v1813_v33, %v6955_v61  ;;  %v1816_v38 = vmul.f32 %v1812_v34, %v6955_v61  ;;  %v6326_v46 = vld [vmem:[#allocation3 + $0x98] sm:$0xff]   ;;  %v6330_v50 = vld [vmem:[#allocation3 + $0xa8] sm:$0xff]   ;;  %v6331_v51 = vld [vmem:[#allocation3 + $0xe0] sm:$0xff]  }
  0xdf   : > { %828 = vmatprep.mubr.bf16.mxu0 %v9337_v2  ;;  %v6329_v49 = vld [vmem:[#allocation3 + $0xd8] sm:$0xff]   ;;  %v6338_v34 = vld [vmem:[#allocation3 + $0x108] sm:$0xff]  }
  0xe0   : > { %5956 = vmatmul.mubr.msk.bf16.gmra.mxu1 %vm731_vm2, %v6311_v47  ;;  %v1821_v54 = vpack.c.bf16 %v1819_v52, %v1817_v53  ;;  %v7023_v59 = vpop.permute.xlu1 %2050  ;;  %v7025_v60 = vpop.permute.xlu0 %2048  ;;  %v1820_v42 = vpack.c.bf16 %v1818_v36, %v1816_v38  ;;  %v6327_v47 = vld [vmem:[#allocation3 + $0xd0] sm:$0xff]   ;;  %v564_v38 = vld [vmem:[%s9296_s3 + $0x18] sm:$0xff] }
  0xe1   : > { %995 = vmatprep.mubr.bf16.mxu1 %v9337_v2  ;;  %v563_v36 = vld [vmem:[%s9296_s3 + $0x10] sm:$0xff] }
  0xe2   : > { %1900 = vmatprep.subr.bf16.mxu1 %v1821_v54  ;;  %v6332_v54 = vld [vmem:[#allocation3 + $0xb0] sm:$0xff]  }
  0xe4   : > { %v7030_v11 = vpop.permute.xlu1 %2054  ;;  %v7032_v12 = vpop.permute.xlu0 %2052 }
  0xe5   : > { %v2060_v15 = vsel %vm2056_vm6, %v7030_v11, %v7023_v59  ;;  %v2059_v16 = vsel %vm2056_vm6, %v7032_v12, %v7025_v60 }
  0xe6   : > { %5942 = vmatmul.mubr.msk.bf16.gmra.mxu0 %vm731_vm2, %v6312_v55  ;;  %v2064_v21 = vmul.f32 %v2060_v15, %v6928_v39  ;;  %v2062_v22 = vmul.f32 %v2059_v16, %v6928_v39  ;;  %v6333_v55 = vld [vmem:[#allocation3 + $0xe8] sm:$0xff]  }
  0xe7   : > { %838 = vmatprep.mubr.bf16.mxu0 %v9337_v2 }
  0xe8   : > { %5957 = vmatmul.mubr.msk.bf16.gmra.mxu1 %vm731_vm2, %v6313_v56  ;;  %v2084_v24 = vmul.f32 %v7052_v23, %v2062_v22  ;;  %v2086_v25 = vmul.f32 %v7052_v23, %v2064_v21  ;;  %v7060_v26 = vpop.permute.xlu1 %2317  ;;  %v7062_v27 = vpop.permute.xlu0 %2315  ;;  %v6336_v22 = vld [vmem:[#allocation3 + $0x100] sm:$0xff]  }
  0xe9   : > { %1005 = vmatprep.mubr.bf16.mxu1 %v9337_v2 }
  0xea   : > { %v2088_v31 = vpack.c.bf16 %v2086_v25, %v2084_v24  ;;  %v6337_v25 = vld [vmem:[#allocation3 + $0xf8] sm:$0xff]  }
  0xec   : > { %v7067_v32 = vpop.permute.xlu1 %2321  ;;  %v7076_v35 = vpop.permute.xlu0 %2319 }
  0xed   : > { %v2327_v1 = vsel %vm2323_vm7, %v7067_v32, %v7060_v26  ;;  %v2326_v4 = vsel %vm2323_vm7, %v7076_v35, %v7062_v27 }
  0xee   : > { %5943 = vmatmul.mubr.msk.bf16.gmra.mxu0 %vm731_vm2, %v6314_v57  ;;  %v2331_v3 = vmul.f32 %v2327_v1, %v7052_v23  ;;  %v2329_v40 = vmul.f32 %v2326_v4, %v7052_v23  ;;  %v6339_v1 = vld [vmem:[#allocation3 + $0x140] sm:$0xff]  }
  0xef   : > { %848 = vmatprep.mubr.bf16.mxu0 %v9337_v2  ;;  %v561_v4 = vld [vmem:[%s9296_s3] sm:$0xff] }
  0xf0   : > { %5958 = vmatmul.mubr.msk.bf16.gmra.mxu1 %vm731_vm2, %v6315_v58  ;;  %v2333_v43 = vpack.c.bf16 %v2331_v3, %v2329_v40  ;;  %v7113_v52 = vpop.permute.xlu1 %2562  ;;  %v7115_v53 = vpop.permute.xlu0 %2560  ;;  %v2068_v58 = vrot.slane %v6891_v9, %v7037_v13  ;;  %2794 = vperm.xlu0 %6303, %v561_v4   ;;  %v2936_v3 = vld [vmem:[%s9297_s4] sm:$0xff]  ;;  %v6343_v40 = vld [vmem:[#allocation3 + $0x150] sm:$0xff]  }
  0xf1   : > { %1015 = vmatprep.mubr.bf16.mxu1 %v9337_v2  ;;  %v6355_v4 = vld [vmem:[#allocation3 + $0x1c0] sm:$0xff]  }
  0xf4   : > { %v7119_v56 = vpop.permute.xlu1 %2566  ;;  %v7121_v57 = vpop.permute.xlu0 %2564  ;;  %2809 = vperm.xlu0 %6303, %v564_v38  }
  0xf5   : > { %v2572_v8 = vsel %vm2568_vm8, %v7119_v56, %v7113_v52  ;;  %v2571_v9 = vsel %vm2568_vm8, %v7121_v57, %v7115_v53 }
  0xf6   : > { %5944 = vmatmul.mubr.msk.bf16.gmra.mxu0 %vm731_vm2, %v6316_v63  ;;  %v2058_v63 = vsel %vm2056_vm6, %v7023_v59, %v7030_v11  ;;  %v7145_v59 = vrot.slane %v2068_v58, %v7037_v13  ;;  %v2576_v15 = vmul.f32 %v2572_v8, %v6957_v62  ;;  %v2574_v16 = vmul.f32 %v2571_v9, %v6957_v62  ;;  %v569_v58 = vld [vmem:[%s9296_s3 + $0x40] sm:$0xff]  ;;  %v570_v8 = vld [vmem:[%s9296_s3 + $0x48] sm:$0xff] }
  0xf7   : > { %858 = vmatprep.mubr.bf16.mxu0 %v9337_v2  ;;  %v2063_v11 = vmul.f32 %v2058_v63, %v6926_v37  ;;  %v2942_v63 = vld [vmem:[%s9297_s4 + $0x30] sm:$0xff]  ;;  %v6349_v9 = vld [vmem:[#allocation3 + $0x168] sm:$0xff]  }
  0xf8   : > { %5959 = vmatmul.mubr.msk.bf16.gmra.mxu1 %vm731_vm2, %v6317_v7  ;;  %v2057_v7 = vsel %vm2056_vm6, %v7025_v60, %v7032_v12  ;;  %9377 = vst [vmem:[#allocation28_spill] sm:$0xff] %v7145_v59  ;;  %v6335_v12 = vld [vmem:[#allocation3 + $0xf0] sm:$0xff]   ;;  %v2578_v13 = vmul.f32 %v2574_v16, %v7052_v23  ;;  %v2580_v21 = vmul.f32 %v2576_v15, %v7052_v23  ;;  %v2944_v15 = vld [vmem:[%s9297_s4 + $0x40] sm:$0xff]  ;;  %v6350_v16 = vld [vmem:[#allocation3 + $0x138] sm:$0xff]  }
  0xf9   : > { %1025 = vmatprep.mubr.bf16.mxu1 %v9337_v2  ;;  %v2061_v60 = vmul.f32 %v2057_v7, %v6926_v37  ;;  %v6348_v7 = vld [vmem:[#allocation3 + $0x130] sm:$0xff]  }
  0xfe   : > { %5945 = vmatmul.mubr.msk.bf16.gmra.mxu0 %vm731_vm2, %v6318_v19  ;;  %v2085_v19 = vmul.f32 %v7145_v59, %v2063_v11  ;;  %v571_v11 = vld [vmem:[%s9296_s3 + $0x50] sm:$0xff] }
  0xff   : > { %1200 = vmatprep.mubr.bf16.mxu0 %v9337_v2 }
 0x100   : > { %5960 = vmatmul.mubr.msk.bf16.gmra.mxu1 %vm731_vm2, %v6319_v20  ;;  %v2083_v20 = vmul.f32 %v7145_v59, %v2061_v60  ;;  %v2570_v60 = vsel %vm2568_vm8, %v7113_v52, %v7119_v56  ;;  %v6351_v56 = vld [vmem:[#allocation3 + $0x170] sm:$0xff]  }
 0x101   : > { %1035 = vmatprep.mubr.bf16.mxu1 %v9337_v2 }
 0x102   : > { %v2087_v24 = vpack.c.bf16 %v2085_v19, %v2083_v20  ;;  %v572_v19 = vld [vmem:[%s9296_s3 + $0x58] sm:$0xff]  ;;  %v2575_v20 = vmul.f32 %v2570_v60, %v6955_v61 }
 0x106   : > { %5970 = vmatmul.mubr.msk.bf16.vlgmr.msra.gmra.mxu0 %vm731_vm2, %v6320_v28  ;;  %v2582_v28 = vpack.c.bf16 %v2580_v21, %v2578_v13  ;;  %v2579_v13 = vmul.f32 %v2575_v20, %v7145_v59 }
 0x107   : > { %1210 = vmatprep.mubr.bf16.mxu0 %v9337_v2  ;;  %1656 = vmatpush1.bf16.msra.mxu0 %v1575_v29  ;;  %v2325_v29 = vsel %vm2323_vm7, %v7060_v26, %v7067_v32  ;;  %v562_v32 = vld [vmem:[%s9296_s3 + $0x8] sm:$0xff] }
 0x108   : > { %5961 = vmatmul.mubr.msk.bf16.gmra.mxu1 %vm731_vm2, %v6321_v30  ;;  %2167 = vmatprep.subr.bf16.mxu0 %v2088_v31  ;;  %v2324_v30 = vsel %vm2323_vm7, %v7062_v27, %v7076_v35  ;;  %v2330_v31 = vmul.f32 %v2325_v29, %v7145_v59  ;;  %v6340_v27 = vld [vmem:[#allocation3 + $0x110] sm:$0xff]   ;;  %v6341_v35 = vld [vmem:[#allocation3 + $0x148] sm:$0xff]   ;;  %v6353_v29 = vld [vmem:[#allocation3 + $0x178] sm:$0xff]  }
 0x109   : > { %1445 = vmatprep.mubr.bf16.mxu1 %v9337_v2  ;;  %v2328_v33 = vmul.f32 %v2324_v30, %v7145_v59  ;;  %2799 = vperm.xlu1 %6304, %v562_v32   ;;  %v2947_v30 = vld [vmem:[%s9297_s4 + $0x58] sm:$0xff] }
 0x10a   : > { %v576_v32 = vld [vmem:[%s9296_s3 + $0x78] sm:$0xff] }
 0x10b   : > { %v2332_v26 = vpack.c.bf16 %v2330_v31, %v2328_v33  ;;  %v575_v33 = vld [vmem:[%s9296_s3 + $0x70] sm:$0xff] }
 0x10d   : > { %2804 = vperm.xlu1 %6304, %v563_v36   ;;  %v2949_v36 = vld [vmem:[%s9297_s4 + $0x68] sm:$0xff] }
 0x10e   : > { %5971 = vmatmul.mubr.msk.bf16.gmra.mxu0 %vm731_vm2, %v6322_v0  ;;  %v6342_v0 = vld [vmem:[#allocation3 + $0x118] sm:$0xff]  }
 0x10f   : > { %1220 = vmatprep.mubr.bf16.mxu0 %v9337_v2 }
 0x110   : > { %5986 = vmatmul.mubr.msk.bf16.vlgmr.msra.gmra.mxu1 %vm731_vm2, %v6323_v41  ;;  %v2937_v41 = vld [vmem:[%s9297_s4 + $0x8] sm:$0xff] }
 0x111   : > { %1455 = vmatprep.mubr.bf16.mxu1 %v9337_v2  ;;  %1901 = vmatpush1.bf16.msra.mxu1 %v1820_v42  ;;  %v565_v42 = vld [vmem:[%s9296_s3 + $0x20] sm:$0xff] }
 0x112   : > { %2412 = vmatprep.subr.bf16.mxu1 %v2333_v43  ;;  %2954 = vperm.xlu1 %6304, %v2936_v3   ;;  %v2938_v43 = vld [vmem:[%s9297_s4 + $0x10] sm:$0xff] }
 0x113   : > { %2959 = vperm.xlu0 %6303, %v2937_v41   ;;  %v2951_v41 = vld [vmem:[%s9297_s4 + $0x78] sm:$0xff] }
 0x116   : > { %5972 = vmatmul.mubr.msk.bf16.gmra.mxu0 %vm731_vm2, %v6324_v44  ;;  %2814 = vperm.xlu1 %6304, %v565_v42   ;;  %v6344_v44 = vld [vmem:[#allocation3 + $0x120] sm:$0xff]  }
 0x117   : > { %1230 = vmatprep.mubr.bf16.mxu0 %v9337_v2  ;;  %2964 = vperm.xlu0 %6303, %v2938_v43  }
 0x118   : > { %5987 = vmatmul.mubr.msk.bf16.gmra.mxu1 %vm731_vm2, %v6325_v45  ;;  %v566_v45 = vld [vmem:[%s9296_s3 + $0x28] sm:$0xff] }
 0x119   : > { %1465 = vmatprep.mubr.bf16.mxu1 %v9337_v2 }
 0x11a   : > { %2819 = vperm.xlu1 %6304, %v566_v45   ;;  %v6356_v45 = vld [vmem:[#allocation3 + $0x190] sm:$0xff]  }
 0x11e   : > { %5973 = vmatmul.mubr.msk.bf16.gmra.mxu0 %vm731_vm2, %v6326_v46  ;;  %v6345_v46 = vld [vmem:[#allocation3 + $0x158] sm:$0xff]  }
 0x11f   : > { %1240 = vmatprep.mubr.bf16.mxu0 %v9337_v2 }
 0x120   : > { %5988 = vmatmul.mubr.msk.bf16.gmra.mxu1 %vm731_vm2, %v6327_v47  ;;  %v2939_v47 = vld [vmem:[%s9297_s4 + $0x18] sm:$0xff] }
 0x121   : > { %1475 = vmatprep.mubr.bf16.mxu1 %v9337_v2  ;;  %2969 = vperm.xlu0 %6303, %v2939_v47  }
 0x126   : > { %5974 = vmatmul.mubr.msk.bf16.gmra.mxu0 %vm731_vm2, %v6328_v48  ;;  %v567_v48 = vld [vmem:[%s9296_s3 + $0x30] sm:$0xff] }
 0x127   : > { %1250 = vmatprep.mubr.bf16.mxu0 %v9337_v2  ;;  %2824 = vperm.xlu1 %6304, %v567_v48  }
 0x128   : > { %5989 = vmatmul.mubr.msk.bf16.gmra.mxu1 %vm731_vm2, %v6329_v49  ;;  %v2940_v49 = vld [vmem:[%s9297_s4 + $0x20] sm:$0xff] }
 0x129   : > { %1485 = vmatprep.mubr.bf16.mxu1 %v9337_v2  ;;  %2974 = vperm.xlu0 %6303, %v2940_v49   ;;  %v6357_v49 = vld [vmem:[#allocation3 + $0x1c8] sm:$0xff]  }
 0x12e   : > { %5975 = vmatmul.mubr.msk.bf16.gmra.mxu0 %vm731_vm2, %v6330_v50  ;;  %v6346_v50 = vld [vmem:[#allocation3 + $0x128] sm:$0xff]  }
 0x12f   : > { %1260 = vmatprep.mubr.bf16.mxu0 %v9337_v2 }
 0x130   : > { %5990 = vmatmul.mubr.msk.bf16.gmra.mxu1 %vm731_vm2, %v6331_v51  ;;  %v568_v51 = vld [vmem:[%s9296_s3 + $0x38] sm:$0xff] }
 0x131   : > { %1495 = vmatprep.mubr.bf16.mxu1 %v9337_v2  ;;  %2829 = vperm.xlu1 %6304, %v568_v51  }
 0x135   : > { %2834 = vperm.xlu1 %6304, %v569_v58  }
 0x136   : > { %5976 = vmatmul.mubr.msk.bf16.gmra.mxu0 %vm731_vm2, %v6332_v54  ;;  %v6347_v54 = vld [vmem:[#allocation3 + $0x160] sm:$0xff]  }
 0x137   : > { %1270 = vmatprep.mubr.bf16.mxu0 %v9337_v2 }
 0x138   : > { %5991 = vmatmul.mubr.msk.bf16.gmra.mxu1 %vm731_vm2, %v6333_v55  ;;  %v2941_v55 = vld [vmem:[%s9297_s4 + $0x28] sm:$0xff] }
 0x139   : > { %1505 = vmatprep.mubr.bf16.mxu1 %v9337_v2  ;;  %2979 = vperm.xlu0 %6303, %v2941_v55  }
 0x13a   : > { %2839 = vperm.xlu1 %6304, %v570_v8  }
 0x13d   : > { %2984 = vperm.xlu0 %6303, %v2942_v63  }
 0x13e   : > { %5977 = vmatmul.mubr.msk.bf16.gmra.mxu0 %vm731_vm2, %v6334_v14  ;;  %v2943_v14 = vld [vmem:[%s9297_s4 + $0x38] sm:$0xff]  ;;  %2844 = vperm.xlu1 %6304, %v571_v11  }
 0x13f   : > { %1673 = vmatprep.mubr.bf16.mxu0 %v9337_v2 }
 0x140   : > { %5992 = vmatmul.mubr.msk.bf16.gmra.mxu1 %vm731_vm2, %v6335_v12  ;;  %v2569_v12 = vsel %vm2568_vm8, %v7115_v53, %v7121_v57  ;;  %v2945_v53 = vld [vmem:[%s9297_s4 + $0x48] sm:$0xff]  ;;  %v573_v57 = vld [vmem:[%s9296_s3 + $0x60] sm:$0xff] }
 0x141   : > { %1515 = vmatprep.mubr.bf16.mxu1 %v9337_v2  ;;  %2989 = vperm.xlu0 %6303, %v2943_v14   ;;  %v2573_v52 = vmul.f32 %v2569_v12, %v6955_v61  ;;  %v6358_v14 = vld [vmem:[#allocation3 + $0x198] sm:$0xff]  }
 0x142   : > { %2849 = vperm.xlu1 %6304, %v572_v19  }
 0x143   : > { %v2577_v21 = vmul.f32 %v2573_v52, %v7145_v59 }
 0x145   : > { %2994 = vperm.xlu0 %6303, %v2944_v15   ;;  %v6359_v15 = vld [vmem:[#allocation3 + $0x1d0] sm:$0xff]  }
 0x146   : > { %6002 = vmatmul.mubr.msk.bf16.vlgmr.msra.gmra.mxu0 %vm731_vm2, %v6336_v22  ;;  %2854 = vperm.xlu1 %6304, %v573_v57   ;;  %v2946_v22 = vld [vmem:[%s9297_s4 + $0x50] sm:$0xff] }
 0x147   : > { %1683 = vmatprep.mubr.bf16.mxu0 %v9337_v2  ;;  %2168 = vmatpush1.bf16.msra.mxu0 %v2087_v24  ;;  %v6352_v24 = vld [vmem:[#allocation3 + $0x180] sm:$0xff]  }
 0x148   : > { %5993 = vmatmul.mubr.msk.bf16.gmra.mxu1 %vm731_vm2, %v6337_v25  ;;  %2661 = vmatprep.subr.bf16.mxu0 %v2582_v28  ;;  %v574_v25 = vld [vmem:[%s9296_s3 + $0x68] sm:$0xff]  ;;  %v2581_v28 = vpack.c.bf16 %v2579_v13, %v2577_v21 }
 0x149   : > { %1918 = vmatprep.mubr.bf16.mxu1 %v9337_v2  ;;  %2999 = vperm.xlu0 %6303, %v2945_v53  }
 0x14a   : > { %2859 = vperm.xlu1 %6304, %v574_v25  }
 0x14d   : > { %3004 = vperm.xlu0 %6303, %v2946_v22   ;;  %v6360_v22 = vld [vmem:[#allocation3 + $0x1a0] sm:$0xff]  }
 0x14e   : > { %6003 = vmatmul.mubr.msk.bf16.gmra.mxu0 %vm731_vm2, %v6338_v34  ;;  %2864 = vperm.xlu1 %6304, %v575_v33  }
 0x14f   : > { %1693 = vmatprep.mubr.bf16.mxu0 %v9337_v2 }
 0x150   : > { %6018 = vmatmul.mubr.msk.bf16.vlgmr.msra.gmra.mxu1 %vm731_vm2, %v6339_v1  ;;  %v2948_v1 = vld [vmem:[%s9297_s4 + $0x60] sm:$0xff] }
 0x151   : > { %1928 = vmatprep.mubr.bf16.mxu1 %v9337_v2  ;;  %2413 = vmatpush1.bf16.msra.mxu1 %v2332_v26 }
 0x152   : > { %3009 = vperm.xlu0 %6303, %v2947_v30   ;;  %2869 = vperm.xlu1 %6304, %v576_v32  }
 0x156   : > { %6004 = vmatmul.mubr.msk.bf16.gmra.mxu0 %vm731_vm2, %v6340_v27  ;;  %3014 = vperm.xlu0 %6303, %v2948_v1   ;;  %v6354_v27 = vld [vmem:[#allocation3 + $0x188] sm:$0xff]  }
 0x157   : > { %1703 = vmatprep.mubr.bf16.mxu0 %v9337_v2 }
 0x158   : > { %6019 = vmatmul.mubr.msk.bf16.gmra.mxu1 %vm731_vm2, %v6341_v35 }
 0x159   : > { %1938 = vmatprep.mubr.bf16.mxu1 %v9337_v2 }
 0x15a   : > { %3019 = vperm.xlu0 %6303, %v2949_v36  }
 0x15e   : > { %6005 = vmatmul.mubr.msk.bf16.gmra.mxu0 %vm731_vm2, %v6342_v0  ;;  %v2950_v0 = vld [vmem:[%s9297_s4 + $0x70] sm:$0xff]  ;;  %3029 = vperm.xlu0 %6303, %v2951_v41  }
 0x15f   : > { %1713 = vmatprep.mubr.bf16.mxu0 %v9337_v2  ;;  %3024 = vperm.xlu1 %6304, %v2950_v0  }
 0x160   : > { %6020 = vmatmul.mubr.msk.bf16.gmra.mxu1 %vm731_vm2, %v6343_v40 }
 0x161   : > { %1948 = vmatprep.mubr.bf16.mxu1 %v9337_v2 }
 0x166   : > { %6006 = vmatmul.mubr.msk.bf16.gmra.mxu0 %vm731_vm2, %v6344_v44 }
 0x167   : > { %1723 = vmatprep.mubr.bf16.mxu0 %v9337_v2 }
 0x168   : > { %6021 = vmatmul.mubr.msk.bf16.gmra.mxu1 %vm731_vm2, %v6345_v46 }
 0x169   : > { %1958 = vmatprep.mubr.bf16.mxu1 %v9337_v2 }
 0x16e   : > { %6007 = vmatmul.mubr.msk.bf16.gmra.mxu0 %vm731_vm2, %v6346_v50 }
 0x16f   : > { %1733 = vmatprep.mubr.bf16.mxu0 %v9337_v2 }
 0x170   : > { %6022 = vmatmul.mubr.msk.bf16.gmra.mxu1 %vm731_vm2, %v6347_v54 }
 0x171   : > { %1968 = vmatprep.mubr.bf16.mxu1 %v9337_v2 }
 0x176   : > { %6008 = vmatmul.mubr.msk.bf16.gmra.mxu0 %vm731_vm2, %v6348_v7 }
 0x177   : > { %1743 = vmatprep.mubr.bf16.mxu0 %v9337_v2 }
 0x178   : > { %6023 = vmatmul.mubr.msk.bf16.gmra.mxu1 %vm731_vm2, %v6349_v9 }
 0x179   : > { %1978 = vmatprep.mubr.bf16.mxu1 %v9337_v2 }
 0x17e   : > { %6009 = vmatmul.mubr.msk.bf16.gmra.mxu0 %vm731_vm2, %v6350_v16 }
 0x17f   : > { %2185 = vmatprep.mubr.bf16.mxu0 %v9337_v2 }
 0x180   : > { %6024 = vmatmul.mubr.msk.bf16.gmra.mxu1 %vm731_vm2, %v6351_v56 }
 0x181   : > { %1988 = vmatprep.mubr.bf16.mxu1 %v9337_v2 }
 0x186   : > { %v790_v31 = vpop.f32.mrf.mxu0  ;;  %6034 = vmatmul.mubr.msk.bf16.vlgmr.msra.gmra.mxu0 %vm731_vm2, %v6352_v24 }
 0x187   : > { %2195 = vmatprep.mubr.bf16.mxu0 %v9337_v2  ;;  %2662 = vmatpush1.bf16.msra.mxu0 %v2581_v28 }
 0x188   : > { %v792_v34 = vpop.f32.mrf.mxu0  ;;  %6025 = vmatmul.mubr.msk.bf16.gmra.mxu1 %vm731_vm2, %v6353_v29  ;;  %v6361_v29 = vld [vmem:[#allocation3 + $0x1d8] sm:$0xff]  }
 0x189   : > { %2430 = vmatprep.mubr.bf16.mxu1 %v9337_v2 }
 0x18a   : > { %v794_v26 = vpop.f32.mrf.mxu0 }
 0x18c   : > { %v796_v35 = vpop.f32.mrf.mxu0 }
 0x18e   : > { %v800_v38 = vpop.f32.mrf.mxu0  ;;  %6035 = vmatmul.mubr.msk.bf16.gmra.mxu0 %vm731_vm2, %v6354_v27 }
 0x18f   : > { %2205 = vmatprep.mubr.bf16.mxu0 %v9337_v2 }
 0x190   : > { %v802_v3 = vpop.f32.mrf.mxu0  ;;  %v967_v40 = vpop.f32.mrf.mxu1  ;;  %6050 = vmatmul.mubr.msk.bf16.vlgmr.msra.gmra.mxu1 %vm731_vm2, %v6355_v4  ;;  %v6362_v4 = vld [vmem:[#allocation3 + $0x1a8] sm:$0xff]  }
 0x191   : > { %v7316_v42 = vadd.f32 %v967_v40, %v790_v31  ;;  %2440 = vmatprep.mubr.bf16.mxu1 %v9337_v2 }
 0x192   : > { %v804_v43 = vpop.f32.mrf.mxu0  ;;  %v969_v44 = vpop.f32.mrf.mxu1 }
 0x193   : > { %v7319_v46 = vadd.f32 %v969_v44, %v792_v34 }
 0x194   : > { %v806_v47 = vpop.f32.mrf.mxu0  ;;  %v971_v48 = vpop.f32.mrf.mxu1 }
 0x195   : > { %v7321_v50 = vadd.f32 %v971_v48, %v794_v26 }
 0x196   : > { %v810_v51 = vpop.f32.mrf.mxu0  ;;  %v973_v54 = vpop.f32.mrf.mxu1  ;;  %6036 = vmatmul.mubr.msk.bf16.gmra.mxu0 %vm731_vm2, %v6356_v45 }
 0x197   : > { %v7324_v55 = vadd.f32 %v973_v54, %v796_v35  ;;  %2215 = vmatprep.mubr.bf16.mxu0 %v9337_v2  ;;  %v6364_v54 = vld [vmem:[#allocation3 + $0x1b0] sm:$0xff]  }
 0x198   : > { %v812_v58 = vpop.f32.mrf.mxu0  ;;  %v977_v63 = vpop.f32.mrf.mxu1  ;;  %6051 = vmatmul.mubr.msk.bf16.gmra.mxu1 %vm731_vm2, %v6357_v49 }
 0x199   : > { %v7328_v7 = vadd.f32 %v977_v63, %v800_v38  ;;  %2450 = vmatprep.mubr.bf16.mxu1 %v9337_v2 }
 0x19a   : > { %v814_v8 = vpop.f32.mrf.mxu0  ;;  %v979_v9 = vpop.f32.mrf.mxu1 }
 0x19b   : > { %v7331_v11 = vadd.f32 %v979_v9, %v802_v3  ;;  %v6363_v3 = vld [vmem:[#allocation3 + $0x1e0] sm:$0xff]   ;;  %v6365_v9 = vld [vmem:[#allocation3 + $0x1e8] sm:$0xff]  }
 0x19c   : > { %v816_v60 = vpop.f32.mrf.mxu0  ;;  %v981_v12 = vpop.f32.mrf.mxu1 }
 0x19d   : > { %v7333_v16 = vadd.f32 %v981_v12, %v804_v43 }
 0x19e   : > { %v820_v19 = vpop.f32.mrf.mxu0  ;;  %v983_v20 = vpop.f32.mrf.mxu1  ;;  %6037 = vmatmul.mubr.msk.bf16.gmra.mxu0 %vm731_vm2, %v6358_v14 }
 0x19f   : > { %v7336_v52 = vadd.f32 %v983_v20, %v806_v47  ;;  %2225 = vmatprep.mubr.bf16.mxu0 %v9337_v2 }
 0x1a0   : > { %v822_v56 = vpop.f32.mrf.mxu0  ;;  %v987_v53 = vpop.f32.mrf.mxu1  ;;  %6052 = vmatmul.mubr.msk.bf16.gmra.mxu1 %vm731_vm2, %v6359_v15 }
 0x1a1   : > { %v7340_v57 = vadd.f32 %v987_v53, %v810_v51  ;;  %2460 = vmatprep.mubr.bf16.mxu1 %v9337_v2 }
 0x1a2   : > { %v824_v13 = vpop.f32.mrf.mxu0  ;;  %v989_v21 = vpop.f32.mrf.mxu1 }
 0x1a3   : > { %v7343_v24 = vadd.f32 %v989_v21, %v812_v58 }
 0x1a4   : > { %v826_v25 = vpop.f32.mrf.mxu0  ;;  %v991_v28 = vpop.f32.mrf.mxu1 }
 0x1a5   : > { %v7345_v30 = vadd.f32 %v991_v28, %v814_v8  ;;  %v6367_v28 = vld [vmem:[#allocation3 + $0x1f0] sm:$0xff]  }
 0x1a6   : > { %v830_v31 = vpop.f32.mrf.mxu0  ;;  %v993_v33 = vpop.f32.mrf.mxu1  ;;  %6038 = vmatmul.mubr.msk.bf16.gmra.mxu0 %vm731_vm2, %v6360_v22 }
 0x1a7   : > { %v7348_v34 = vadd.f32 %v993_v33, %v816_v60  ;;  %2235 = vmatprep.mubr.bf16.mxu0 %v9337_v2 }
 0x1a8   : > { %v832_v1 = vpop.f32.mrf.mxu0  ;;  %v997_v26 = vpop.f32.mrf.mxu1  ;;  %6053 = vmatmul.mubr.msk.bf16.gmra.mxu1 %vm731_vm2, %v6361_v29 }
 0x1a9   : > { %v7352_v27 = vadd.f32 %v997_v26, %v820_v19  ;;  %2470 = vmatprep.mubr.bf16.mxu1 %v9337_v2 }
 0x1aa   : > { %v834_v32 = vpop.f32.mrf.mxu0  ;;  %v999_v35 = vpop.f32.mrf.mxu1 }
 0x1ab   : > { %v7355_v36 = vadd.f32 %v999_v35, %v822_v56 }
 0x1ac   : > { %v7357_v38 = vpop.f32.mrf.mxu0  ;;  %v1001_v0 = vpop.f32.mrf.mxu1 }
 0x1ad   : > { %v7359_v40 = vadd.f32 %v1001_v0, %v824_v13  ;;  %v6366_v13 = vld [vmem:[#allocation3 + $0x1b8] sm:$0xff]   ;;  %v6368_v0 = vld [vmem:[#allocation3 + $0x200] sm:$0xff]  }
 0x1ae   : > { %v840_v41 = vpop.f32.mrf.mxu0  ;;  %v1003_v43 = vpop.f32.mrf.mxu1  ;;  %6039 = vmatmul.mubr.msk.bf16.gmra.mxu0 %vm731_vm2, %v6362_v4 }
 0x1af   : > { %v7362_v44 = vadd.f32 %v1003_v43, %v826_v25  ;;  %2245 = vmatprep.mubr.bf16.mxu0 %v9337_v2 }
 0x1b0   : > { %v842_v45 = vpop.f32.mrf.mxu0  ;;  %v1007_v47 = vpop.f32.mrf.mxu1  ;;  %6054 = vmatmul.mubr.msk.bf16.gmra.mxu1 %vm731_vm2, %v6363_v3 }
 0x1b1   : > { %v7366_v48 = vadd.f32 %v1007_v47, %v830_v31  ;;  %2480 = vmatprep.mubr.bf16.mxu1 %v9337_v2 }
 0x1b2   : > { %v844_v49 = vpop.f32.mrf.mxu0  ;;  %v1009_v51 = vpop.f32.mrf.mxu1 }
 0x1b3   : > { %v7369_v58 = vadd.f32 %v1009_v51, %v832_v1 }
 0x1b4   : > { %v7371_v63 = vpop.f32.mrf.mxu0  ;;  %v1011_v8 = vpop.f32.mrf.mxu1 }
 0x1b5   : > { %v7373_v14 = vadd.f32 %v1011_v8, %v834_v32 }
 0x1b6   : > { %v850_v60 = vpop.f32.mrf.mxu0  ;;  %v7375_v12 = vpop.f32.mrf.mxu1  ;;  %6040 = vmatmul.mubr.msk.bf16.gmra.mxu0 %vm731_vm2, %v6364_v54 }
 0x1b7   : > { %2255 = vmatprep.mubr.bf16.mxu0 %v9337_v2 }
 0x1b8   : > { %v852_v15 = vpop.f32.mrf.mxu0  ;;  %v1017_v19 = vpop.f32.mrf.mxu1  ;;  %6055 = vmatmul.mubr.msk.bf16.gmra.mxu1 %vm731_vm2, %v6365_v9 }
 0x1b9   : > { %v7380_v20 = vadd.f32 %v1017_v19, %v840_v41  ;;  %2490 = vmatprep.mubr.bf16.mxu1 %v9337_v2 }
 0x1ba   : > { %v854_v56 = vpop.f32.mrf.mxu0  ;;  %v1019_v53 = vpop.f32.mrf.mxu1 }
 0x1bb   : > { %v7383_v21 = vadd.f32 %v1019_v53, %v842_v45  ;;  %v6369_v45 = vld [vmem:[#allocation3 + $0x1f8] sm:$0xff]   ;;  %v6370_v53 = vld [vmem:[#allocation3 + $0x208] sm:$0xff]  }
 0x1bc   : > { %v7385_v22 = vpop.f32.mrf.mxu0  ;;  %v1021_v25 = vpop.f32.mrf.mxu1 }
 0x1bd   : > { %v7387_v29 = vadd.f32 %v1021_v25, %v844_v49 }
 0x1be   : > { %v860_v31 = vpop.f32.mrf.mxu0  ;;  %v7389_v33 = vpop.f32.mrf.mxu1  ;;  %6041 = vmatmul.mubr.msk.bf16.gmra.mxu0 %vm731_vm2, %v6366_v13 }
 0x1bf   : > { %2679 = vmatprep.mubr.bf16.mxu0 %v9337_v2 }
 0x1c0   : > { %v862_v1 = vpop.f32.mrf.mxu0  ;;  %v1027_v26 = vpop.f32.mrf.mxu1  ;;  %6056 = vmatmul.mubr.msk.bf16.gmra.mxu1 %vm731_vm2, %v6367_v28 }
 0x1c1   : > { %v7394_v32 = vadd.f32 %v1027_v26, %v850_v60  ;;  %2500 = vmatprep.mubr.bf16.mxu1 %v9337_v2 }
 0x1c2   : > { %v864_v35 = vpop.f32.mrf.mxu0  ;;  %v1029_v4 = vpop.f32.mrf.mxu1 }
 0x1c3   : > { %v7397_v3 = vadd.f32 %v1029_v4, %v852_v15 }
 0x1c4   : > { %v7399_v41 = vpop.f32.mrf.mxu0  ;;  %v1031_v43 = vpop.f32.mrf.mxu1 }
 0x1c5   : > { %v7401_v47 = vadd.f32 %v1031_v43, %v854_v56 }
 0x1c6   : > { %v7403_v49 = vpop.f32.mrf.mxu1  ;;  %v1202_v51 = vpop.f32.mrf.mxu0  ;;  %6066 = vmatmul.mubr.msk.bf16.vlgmr.msra.gmra.mxu0 %vm731_vm2, %v6368_v0 }
 0x1c7   : > { %v1281_v54 = vadd.f32 %v1202_v51, %v7316_v42  ;;  %2689 = vmatprep.mubr.bf16.mxu0 %v9337_v2 }
 0x1c8   : > { %v1037_v8 = vpop.f32.mrf.mxu1  ;;  %v1204_v9 = vpop.f32.mrf.mxu0  ;;  %6057 = vmatmul.mubr.msk.bf16.gmra.mxu1 %vm731_vm2, %v6369_v45 }
 0x1c9   : > { %v7409_v60 = vadd.f32 %v1037_v8, %v860_v31  ;;  %v1282_v15 = vadd.f32 %v1204_v9, %v7319_v46  ;;  %3459 = vmatprep.mubr.bf16.mxu1 %v9337_v2  ;;  %v6371_v8 = vld [vmem:[#allocation3 + $0x210] sm:$0xff]  }
 0x1ca   : > { %v1039_v19 = vpop.f32.mrf.mxu1  ;;  %v1206_v56 = vpop.f32.mrf.mxu0 }
 0x1cb   : > { %v7413_v13 = vadd.f32 %v1039_v19, %v862_v1  ;;  %v1283_v25 = vadd.f32 %v1206_v56, %v7321_v50 }
 0x1cc   : > { %v1041_v42 = vpop.f32.mrf.mxu1  ;;  %v1208_v28 = vpop.f32.mrf.mxu0 }
 0x1cd   : > { %v7416_v26 = vadd.f32 %v1041_v42, %v864_v35  ;;  %v7419_v4 = vadd.f32 %v1208_v28, %v7324_v55 }
 0x1ce   : > { %v7421_v31 = vpop.f32.mrf.mxu1  ;;  %v1212_v0 = vpop.f32.mrf.mxu0  ;;  %6067 = vmatmul.mubr.msk.bf16.gmra.mxu0 %vm731_vm2, %v6370_v53 }
 0x1cf   : > { %9378 = vst [vmem:[#allocation29_spill] sm:$0xff] %v7421_v31  ;;  %v1285_v46 = vadd.f32 %v1212_v0, %v7328_v7  ;;  %2699 = vmatprep.mubr.bf16.mxu0 %v9337_v2 }
 0x1d0   : > { %v1214_v1 = vpop.f32.mrf.mxu0  ;;  %v1447_v43 = vpop.f32.mrf.mxu1 }
 0x1d1   : > { %v1286_v50 = vadd.f32 %v1214_v1, %v7331_v11  ;;  %v7427_v45 = vadd.f32 %v1447_v43, %v1281_v54  ;;  %v6372_v43 = vld [vmem:[#allocation3 + $0x218] sm:$0xff]  }
 0x1d2   : > { %v1216_v35 = vpop.f32.mrf.mxu0  ;;  %v1449_v51 = vpop.f32.mrf.mxu1 }
 0x1d3   : > { %v1287_v55 = vadd.f32 %v1216_v35, %v7333_v16  ;;  %v7430_v9 = vadd.f32 %v1449_v51, %v1282_v15 }
 0x1d4   : > { %v1218_v19 = vpop.f32.mrf.mxu0  ;;  %v1451_v56 = vpop.f32.mrf.mxu1 }
 0x1d5   : > { %v7433_v53 = vadd.f32 %v1218_v19, %v7336_v52  ;;  %v7435_v7 = vadd.f32 %v1451_v56, %v1283_v25 }
 0x1d6   : > { %v1222_v42 = vpop.f32.mrf.mxu0  ;;  %v7437_v28 = vpop.f32.mrf.mxu1  ;;  %6068 = vmatmul.mubr.msk.bf16.gmra.mxu0 %vm731_vm2, %v6371_v8 }
 0x1d7   : > { %v1289_v11 = vadd.f32 %v1222_v42, %v7340_v57  ;;  %2709 = vmatprep.mubr.bf16.mxu0 %v9337_v2 }
 0x1d8   : > { %v1224_v54 = vpop.f32.mrf.mxu0  ;;  %v1457_v16 = vpop.f32.mrf.mxu1 }
 0x1d9   : > { %v1290_v15 = vadd.f32 %v1224_v54, %v7343_v24  ;;  %v7443_v0 = vadd.f32 %v1457_v16, %v1285_v46 }
 0x1da   : > { %v1226_v1 = vpop.f32.mrf.mxu0  ;;  %v1459_v52 = vpop.f32.mrf.mxu1 }
 0x1db   : > { %v1291_v25 = vadd.f32 %v1226_v1, %v7345_v30  ;;  %v7446_v35 = vadd.f32 %v1459_v52, %v1286_v50  ;;  %v6373_v1 = vld [vmem:[#allocation3 + $0x220] sm:$0xff]  }
 0x1dc   : > { %v1228_v51 = vpop.f32.mrf.mxu0  ;;  %v1461_v19 = vpop.f32.mrf.mxu1 }
 0x1dd   : > { %v7449_v8 = vadd.f32 %v1228_v51, %v7348_v34  ;;  %v7451_v57 = vadd.f32 %v1461_v19, %v1287_v55 }
 0x1de   : > { %v1232_v56 = vpop.f32.mrf.mxu0  ;;  %v7453_v42 = vpop.f32.mrf.mxu1  ;;  %6069 = vmatmul.mubr.msk.bf16.gmra.mxu0 %vm731_vm2, %v6372_v43 }
 0x1df   : > { %v1293_v24 = vadd.f32 %v1232_v56, %v7352_v27  ;;  %2719 = vmatprep.mubr.bf16.mxu0 %v9337_v2 }
 0x1e0   : > { %v1234_v46 = vpop.f32.mrf.mxu0  ;;  %v1467_v30 = vpop.f32.mrf.mxu1 }
 0x1e1   : > { %v1294_v50 = vadd.f32 %v1234_v46, %v7355_v36  ;;  %v7459_v54 = vadd.f32 %v1467_v30, %v1289_v11 }
 0x1e2   : > { %v1236_v16 = vpop.f32.mrf.mxu0  ;;  %v1469_v34 = vpop.f32.mrf.mxu1 }
 0x1e3   : > { %v1295_v55 = vadd.f32 %v1236_v16, %v7359_v40  ;;  %v7462_v52 = vadd.f32 %v1469_v34, %v1290_v15  ;;  %v6374_v16 = vld [vmem:[#allocation3 + $0x228] sm:$0xff]  }
 0x1e4   : > { %v1238_v51 = vpop.f32.mrf.mxu0  ;;  %v1471_v19 = vpop.f32.mrf.mxu1 }
 0x1e5   : > { %v7465_v43 = vadd.f32 %v1238_v51, %v7362_v44  ;;  %v7467_v27 = vadd.f32 %v1471_v19, %v1291_v25 }
 0x1e6   : > { %v1242_v56 = vpop.f32.mrf.mxu0  ;;  %v7469_v5 = vpop.f32.mrf.mxu1  ;;  %6070 = vmatmul.mubr.msk.bf16.gmra.mxu0 %vm731_vm2, %v6373_v1 }
 0x1e7   : > { %v1297_v36 = vadd.f32 %v1242_v56, %v7366_v48  ;;  %2729 = vmatprep.mubr.bf16.mxu0 %v9337_v2 }
 0x1e8   : > { %v1244_v11 = vpop.f32.mrf.mxu0  ;;  %v1477_v40 = vpop.f32.mrf.mxu1 }
 0x1e9   : > { %v1298_v15 = vadd.f32 %v1244_v11, %v7369_v58  ;;  %v7475_v46 = vadd.f32 %v1477_v40, %v1293_v24 }
 0x1ea   : > { %v1246_v30 = vpop.f32.mrf.mxu0  ;;  %v1479_v44 = vpop.f32.mrf.mxu1 }
 0x1eb   : > { %v1299_v25 = vadd.f32 %v1246_v30, %v7373_v14  ;;  %v7478_v34 = vadd.f32 %v1479_v44, %v1294_v50  ;;  %v6375_v44 = vld [vmem:[#allocation3 + $0x230] sm:$0xff]  }
 0x1ec   : > { %v7480_v51 = vpop.f32.mrf.mxu0  ;;  %v1481_v1 = vpop.f32.mrf.mxu1 }
 0x1ed   : > { %9379 = vst [vmem:[#allocation30_spill] sm:$0xff] %v7480_v51  ;;  %v7482_v19 = vadd.f32 %v1481_v1, %v1295_v55 }
 0x1ee   : > { %v1252_v48 = vpop.f32.mrf.mxu0  ;;  %v7484_v56 = vpop.f32.mrf.mxu1  ;;  %6071 = vmatmul.mubr.msk.bf16.gmra.mxu0 %vm731_vm2, %v6374_v16 }
 0x1ef   : > { %v1301_v58 = vadd.f32 %v1252_v48, %v7380_v20  ;;  %2739 = vmatprep.mubr.bf16.mxu0 %v9337_v2 }
 0x1f0   : > { %v1254_v24 = vpop.f32.mrf.mxu0  ;;  %v1487_v11 = vpop.f32.mrf.mxu1 }
 0x1f1   : > { %v1302_v14 = vadd.f32 %v1254_v24, %v7383_v21  ;;  %v7490_v50 = vadd.f32 %v1487_v11, %v1297_v36 }
 0x1f2   : > { %v1256_v40 = vpop.f32.mrf.mxu0  ;;  %v1489_v30 = vpop.f32.mrf.mxu1 }
 0x1f3   : > { %v1303_v55 = vadd.f32 %v1256_v40, %v7387_v29  ;;  %v7493_v1 = vadd.f32 %v1489_v30, %v1298_v15  ;;  %v6376_v30 = vld [vmem:[#allocation3 + $0x238] sm:$0xff]  }
 0x1f4   : > { %v7495_v23 = vpop.f32.mrf.mxu0  ;;  %v1491_v16 = vpop.f32.mrf.mxu1 }
 0x1f5   : > { %9380 = vst [vmem:[#allocation31_spill] sm:$0xff] %v7495_v23  ;;  %v7497_v59 = vadd.f32 %v1491_v16, %v1299_v25 }
 0x1f6   : > { %v1262_v20 = vpop.f32.mrf.mxu0  ;;  %v7499_v48 = vpop.f32.mrf.mxu1  ;;  %6072 = vmatmul.mubr.msk.bf16.gmra.mxu0 %vm731_vm2, %v6375_v44 }
 0x1f7   : > { %9381 = vst [vmem:[#allocation32_spill] sm:$0xff] %v7499_v48  ;;  %v1305_v21 = vadd.f32 %v1262_v20, %v7394_v32  ;;  %2749 = vmatprep.mubr.bf16.mxu0 %v9337_v2 }
 0x1f8   : > { %v1264_v36 = vpop.f32.mrf.mxu0  ;;  %v1497_v24 = vpop.f32.mrf.mxu1 }
 0x1f9   : > { %v1306_v29 = vadd.f32 %v1264_v36, %v7397_v3  ;;  %v7505_v15 = vadd.f32 %v1497_v24, %v1301_v58 }
 0x1fa   : > { %v1266_v11 = vpop.f32.mrf.mxu0  ;;  %v1499_v40 = vpop.f32.mrf.mxu1 }
 0x1fb   : > { %v1307_v25 = vadd.f32 %v1266_v11, %v7401_v47  ;;  %v7508_v16 = vadd.f32 %v1499_v40, %v1302_v14 }
 0x1fc   : > { %v7510_v62 = vpop.f32.mrf.mxu0  ;;  %v1501_v44 = vpop.f32.mrf.mxu1 }
 0x1fd   : > { %9382 = vst [vmem:[#allocation33_spill] sm:$0xff] %v7510_v62  ;;  %v7512_v61 = vadd.f32 %v1501_v44, %v1303_v55 }
 0x1fe   : > { %v1272_v32 = vpop.f32.mrf.mxu0  ;;  %v7514_v20 = vpop.f32.mrf.mxu1  ;;  %6073 = vmatmul.mubr.msk.bf16.gmra.mxu0 %vm731_vm2, %v6376_v30 }
 0x1ff   : > { %9383 = vst [vmem:[#allocation34_spill] sm:$0xff] %v7514_v20  ;;  %v1309_v3 = vadd.f32 %v1272_v32, %v7409_v60  ;;  %3636 = vmatprep.mubr.bf16.mxu0 %v9337_v2 }
 0x200   : > { %v1274_v58 = vpop.f32.mrf.mxu0  ;;  %v1507_v36 = vpop.f32.mrf.mxu1 }
 0x201   : > { %v1310_v47 = vadd.f32 %v1274_v58, %v7413_v13  ;;  %v7520_v14 = vadd.f32 %v1507_v36, %v1305_v21 }
 0x202   : > { %v1276_v24 = vpop.f32.mrf.mxu0  ;;  %v1509_v11 = vpop.f32.mrf.mxu1 }
 0x203   : > { %v1311_v55 = vadd.f32 %v1276_v24, %v7416_v26  ;;  %v7523_v40 = vadd.f32 %v1509_v11, %v1306_v29 }
 0x204   : > { %v7525_v44 = vpop.f32.mrf.mxu0  ;;  %v1511_v39 = vpop.f32.mrf.mxu1 }
 0x205   : > { %9384 = vst [vmem:[#allocation35_spill] sm:$0xff] %v7525_v44  ;;  %v7527_v30 = vadd.f32 %v1511_v39, %v1307_v25 }
 0x206   : > { %v7529_v60 = vpop.f32.mrf.mxu1  ;;  %v1675_v32 = vpop.f32.mrf.mxu0 }
 0x207   : > { %9385 = vst [vmem:[#allocation36_spill] sm:$0xff] %v7529_v60  ;;  %v1754_v2 = vadd.f32 %v1675_v32, %v7427_v45 }
 0x208   : > { %v1517_v37 = vpop.f32.mrf.mxu1  ;;  %v1677_v13 = vpop.f32.mrf.mxu0 }
 0x209   : > { %v7532_v21 = vadd.f32 %v1517_v37, %v1309_v3  ;;  %v1755_v58 = vadd.f32 %v1677_v13, %v7430_v9 }
 0x20a   : > { %v1519_v36 = vpop.f32.mrf.mxu1  ;;  %v1679_v26 = vpop.f32.mrf.mxu0 }
 0x20b   : > { %v7535_v29 = vadd.f32 %v1519_v36, %v1310_v47  ;;  %v1756_v24 = vadd.f32 %v1679_v26, %v7435_v7 }
 0x20c   : > { %v1521_v11 = vpop.f32.mrf.mxu1  ;;  %v7538_v39 = vpop.f32.mrf.mxu0 }
 0x20d   : > { %v7540_v25 = vadd.f32 %v1521_v11, %v1311_v55 }
 0x20e   : > { %v7542_v17 = vpop.f32.mrf.mxu1  ;;  %v1685_v45 = vpop.f32.mrf.mxu0 }
 0x20f   : > { %9386 = vst [vmem:[#allocation37_spill] sm:$0xff] %v7542_v17  ;;  %v1758_v32 = vadd.f32 %v1685_v45, %v7443_v0 }
 0x210   : > { %v1687_v37 = vpop.f32.mrf.mxu0  ;;  %v1920_v3 = vpop.f32.mrf.mxu1 }
 0x211   : > { %v1759_v9 = vadd.f32 %v1687_v37, %v7446_v35  ;;  %v7546_v13 = vadd.f32 %v1920_v3, %v1754_v2 }
 0x212   : > { %v1689_v47 = vpop.f32.mrf.mxu0  ;;  %v1922_v36 = vpop.f32.mrf.mxu1 }
 0x213   : > { %v1760_v7 = vadd.f32 %v1689_v47, %v7451_v57  ;;  %v7549_v26 = vadd.f32 %v1922_v36, %v1755_v58 }
 0x214   : > { %v7551_v18 = vpop.f32.mrf.mxu0  ;;  %v1924_v55 = vpop.f32.mrf.mxu1 }
 0x215   : > { %v7553_v11 = vadd.f32 %v1924_v55, %v1756_v24 }
 0x216   : > { %v1695_v10 = vpop.f32.mrf.mxu0  ;;  %v7555_v6 = vpop.f32.mrf.mxu1 }
 0x217   : > { %v1762_v0 = vadd.f32 %v1695_v10, %v7459_v54 }
 0x218   : > { %v1697_v45 = vpop.f32.mrf.mxu0  ;;  %v1930_v35 = vpop.f32.mrf.mxu1 }
 0x219   : > { %v1763_v2 = vadd.f32 %v1697_v45, %v7462_v52  ;;  %v7559_v37 = vadd.f32 %v1930_v35, %v1758_v32 }
 0x21a   : > { %v1699_v3 = vpop.f32.mrf.mxu0  ;;  %v1932_v57 = vpop.f32.mrf.mxu1 }
 0x21b   : > { %v1764_v58 = vadd.f32 %v1699_v3, %v7467_v27  ;;  %v7562_v47 = vadd.f32 %v1932_v57, %v1759_v9 }
 0x21c   : > { %v7564_v36 = vpop.f32.mrf.mxu0  ;;  %v1934_v24 = vpop.f32.mrf.mxu1 }
 0x21d   : > { %v7566_v55 = vadd.f32 %v1934_v24, %v1760_v7 }
 0x21e   : > { %v1705_v17 = vpop.f32.mrf.mxu0  ;;  %v7568_v60 = vpop.f32.mrf.mxu1 }
 0x21f   : > { %v1766_v10 = vadd.f32 %v1705_v17, %v7475_v46 }
 0x220   : > { %v1707_v54 = vpop.f32.mrf.mxu0  ;;  %v1940_v52 = vpop.f32.mrf.mxu1 }
 0x221   : > { %v1767_v32 = vadd.f32 %v1707_v54, %v7478_v34  ;;  %v7572_v45 = vadd.f32 %v1940_v52, %v1762_v0 }
 0x222   : > { %v1709_v35 = vpop.f32.mrf.mxu0  ;;  %v1942_v27 = vpop.f32.mrf.mxu1 }
 0x223   : > { %v1768_v9 = vadd.f32 %v1709_v35, %v7482_v19  ;;  %v7575_v3 = vadd.f32 %v1942_v27, %v1763_v2 }
 0x224   : > { %v7577_v57 = vpop.f32.mrf.mxu0  ;;  %v1944_v7 = vpop.f32.mrf.mxu1 }
 0x225   : > { %9387 = vst [vmem:[#allocation38_spill] sm:$0xff] %v7577_v57  ;;  %v7579_v24 = vadd.f32 %v1944_v7, %v1764_v58 }
 0x226   : > { %v1715_v44 = vpop.f32.mrf.mxu0  ;;  %v7581_v20 = vpop.f32.mrf.mxu1 }
 0x227   : > { %v1770_v17 = vadd.f32 %v1715_v44, %v7490_v50 }
 0x228   : > { %v1717_v46 = vpop.f32.mrf.mxu0  ;;  %v1950_v34 = vpop.f32.mrf.mxu1 }
 0x229   : > { %v1771_v0 = vadd.f32 %v1717_v46, %v7493_v1  ;;  %v7585_v54 = vadd.f32 %v1950_v34, %v1766_v10 }
 0x22a   : > { %v1719_v52 = vpop.f32.mrf.mxu0  ;;  %v1952_v19 = vpop.f32.mrf.mxu1 }
 0x22b   : > { %v1772_v2 = vadd.f32 %v1719_v52, %v7497_v59  ;;  %v7588_v35 = vadd.f32 %v1952_v19, %v1767_v32 }
 0x22c   : > { %v7590_v27 = vpop.f32.mrf.mxu0  ;;  %v1954_v58 = vpop.f32.mrf.mxu1 }
 0x22d   : > { %9388 = vst [vmem:[#allocation39_spill] sm:$0xff] %v7590_v27  ;;  %v7592_v7 = vadd.f32 %v1954_v58, %v1768_v9 }
 0x22e   : > { %v1725_v62 = vpop.f32.mrf.mxu0  ;;  %v7594_v48 = vpop.f32.mrf.mxu1 }
 0x22f   : > { %9389 = vst [vmem:[#allocation40_spill] sm:$0xff] %v7594_v48  ;;  %v1774_v50 = vadd.f32 %v1725_v62, %v7505_v15 }
 0x230   : > { %v1727_v44 = vpop.f32.mrf.mxu0  ;;  %v1960_v1 = vpop.f32.mrf.mxu1 }
 0x231   : > { %v1775_v10 = vadd.f32 %v1727_v44, %v7508_v16  ;;  %v7598_v46 = vadd.f32 %v1960_v1, %v1770_v17 }
 0x232   : > { %v1729_v34 = vpop.f32.mrf.mxu0  ;;  %v1962_v59 = vpop.f32.mrf.mxu1 }
 0x233   : > { %v1776_v32 = vadd.f32 %v1729_v34, %v7512_v61  ;;  %v7601_v52 = vadd.f32 %v1962_v59, %v1771_v0 }
 0x234   : > { %v7603_v19 = vpop.f32.mrf.mxu0  ;;  %v1964_v9 = vpop.f32.mrf.mxu1 }
 0x235   : > { %9390 = vst [vmem:[#allocation41_spill] sm:$0xff] %v7603_v19  ;;  %v7605_v58 = vadd.f32 %v1964_v9, %v1772_v2 }
 0x236   : > { %v1735_v27 = vpop.f32.mrf.mxu0  ;;  %v7607_v23 = vpop.f32.mrf.mxu1 }
 0x237   : > { %9391 = vst [vmem:[#allocation42_spill] sm:$0xff] %v7607_v23  ;;  %v1778_v62 = vadd.f32 %v1735_v27, %v7520_v14 }
 0x238   : > { %v1737_v15 = vpop.f32.mrf.mxu0  ;;  %v1970_v16 = vpop.f32.mrf.mxu1 }
 0x239   : > { %v1779_v17 = vadd.f32 %v1737_v15, %v7523_v40  ;;  %v7611_v44 = vadd.f32 %v1970_v16, %v1774_v50 }
 0x23a   : > { %v1739_v1 = vpop.f32.mrf.mxu0  ;;  %v1972_v61 = vpop.f32.mrf.mxu1 }
 0x23b   : > { %v1780_v0 = vadd.f32 %v1739_v1, %v7527_v30  ;;  %v7614_v34 = vadd.f32 %v1972_v61, %v1775_v10 }
 0x23c   : > { %v7616_v59 = vpop.f32.mrf.mxu0  ;;  %v1974_v2 = vpop.f32.mrf.mxu1 }
 0x23d   : > { %9392 = vst [vmem:[#allocation43_spill] sm:$0xff] %v7616_v59  ;;  %v7618_v9 = vadd.f32 %v1974_v2, %v1776_v32 }
 0x23e   : > { %v1745_v19 = vpop.f32.mrf.mxu0  ;;  %v7620_v23 = vpop.f32.mrf.mxu1 }
 0x23f   : > { %9393 = vst [vmem:[#allocation44_spill] sm:$0xff] %v7620_v23  ;;  %v7623_v14 = vadd.f32 %v1745_v19, %v7532_v21 }
 0x240   : > { %v1747_v40 = vpop.f32.mrf.mxu0  ;;  %v1980_v27 = vpop.f32.mrf.mxu1 }
 0x241   : > { %9394 = vst [vmem:[#allocation45_spill] sm:$0xff] %v7623_v14  ;;  %v7626_v50 = vadd.f32 %v1747_v40, %v7535_v29  ;;  %v7628_v15 = vadd.f32 %v1980_v27, %v1778_v62 }
 0x242   : > { %v1749_v30 = vpop.f32.mrf.mxu0  ;;  %v1982_v10 = vpop.f32.mrf.mxu1 }
 0x243   : > { %9395 = vst [vmem:[#allocation46_spill] sm:$0xff] %v7626_v50  ;;  %v7631_v16 = vadd.f32 %v1749_v30, %v7540_v25  ;;  %v7633_v32 = vadd.f32 %v1982_v10, %v1779_v17 }
 0x244   : > { %v7635_v1 = vpop.f32.mrf.mxu0  ;;  %v1984_v61 = vpop.f32.mrf.mxu1 }
 0x245   : > { %9396 = vst [vmem:[#allocation47_spill] sm:$0xff] %v7631_v16  ;;  %9397 = vst [vmem:[#allocation48_spill] sm:$0xff] %v7635_v1  ;;  %v7637_v2 = vadd.f32 %v1984_v61, %v1780_v0 }
 0x246   : > { %v7639_v21 = vpop.f32.mrf.mxu1  ;;  %v2187_v19 = vpop.f32.mrf.mxu0 }
 0x247   : > { %9398 = vst [vmem:[#allocation49_spill] sm:$0xff] %v7639_v21  ;;  %v7642_v29 = vadd.f32 %v2187_v19, %v7546_v13 }
 0x248   : > { %v7644_v62 = vpop.f32.mrf.mxu1  ;;  %v2189_v40 = vpop.f32.mrf.mxu0 }
 0x249   : > { %9399 = vst [vmem:[#allocation50_spill] sm:$0xff] %v7644_v62  ;;  %v7647_v27 = vadd.f32 %v2189_v40, %v7549_v26 }
 0x24a   : > { %v7649_v25 = vpop.f32.mrf.mxu1  ;;  %v2191_v17 = vpop.f32.mrf.mxu0 }
 0x24b   : > { %9400 = vst [vmem:[#allocation51_spill] sm:$0xff] %v7649_v25  ;;  %v7652_v30 = vadd.f32 %v2191_v17, %v7553_v11 }
 0x24c   : > { %v7654_v0 = vpop.f32.mrf.mxu1  ;;  %v7656_v10 = vpop.f32.mrf.mxu0 }
 0x24d   : > { %9401 = vst [vmem:[#allocation52_spill] sm:$0xff] %v7654_v0 }
 0x24e   : > { %v7658_v61 = vpop.f32.mrf.mxu1  ;;  %v2197_v13 = vpop.f32.mrf.mxu0 }
 0x24f   : > { %9402 = vst [vmem:[#allocation53_spill] sm:$0xff] %v7658_v61  ;;  %v7661_v19 = vadd.f32 %v2197_v13, %v7559_v37 }
 0x250   : > { %v7663_v16 = vpop.f32.mrf.mxu1  ;;  %v2199_v26 = vpop.f32.mrf.mxu0 }
 0x251   : > { %v7666_v40 = vadd.f32 %v2199_v26, %v7562_v47 }
 0x252   : > { %v2201_v25 = vpop.f32.mrf.mxu0  ;;  %v7668_v50 = vpop.f32.mrf.mxu1 }
 0x253   : > { %v7671_v11 = vadd.f32 %v2201_v25, %v7566_v55 }
 0x254   : > { %v7673_v17 = vpop.f32.mrf.mxu1  ;;  %v7675_v0 = vpop.f32.mrf.mxu0 }
 0x256   : > { %v2207_v61 = vpop.f32.mrf.mxu0  ;;  %v7677_v62 = vpop.f32.mrf.mxu1 }
 0x257   : > { %v7680_v37 = vadd.f32 %v2207_v61, %v7572_v45 }
 0x258   : > { %v7682_v13 = vpop.f32.mrf.mxu1  ;;  %v2209_v47 = vpop.f32.mrf.mxu0 }
 0x259   : > { %v7685_v26 = vadd.f32 %v2209_v47, %v7575_v3 }
 0x25a   : > { %v2211_v14 = vpop.f32.mrf.mxu0  ;;  %v7687_v21 = vpop.f32.mrf.mxu1 }
 0x25b   : > { %v7690_v55 = vadd.f32 %v2211_v14, %v7579_v24 }
 0x25c   : > { %v7692_v25 = vpop.f32.mrf.mxu1  ;;  %v7694_v1 = vpop.f32.mrf.mxu0 }
 0x25e   : > { %v2217_v23 = vpop.f32.mrf.mxu0  ;;  %v7699_v61 = vpop.f32.mrf.mxu1 }
 0x25f   : > { %v7697_v45 = vadd.f32 %v2217_v23, %v7585_v54 }
 0x260   : > { %v2219_v59 = vpop.f32.mrf.mxu0  ;;  %v7704_v51 = vpop.f32.mrf.mxu1 }
 0x261   : > { %9403 = vst [vmem:[#allocation54_spill] sm:$0xff] %v7697_v45  ;;  %v7702_v3 = vadd.f32 %v2219_v59, %v7588_v35  ;;  %v7719_v59 = vpop.permute.xlu1 %2799 }
 0x262   : > { %v2221_v47 = vpop.f32.mrf.mxu0  ;;  %v7711_v57 = vpop.f32.mrf.mxu1 }
 0x263   : > { %9404 = vst [vmem:[#allocation55_spill] sm:$0xff] %v7702_v3  ;;  %v7707_v24 = vadd.f32 %v2221_v47, %v7592_v7  ;;  %v2795_v47 = vpop.permute.xlu0 %2794 }
 0x264   : > { %v7709_v14 = vpop.f32.mrf.mxu0  ;;  %v7721_v3 = vpop.f32.mrf.mxu1 }
 0x265   : > { %9405 = vst [vmem:[#allocation56_spill] sm:$0xff] %v7707_v24  ;;  %9406 = vst [vmem:[#allocation57_spill] sm:$0xff] %v7709_v14 }
 0x266   : > { %v2227_v48 = vpop.f32.mrf.mxu0  ;;  %v7728_v31 = vpop.f32.mrf.mxu1 }
 0x267   : > { %v7714_v23 = vadd.f32 %v2227_v48, %v7598_v46  ;;  %9411 = vst [vmem:[#allocation62_spill] sm:$0xff] %v7728_v31 }
 0x268   : > { %v2229_v54 = vpop.f32.mrf.mxu0 }
 0x269   : > { %9407 = vst [vmem:[#allocation58_spill] sm:$0xff] %v7714_v23  ;;  %v7717_v45 = vadd.f32 %v2229_v54, %v7601_v52  ;;  %v7733_v52 = vpop.permute.xlu1 %2804 }
 0x26a   : > { %v2231_v35 = vpop.f32.mrf.mxu0 }
 0x26b   : > { %9408 = vst [vmem:[#allocation59_spill] sm:$0xff] %v7717_v45  ;;  %v7724_v7 = vadd.f32 %v2231_v35, %v7605_v58  ;;  %v7738_v45 = vpop.permute.xlu0 %2809  ;;  %v7740_v58 = vpop.f32.mrf.mxu1 }
 0x26c   : > { %v7726_v24 = vpop.f32.mrf.mxu0  ;;  %9414 = vst [vmem:[#allocation65_spill] sm:$0xff] %v7740_v58 }
 0x26d   : > { %9409 = vst [vmem:[#allocation60_spill] sm:$0xff] %v7724_v7  ;;  %9410 = vst [vmem:[#allocation61_spill] sm:$0xff] %v7726_v24  ;;  %v7747_v31 = vpop.permute.xlu1 %2954 }
 0x26e   : > { %v2237_v14 = vpop.f32.mrf.mxu0 }
 0x26f   : > { %v7731_v48 = vadd.f32 %v2237_v14, %v7611_v44  ;;  %v7749_v44 = vpop.f32.mrf.mxu1 }
 0x270   : > { %v2239_v46 = vpop.f32.mrf.mxu0  ;;  %9417 = vst [vmem:[#allocation68_spill] sm:$0xff] %v7749_v44 }
 0x271   : > { %9412 = vst [vmem:[#allocation63_spill] sm:$0xff] %v7731_v48  ;;  %v7736_v54 = vadd.f32 %v2239_v46, %v7614_v34  ;;  %v7754_v34 = vpop.permute.xlu0 %2959  ;;  %v7759_v58 = vpop.f32.mrf.mxu1 }
 0x272   : > { %v2241_v23 = vpop.f32.mrf.mxu0  ;;  %9420 = vst [vmem:[#allocation71_spill] sm:$0xff] %v7759_v58 }
 0x273   : > { %9413 = vst [vmem:[#allocation64_spill] sm:$0xff] %v7736_v54  ;;  %v7743_v35 = vadd.f32 %v2241_v23, %v7618_v9 }
 0x274   : > { %v7745_v7 = vpop.f32.mrf.mxu0 }
 0x275   : > { %9415 = vst [vmem:[#allocation66_spill] sm:$0xff] %v7743_v35  ;;  %9416 = vst [vmem:[#allocation67_spill] sm:$0xff] %v7745_v7  ;;  %v7766_v7 = vpop.permute.xlu1 %2814  ;;  %v7768_v35 = vpop.permute.xlu0 %2964 }
 0x276   : > { %v2247_v24 = vpop.f32.mrf.mxu0 }
 0x277   : > { %v7752_v14 = vadd.f32 %v2247_v24, %v7628_v15  ;;  %v7772_v24 = vpop.f32.mrf.mxu1 }
 0x278   : > { %v2249_v46 = vpop.f32.mrf.mxu0  ;;  %9424 = vst [vmem:[#allocation75_spill] sm:$0xff] %v7772_v24 }
 0x279   : > { %9418 = vst [vmem:[#allocation69_spill] sm:$0xff] %v7752_v14  ;;  %v7757_v54 = vadd.f32 %v2249_v46, %v7633_v32  ;;  %v7778_v46 = vpop.permute.xlu1 %2819 }
 0x27a   : > { %v2251_v48 = vpop.f32.mrf.mxu0  ;;  %9427 = vst [vmem:[#allocation78_spill] sm:$0xff] %v7778_v46 }
 0x27b   : > { %9419 = vst [vmem:[#allocation70_spill] sm:$0xff] %v7757_v54  ;;  %v7762_v9 = vadd.f32 %v2251_v48, %v7637_v2  ;;  %v7780_v54 = vpop.f32.mrf.mxu1  ;;  %v1529_v2 = vadd.f32 %v7437_v28, %v7419_v4  ;;  %v7784_v48 = vpop.permute.xlu0 %2969  ;;  %v2513_v4 = vadd.f32 %v7673_v17, %v7652_v30 }
 0x27c   : > { %v7764_v23 = vpop.f32.mrf.mxu0  ;;  %9428 = vst [vmem:[#allocation79_spill] sm:$0xff] %v7780_v54 }
 0x27d   : > { %9421 = vst [vmem:[#allocation72_spill] sm:$0xff] %v7762_v9  ;;  %9422 = vst [vmem:[#allocation73_spill] sm:$0xff] %v7764_v23  ;;  %v1757_v23 = vadd.f32 %v7538_v39, %v1529_v2  ;;  %v7798_v28 = vpop.permute.xlu1 %2824  ;;  %v1533_v39 = vadd.f32 %v7453_v42, %v7433_v53  ;;  %v7814_v42 = vadd.f32 %v7375_v12, %v7357_v38 }
 0x27e   : > { %v7770_v15 = vpop.f32.mrf.mxu0 }
 0x27f   : > { %9423 = vst [vmem:[#allocation74_spill] sm:$0xff] %v7770_v15  ;;  %v2511_v15 = vadd.f32 %v7663_v16, %v7642_v29  ;;  %v2002_v54 = vadd.f32 %v7555_v6, %v1757_v23  ;;  %v7803_v29 = vpop.permute.xlu0 %2974  ;;  %v1761_v23 = vadd.f32 %v7551_v18, %v1533_v39 }
 0x280   : > { %v7774_v14 = vpop.f32.mrf.mxu0 }
 0x281   : > { %9425 = vst [vmem:[#allocation76_spill] sm:$0xff] %v7774_v14  ;;  %v7793_v14 = vpop.f32.mrf.mxu1  ;;  %v2269_v16 = vadd.f32 %v7656_v10, %v2002_v54  ;;  %v7818_v10 = vadd.f32 %v7389_v33, %v7371_v63  ;;  %v2006_v18 = vadd.f32 %v7568_v60, %v1761_v23  ;;  %v7823_v54 = vadd.f32 %v7403_v49, %v7385_v22 }
 0x282   : > { %v7776_v32 = vpop.f32.mrf.mxu0  ;;  %v2517_v33 = vadd.f32 %v7692_v25, %v7671_v11  ;;  %v1541_v11 = vadd.f32 %v7484_v56, %v7465_v43 }
 0x283   : > { %9426 = vst [vmem:[#allocation77_spill] sm:$0xff] %v7776_v32  ;;  %v2512_v32 = vadd.f32 %v7668_v50, %v7647_v27  ;;  %v7805_v27 = vpop.f32.mrf.mxu1  ;;  %v2514_v30 = vadd.f32 %v7677_v62, %v2269_v16  ;;  %v2273_v63 = vadd.f32 %v7675_v0, %v2006_v18  ;;  %v7834_v60 = vpop.permute.xlu0 %2979  ;;  %v1537_v0 = vadd.f32 %v7469_v5, %v7449_v8 }
 0x284   : > { %v7786_v9 = vpop.f32.mrf.mxu0 }
 0x285   : > { %9429 = vst [vmem:[#allocation80_spill] sm:$0xff] %v7786_v9  ;;  %v2518_v25 = vadd.f32 %v7699_v61, %v2273_v63  ;;  %v1765_v23 = vadd.f32 %v7564_v36, %v1537_v0  ;;  %v2519_v36 = vadd.f32 %v7704_v51, %v7680_v37  ;;  %v2521_v51 = vadd.f32 %v7721_v3, %v7690_v55 }
 0x286   : > { %v2681_v24 = vpop.f32.mrf.mxu0 }
 0x287   : > { %v2760_v58 = vadd.f32 %v2681_v24, %v2511_v15 }
 0x288   : > { %v2683_v44 = vpop.f32.mrf.mxu0 }
 0x289   : > { %v2872_v9 = vadd.f32 %v2795_v47, %v2760_v58  ;;  %v2761_v46 = vadd.f32 %v2683_v44, %v2512_v32  ;;  %v2515_v58 = vadd.f32 %v7682_v13, %v7661_v19  ;;  %v2516_v19 = vadd.f32 %v7687_v21, %v7666_v40  ;;  %v7827_v13 = vpop.permute.xlu1 %2829 }
 0x28a   : > { %v2685_v50 = vpop.f32.mrf.mxu0 }
 0x28b   : > { %v2873_v15 = vadd.f32 %v2795_v47, %v2761_v46  ;;  %v2762_v6 = vadd.f32 %v2685_v50, %v2513_v4  ;;  %v2904_v44 = vmax.f32 %v2872_v9, 0.0  ;;  %v7829_v9 = vpop.f32.mrf.mxu1 }
 0x28c   : > { %v2687_v17 = vpop.f32.mrf.mxu0 }
 0x28d   : > { %v2905_v24 = vmax.f32 %v2873_v15, 0.0  ;;  %v2874_v53 = vadd.f32 %v7719_v59, %v2762_v6  ;;  %v2763_v47 = vadd.f32 %v2687_v17, %v2514_v30  ;;  %v3032_v21 = vmul.f32 %v7747_v31, %v2904_v44  ;;  %v7847_v39 = vpop.f32.mrf.mxu1  ;;  %v7855_v43 = vpop.permute.xlu1 %2834 }
 0x28e   : > { %v2691_v62 = vpop.f32.mrf.mxu0 }
 0x28f   : > { %v2906_v38 = vmax.f32 %v2874_v53, 0.0  ;;  %v2764_v12 = vadd.f32 %v2691_v62, %v2515_v58  ;;  %v2875_v32 = vadd.f32 %v7719_v59, %v2763_v47  ;;  %v7837_v49 = vadd.f32 %v2905_v24, %v2904_v44  ;;  %v7866_v18 = vpop.f32.mrf.mxu1 }
 0x290   : > { %v2693_v22 = vpop.f32.mrf.mxu0  ;;  %v3033_v30 = vmul.f32 %v7747_v31, %v2905_v24  ;;  %v2520_v31 = vadd.f32 %v7711_v57, %v7685_v26 }
 0x291   : > { %v3034_v40 = vmul.f32 %v7754_v34, %v2906_v38  ;;  %v2876_v46 = vadd.f32 %v7733_v52, %v2764_v12  ;;  %v2765_v2 = vadd.f32 %v2693_v22, %v2516_v19  ;;  %v2907_v4 = vmax.f32 %v2875_v32, 0.0  ;;  %v9430_v22 = vld [vmem:[#allocation29_spill] sm:$0xff]  ;;  %v7883_v3 = vpop.permute.xlu1 %2839 }
 0x292   : > { %v2695_v59 = vpop.f32.mrf.mxu0 }
 0x293   : > { %v3064_v16 = vadd.f32 %v3034_v40, %v3032_v21  ;;  %v2908_v50 = vmax.f32 %v2876_v46, 0.0  ;;  %v2877_v15 = vadd.f32 %v7733_v52, %v2765_v2  ;;  %v2766_v6 = vadd.f32 %v2695_v59, %v2517_v33  ;;  %v9431_v21 = vld [vmem:[#allocation38_spill] sm:$0xff]  ;;  %v7885_v2 = vpop.f32.mrf.mxu1 }
 0x294   : > { %v3035_v5 = vmul.f32 %v7754_v34, %v2907_v4  ;;  %v2697_v8 = vpop.f32.mrf.mxu0  ;;  %v7853_v17 = vadd.f32 %v2907_v4, %v2906_v38  ;;  %v2010_v52 = vadd.f32 %v7581_v20, %v1765_v23  ;;  %v7864_v34 = vpop.permute.xlu0 %2984  ;;  %v9432_v40 = vld [vmem:[#allocation62_spill] sm:$0xff] }
 0x295   : > { %v3036_v56 = vmul.f32 %v7768_v35, %v2908_v50  ;;  %v2909_v61 = vmax.f32 %v2877_v15, 0.0  ;;  %v2878_v58 = vadd.f32 %v7738_v45, %v2766_v6  ;;  %v2767_v44 = vadd.f32 %v2697_v8, %v2518_v25  ;;  %v9435_v15 = vld [vmem:[#allocation65_spill] sm:$0xff] }
 0x296   : > { %v3085_v24 = vadd.f32 %v3035_v5, %v3033_v30  ;;  %v2701_v53 = vpop.f32.mrf.mxu0  ;;  %v2277_v20 = vadd.f32 %v7694_v1, %v2010_v52  ;;  %v9438_v52 = vld [vmem:[#allocation31_spill] sm:$0xff] }
 0x297   : > { %v3065_v47 = vadd.f32 %v3064_v16, %v3036_v56  ;;  %v3037_v62 = vmul.f32 %v7768_v35, %v2909_v61  ;;  %v2910_v19 = vmax.f32 %v2878_v58, 0.0  ;;  %v2879_v38 = vadd.f32 %v7738_v45, %v2767_v44  ;;  %v9433_v16 = vld [vmem:[#allocation40_spill] sm:$0xff] }
 0x298   : > { %v2768_v37 = vadd.f32 %v2701_v53, %v2519_v36  ;;  %v2703_v12 = vpop.f32.mrf.mxu0  ;;  %v7873_v57 = vadd.f32 %v2909_v61, %v2908_v50  ;;  %v7878_v35 = vadd.f32 %v9430_v22, %v7399_v41  ;;  %v1769_v45 = vadd.f32 %v9431_v21, %v1541_v11  ;;  %v9434_v50 = vld [vmem:[#allocation54_spill] sm:$0xff]  ;;  %v7892_v6 = vpop.permute.xlu0 %2989 }
 0x299   : > { %v3086_v26 = vadd.f32 %v3085_v24, %v3037_v62  ;;  %v3038_v63 = vmul.f32 %v7784_v48, %v2910_v19  ;;  %v2911_v33 = vmax.f32 %v2879_v38, 0.0  ;;  %v2769_v32 = vadd.f32 %v2703_v12, %v2520_v31  ;;  %v9436_v61 = vld [vmem:[#allocation78_spill] sm:$0xff]  ;;  %v9439_v31 = vld [vmem:[#allocation57_spill] sm:$0xff]  ;;  %v7903_v62 = vpop.f32.mrf.mxu1  ;;  %v9441_v12 = vld [vmem:[#allocation68_spill] sm:$0xff]  ;;  %v7913_v21 = vpop.permute.xlu1 %2844 }
 0x29a   : > { %v2522_v1 = vadd.f32 %v9432_v40, %v2277_v20  ;;  %v2880_v46 = vadd.f32 %v7766_v7, %v2768_v37  ;;  %v2705_v55 = vpop.f32.mrf.mxu0  ;;  %v2014_v41 = vadd.f32 %v9433_v16, %v1769_v45  ;;  %v2523_v11 = vadd.f32 %v9435_v15, %v9434_v50  ;;  %v9440_v37 = vld [vmem:[#allocation55_spill] sm:$0xff] }
 0x29b   : > { %v3066_v0 = vadd.f32 %v3065_v47, %v3038_v63  ;;  %v3039_v25 = vmul.f32 %v7784_v48, %v2911_v33  ;;  %v2881_v4 = vadd.f32 %v7766_v7, %v2769_v32  ;;  %v2770_v59 = vadd.f32 %v2705_v55, %v2521_v51  ;;  %v9437_v48 = vld [vmem:[#allocation30_spill] sm:$0xff]  ;;  %v9443_v63 = vld [vmem:[#allocation71_spill] sm:$0xff]  ;;  %v7923_v15 = vpop.f32.mrf.mxu1 }
 0x29c   : > { %v2912_v23 = vmax.f32 %v2880_v46, 0.0  ;;  %v2707_v30 = vpop.f32.mrf.mxu0  ;;  %v7894_v5 = vadd.f32 %v2911_v33, %v2910_v19  ;;  %v1300_v7 = vadd.f32 %v9437_v48, %v7814_v42  ;;  %v1304_v36 = vadd.f32 %v9438_v52, %v7818_v10  ;;  %v9442_v42 = vld [vmem:[#allocation56_spill] sm:$0xff] }
 0x29d   : > { %v3087_v8 = vadd.f32 %v3086_v26, %v3039_v25  ;;  %v2913_v56 = vmax.f32 %v2881_v4, 0.0  ;;  %v2882_v58 = vadd.f32 %v9436_v61, %v2770_v59  ;;  %v2771_v44 = vadd.f32 %v2707_v30, %v2522_v1  ;;  %v9444_v46 = vld [vmem:[#allocation32_spill] sm:$0xff]  ;;  %v9445_v25 = vld [vmem:[#allocation33_spill] sm:$0xff]  ;;  %v9446_v59 = vld [vmem:[#allocation75_spill] sm:$0xff] }
 0x29e   : > { %v2281_v24 = vadd.f32 %v9439_v31, %v2014_v41  ;;  %v3040_v53 = vmul.f32 %v7803_v29, %v2912_v23  ;;  %v2711_v47 = vpop.f32.mrf.mxu0  ;;  %v2524_v26 = vadd.f32 %v9441_v12, %v9440_v37  ;;  %v2525_v33 = vadd.f32 %v9443_v63, %v9442_v42  ;;  %v7921_v41 = vpop.permute.xlu0 %2994  ;;  %v9452_v37 = vld [vmem:[#allocation59_spill] sm:$0xff] }
 0x29f   : > { %v3041_v19 = vmul.f32 %v7803_v29, %v2913_v56  ;;  %v2914_v38 = vmax.f32 %v2882_v58, 0.0  ;;  %v2883_v20 = vadd.f32 %v9436_v61, %v2771_v44  ;;  %v2772_v51 = vadd.f32 %v2711_v47, %v2523_v11  ;;  %v9448_v58 = vld [vmem:[#allocation58_spill] sm:$0xff]  ;;  %v9449_v44 = vld [vmem:[#allocation79_spill] sm:$0xff]  ;;  %v7938_v63 = vpop.permute.xlu1 %2849 }
 0x2a0   : > { %v3067_v10 = vadd.f32 %v3066_v0, %v3040_v53  ;;  %v2713_v32 = vpop.f32.mrf.mxu0  ;;  %v7911_v22 = vadd.f32 %v2913_v56, %v2912_v23  ;;  %v1545_v55 = vadd.f32 %v9444_v46, %v1300_v7  ;;  %v1308_v4 = vadd.f32 %v9445_v25, %v7823_v54  ;;  %v9447_v56 = vld [vmem:[#allocation39_spill] sm:$0xff] }
 0x2a1   : > { %v3088_v45 = vadd.f32 %v3087_v8, %v3041_v19  ;;  %v3042_v40 = vmul.f32 %v7834_v60, %v2914_v38  ;;  %v2915_v29 = vmax.f32 %v2883_v20, 0.0  ;;  %v2884_v1 = vadd.f32 %v7798_v28, %v2772_v51  ;;  %v9450_v19 = vld [vmem:[#allocation34_spill] sm:$0xff] }
 0x2a2   : > { %v2526_v16 = vadd.f32 %v9446_v59, %v2281_v24  ;;  %v2773_v0 = vadd.f32 %v2713_v32, %v2524_v26  ;;  %v2715_v50 = vpop.f32.mrf.mxu0  ;;  %v1773_v61 = vadd.f32 %v9447_v56, %v1545_v55  ;;  %v2527_v48 = vadd.f32 %v9449_v44, %v9448_v58  ;;  %v9451_v20 = vld [vmem:[#allocation42_spill] sm:$0xff] }
 0x2a3   : > { %v3068_v11 = vadd.f32 %v3067_v10, %v3042_v40  ;;  %v3043_v23 = vmul.f32 %v7834_v60, %v2915_v29  ;;  %v2916_v30 = vmax.f32 %v2884_v1, 0.0  ;;  %v2774_v8 = vadd.f32 %v2715_v50, %v2525_v33  ;;  %v3000_v1 = vpop.permute.xlu0 %2999  ;;  %v9455_v50 = vld [vmem:[#allocation36_spill] sm:$0xff] }
 0x2a4   : > { %v2885_v54 = vadd.f32 %v7798_v28, %v2773_v0  ;;  %v2717_v7 = vpop.f32.mrf.mxu0  ;;  %v7930_v52 = vadd.f32 %v2915_v29, %v2914_v38  ;;  %v1549_v60 = vadd.f32 %v9450_v19, %v1304_v36  ;;  %v2018_v51 = vadd.f32 %v9451_v20, %v1773_v61  ;;  %v7940_v28 = vpop.f32.mrf.mxu1  ;;  %v9454_v36 = vld [vmem:[#allocation61_spill] sm:$0xff] }
 0x2a5   : > { %v3089_v31 = vadd.f32 %v3088_v45, %v3043_v23  ;;  %v3044_v24 = vmul.f32 %v7864_v34, %v2916_v30  ;;  %v2886_v53 = vadd.f32 %v7827_v13, %v2774_v8  ;;  %v2775_v47 = vadd.f32 %v2717_v7, %v2526_v16  ;;  %v9453_v45 = vld [vmem:[#allocation35_spill] sm:$0xff] }
 0x2a6   : > { %v2528_v12 = vadd.f32 %v7793_v14, %v9452_v37  ;;  %v2917_v26 = vmax.f32 %v2885_v54, 0.0  ;;  %v2721_v42 = vpop.f32.mrf.mxu0  ;;  %v1312_v40 = vadd.f32 %v9453_v45, %v7878_v35  ;;  %v2285_v29 = vadd.f32 %v9454_v36, %v2018_v51  ;;  %v7955_v61 = vpop.f32.mrf.mxu1  ;;  %v9458_v7 = vld [vmem:[#allocation63_spill] sm:$0xff]  ;;  %v9462_v36 = vld [vmem:[#allocation44_spill] sm:$0xff] }
 0x2a7   : > { %v3069_v38 = vadd.f32 %v3068_v11, %v3044_v24  ;;  %v2918_v33 = vmax.f32 %v2886_v53, 0.0  ;;  %v2887_v10 = vadd.f32 %v7827_v13, %v2775_v47  ;;  %v2776_v32 = vadd.f32 %v2721_v42, %v2527_v48  ;;  %v9456_v11 = vld [vmem:[#allocation60_spill] sm:$0xff]  ;;  %v9457_v48 = vld [vmem:[#allocation37_spill] sm:$0xff]  ;;  %v9460_v37 = vld [vmem:[#allocation43_spill] sm:$0xff]  ;;  %v3005_v42 = vpop.permute.xlu0 %3004 }
 0x2a8   : > { %v3045_v46 = vmul.f32 %v7864_v34, %v2917_v26  ;;  %v2723_v14 = vpop.f32.mrf.mxu0  ;;  %v7947_v55 = vadd.f32 %v2917_v26, %v2916_v30  ;;  %v1553_v13 = vadd.f32 %v9455_v50, %v1308_v4  ;;  %v2529_v23 = vadd.f32 %v7805_v27, %v9456_v11 }
 0x2a9   : > { %v3046_v25 = vmul.f32 %v7892_v6, %v2918_v33  ;;  %v2919_v59 = vmax.f32 %v2887_v10, 0.0  ;;  %v2888_v16 = vadd.f32 %v7855_v43, %v2776_v32  ;;  %v2777_v0 = vadd.f32 %v2723_v14, %v2528_v12  ;;  %v9461_v12 = vld [vmem:[#allocation64_spill] sm:$0xff] }
 0x2aa   : > { %v2530_v35 = vadd.f32 %v7829_v9, %v2285_v29  ;;  %v3090_v8 = vadd.f32 %v3089_v31, %v3045_v46  ;;  %v2725_v56 = vpop.f32.mrf.mxu0  ;;  %v1557_v54 = vadd.f32 %v9457_v48, %v1312_v40  ;;  %v2531_v4 = vadd.f32 %v7847_v39, %v9458_v7  ;;  %v7964_v9 = vpop.permute.xlu1 %2854  ;;  %v9463_v46 = vld [vmem:[#allocation66_spill] sm:$0xff] }
 0x2ab   : > { %v3070_v34 = vadd.f32 %v3069_v38, %v3046_v25  ;;  %v3047_v30 = vmul.f32 %v7892_v6, %v2919_v59  ;;  %v2920_v58 = vmax.f32 %v2888_v16, 0.0  ;;  %v2889_v44 = vadd.f32 %v7855_v43, %v2777_v0  ;;  %v9459_v6 = vld [vmem:[#allocation41_spill] sm:$0xff] }
 0x2ac   : > { %v2778_v24 = vadd.f32 %v2725_v56, %v2529_v23  ;;  %v2727_v53 = vpop.f32.mrf.mxu0  ;;  %v7962_v27 = vadd.f32 %v2919_v59, %v2918_v33  ;;  %v1777_v51 = vadd.f32 %v9459_v6, %v1549_v60  ;;  %v1781_v43 = vadd.f32 %v9460_v37, %v1553_v13  ;;  %v2498_v33 = vpop.f32.mrf.mxu1  ;;  %v9464_v13 = vld [vmem:[#allocation48_spill] sm:$0xff]  ;;  %v9469_v37 = vld [vmem:[#allocation50_spill] sm:$0xff] }
 0x2ad   : > { %v3091_v31 = vadd.f32 %v3090_v8, %v3047_v30  ;;  %v3048_v47 = vmul.f32 %v7921_v41, %v2920_v58  ;;  %v2921_v19 = vmax.f32 %v2889_v44, 0.0  ;;  %v2779_v20 = vadd.f32 %v2727_v53, %v2530_v35 }
 0x2ae   : > { %v2532_v26 = vadd.f32 %v7866_v18, %v9461_v12  ;;  %v2890_v39 = vadd.f32 %v7883_v3, %v2778_v24  ;;  %v2731_v38 = vpop.f32.mrf.mxu0  ;;  %v2022_v29 = vadd.f32 %v9462_v36, %v1777_v51  ;;  %v2533_v60 = vadd.f32 %v7885_v2, %v9463_v46  ;;  %v2502_v2 = vpop.f32.mrf.mxu1  ;;  %v9471_v12 = vld [vmem:[#allocation51_spill] sm:$0xff] }
 0x2af   : > { %v3071_v10 = vadd.f32 %v3070_v34, %v3048_v47  ;;  %v3049_v32 = vmul.f32 %v7921_v41, %v2921_v19  ;;  %v2891_v45 = vadd.f32 %v7883_v3, %v2779_v20  ;;  %v2780_v40 = vadd.f32 %v2731_v38, %v2531_v4  ;;  %v9465_v41 = vld [vmem:[#allocation49_spill] sm:$0xff]  ;;  %v9466_v3 = vld [vmem:[#allocation67_spill] sm:$0xff]  ;;  %v7983_v34 = vpop.permute.xlu1 %2859 }
 0x2b0   : > { %v2922_v14 = vmax.f32 %v2890_v39, 0.0  ;;  %v2733_v25 = vpop.f32.mrf.mxu0  ;;  %v7977_v59 = vadd.f32 %v2921_v19, %v2920_v58  ;;  %v1785_v11 = vadd.f32 %v9464_v13, %v1557_v54  ;;  %v2026_v23 = vadd.f32 %v9465_v41, %v1781_v43  ;;  %v9467_v4 = vld [vmem:[#allocation69_spill] sm:$0xff]  ;;  %v3010_v54 = vpop.permute.xlu0 %3009 }
 0x2b1   : > { %v3092_v18 = vadd.f32 %v3091_v31, %v3049_v32  ;;  %v2923_v16 = vmax.f32 %v2891_v45, 0.0  ;;  %v2892_v0 = vadd.f32 %v7913_v21, %v2780_v40  ;;  %v2781_v50 = vadd.f32 %v2733_v25, %v2532_v26 }
 0x2b2   : > { %v2289_v35 = vadd.f32 %v9466_v3, %v2022_v29  ;;  %v3050_v8 = vmul.f32 %v3000_v1, %v2922_v14  ;;  %v2735_v56 = vpop.f32.mrf.mxu0  ;;  %v2535_v24 = vadd.f32 %v7923_v15, %v9467_v4  ;;  %v9473_v29 = vld [vmem:[#allocation73_spill] sm:$0xff]  ;;  %v9475_v3 = vld [vmem:[#allocation47_spill] sm:$0xff] }
 0x2b3   : > { %v3051_v30 = vmul.f32 %v3000_v1, %v2923_v16  ;;  %v2924_v44 = vmax.f32 %v2892_v0, 0.0  ;;  %v2893_v58 = vadd.f32 %v7913_v21, %v2781_v50  ;;  %v2782_v48 = vadd.f32 %v2735_v56, %v2533_v60  ;;  %v9468_v1 = vld [vmem:[#allocation45_spill] sm:$0xff]  ;;  %v9470_v21 = vld [vmem:[#allocation46_spill] sm:$0xff]  ;;  %v9474_v60 = vld [vmem:[#allocation72_spill] sm:$0xff]  ;;  %v2865_v0 = vpop.permute.xlu1 %2864 }
 0x2b4   : > { %v2534_v7 = vadd.f32 %v7903_v62, %v2289_v35  ;;  %v3072_v53 = vadd.f32 %v3071_v10, %v3050_v8  ;;  %v2737_v31 = vpop.f32.mrf.mxu0  ;;  %v7989_v47 = vadd.f32 %v2923_v16, %v2922_v14  ;;  %v2027_v43 = vadd.f32 %v9469_v37, %v9468_v1  ;;  %v9472_v62 = vld [vmem:[#allocation70_spill] sm:$0xff]  ;;  %v2504_v10 = vpop.f32.mrf.mxu1  ;;  %v9477_v8 = vld [vmem:[#allocation53_spill] sm:$0xff] }
 0x2b5   : > { %v3093_v19 = vadd.f32 %v3092_v18, %v3051_v30  ;;  %v3052_v20 = vmul.f32 %v3005_v42, %v2924_v44  ;;  %v2925_v6 = vmax.f32 %v2893_v58, 0.0  ;;  %v2894_v51 = vadd.f32 %v7938_v63, %v2782_v48 }
 0x2b6   : > { %v2028_v26 = vadd.f32 %v9471_v12, %v9470_v21  ;;  %v2536_v39 = vadd.f32 %v7940_v28, %v9472_v62  ;;  %v2783_v15 = vadd.f32 %v2737_v31, %v2534_v7  ;;  %v2741_v38 = vpop.f32.mrf.mxu0  ;;  %v2293_v46 = vadd.f32 %v9473_v29, %v2026_v23  ;;  %v3015_v23 = vpop.permute.xlu0 %3014  ;;  %v9479_v31 = vld [vmem:[#allocation76_spill] sm:$0xff]  ;;  %v9481_v21 = vld [vmem:[#allocation77_spill] sm:$0xff] }
 0x2b7   : > { %v3073_v32 = vadd.f32 %v3072_v53, %v3052_v20  ;;  %v3053_v45 = vmul.f32 %v3005_v42, %v2925_v6  ;;  %v2926_v40 = vmax.f32 %v2894_v51, 0.0  ;;  %v2784_v36 = vadd.f32 %v2741_v38, %v2535_v24  ;;  %v9476_v42 = vld [vmem:[#allocation52_spill] sm:$0xff]  ;;  %v2506_v48 = vpop.f32.mrf.mxu1  ;;  %v9478_v24 = vld [vmem:[#allocation74_spill] sm:$0xff]  ;;  %v2870_v38 = vpop.permute.xlu1 %2869 }
 0x2b8   : > { %v2537_v14 = vadd.f32 %v7955_v61, %v9474_v60  ;;  %v2895_v25 = vadd.f32 %v7938_v63, %v2783_v15  ;;  %v2743_v18 = vpop.f32.mrf.mxu0  ;;  %v8002_v16 = vadd.f32 %v2925_v6, %v2924_v44  ;;  %v2029_v35 = vadd.f32 %v9476_v42, %v9475_v3 }
 0x2b9   : > { %v3094_v50 = vadd.f32 %v3093_v19, %v3053_v45  ;;  %v3054_v28 = vmul.f32 %v3010_v54, %v2926_v40  ;;  %v2896_v13 = vadd.f32 %v7964_v9, %v2784_v36  ;;  %v2785_v41 = vadd.f32 %v2743_v18, %v2536_v39 }
 0x2ba   : > { %v2030_v56 = vadd.f32 %v9477_v8, %v1785_v11  ;;  %v2538_v30 = vadd.f32 %v2498_v33, %v2293_v46  ;;  %v2927_v58 = vmax.f32 %v2895_v25, 0.0  ;;  %v2745_v61 = vpop.f32.mrf.mxu0  ;;  %v2294_v53 = vadd.f32 %v9478_v24, %v2027_v43  ;;  %v3020_v29 = vpop.permute.xlu0 %3019 }
 0x2bb   : > { %v3074_v63 = vadd.f32 %v3073_v32, %v3054_v28  ;;  %v2928_v7 = vmax.f32 %v2896_v13, 0.0  ;;  %v2897_v44 = vadd.f32 %v7964_v9, %v2785_v41  ;;  %v2786_v4 = vadd.f32 %v2745_v61, %v2537_v14  ;;  %v2508_v32 = vpop.f32.mrf.mxu1 }
 0x2bc   : > { %v2295_v19 = vadd.f32 %v9479_v31, %v2028_v26  ;;  %v3055_v20 = vmul.f32 %v3010_v54, %v2927_v58  ;;  %v2747_v6 = vpop.f32.mrf.mxu0  ;;  %v8011_v51 = vadd.f32 %v2927_v58, %v2926_v40  ;;  %v2296_v12 = vadd.f32 %v9481_v21, %v2029_v35  ;;  %v9482_v40 = vld [vmem:[#allocation80_spill] sm:$0xff] }
 0x2bd   : > { %v3056_v1 = vmul.f32 %v3015_v23, %v2928_v7  ;;  %v2929_v11 = vmax.f32 %v2897_v44, 0.0  ;;  %v2898_v33 = vadd.f32 %v7983_v34, %v2786_v4  ;;  %v2787_v37 = vadd.f32 %v2747_v6, %v2538_v30  ;;  %v3025_v30 = vpop.permute.xlu1 %3024 }
 0x2be   : > { %9480 = vst [vmem:[#allocation29_spill] sm:$0xff] %v8011_v51  ;;  %v2539_v62 = vadd.f32 %v2502_v2, %v2294_v53  ;;  %v2540_v39 = vadd.f32 %v2504_v10, %v2295_v19  ;;  %v3095_v15 = vadd.f32 %v3094_v50, %v3055_v20  ;;  %v2751_v9 = vpop.f32.mrf.mxu0  ;;  %v2297_v36 = vadd.f32 %v9482_v40, %v2030_v56  ;;  %v3030_v31 = vpop.permute.xlu0 %3029 }
 0x2bf   : > { %v3075_v43 = vadd.f32 %v3074_v63, %v3056_v1  ;;  %v3057_v45 = vmul.f32 %v3015_v23, %v2929_v11  ;;  %v2930_v26 = vmax.f32 %v2898_v33, 0.0  ;;  %v2899_v54 = vadd.f32 %v7983_v34, %v2787_v37 }
 0x2c0   : > { %v2541_v46 = vadd.f32 %v2506_v48, %v2296_v12  ;;  %v2788_v60 = vadd.f32 %v2751_v9, %v2539_v62  ;;  %v2753_v14 = vpop.f32.mrf.mxu0  ;;  %v8017_v25 = vadd.f32 %v2929_v11, %v2928_v7  ;;  %v2542_v28 = vadd.f32 %v2508_v32, %v2297_v36 }
 0x2c1   : > { %v3096_v18 = vadd.f32 %v3095_v15, %v3057_v45  ;;  %v3058_v2 = vmul.f32 %v3020_v29, %v2930_v26  ;;  %v2931_v10 = vmax.f32 %v2899_v54, 0.0  ;;  %v2789_v50 = vadd.f32 %v2753_v14, %v2540_v39 }
 0x2c2   : > { %9483 = vst [vmem:[#allocation38_spill] sm:$0xff] %v8017_v25  ;;  %v2900_v13 = vadd.f32 %v2865_v0, %v2788_v60  ;;  %v2755_v41 = vpop.f32.mrf.mxu0  ;;  %v3107_v45 = vstv %s3106_s27  ;;  %s9494_s27 = smov 111  }
 0x2c3   : > { %v3076_v3 = vadd.f32 %v3075_v43, %v3058_v2  ;;  %v3059_v42 = vmul.f32 %v3020_v29, %v2931_v10  ;;  %v2901_v35 = vadd.f32 %v2865_v0, %v2789_v50  ;;  %v2790_v8 = vadd.f32 %v2755_v41, %v2541_v46 }
 0x2c4   : > { %v2932_v34 = vmax.f32 %v2900_v13, 0.0  ;;  %v2757_v23 = vpop.f32.mrf.mxu0  ;;  %v8019_v56 = vadd.f32 %v2931_v10, %v2930_v26  ;;  %v6626_v50 = vmov 1966171168  }
 0x2c5   : > { %v3097_v58 = vadd.f32 %v3096_v18, %v3059_v42  ;;  %v2933_v61 = vmax.f32 %v2901_v35, 0.0  ;;  %v2902_v48 = vadd.f32 %v2870_v38, %v2790_v8  ;;  %v2791_v63 = vadd.f32 %v2757_v23, %v2542_v28  ;;  %v9487_v42 = vld [vmem:[#allocation19_spill] sm:$0xff] }
 0x2c6   : > { %9484 = vst [vmem:[#allocation62_spill] sm:$0xff] %v8019_v56  ;;  %v3060_v7 = vmul.f32 %v3025_v30, %v2932_v34  ;;  %v3126_v28 = vunpack.c.l.s4 %v6626_v50  ;;  %v9496_v50 = vld [vmem:[#allocation22_spill] sm:$0xff] }
 0x2c7   : > { %v3061_v44 = vmul.f32 %v3025_v30, %v2933_v61  ;;  %v2934_v4 = vmax.f32 %v2902_v48, 0.0  ;;  %v2903_v24 = vadd.f32 %v2870_v38, %v2791_v63  ;;  %v8021_v53 = vadd.f32 %v2933_v61, %v2932_v34  ;;  %v6457_v34 = vld [vmem:[%s6809_s16] sm:$0xff]  ;;  %v6458_v30 = vld [vmem:[%s6809_s16 + $0x10] sm:$0xff] }
 0x2c8   : > { %v3077_v19 = vadd.f32 %v3076_v3, %v3060_v7  ;;  %v3127_v13 = vunpack.c.0.s8 %v3126_v28  ;;  %v6459_v7 = vld [vmem:[%s6809_s16 + $0x8] sm:$0xff] }
 0x2c9   : > { %9485 = vst [vmem:[#allocation40_spill] sm:$0xff] %v8021_v53  ;;  %v3098_v20 = vadd.f32 %v3097_v58, %v3061_v44  ;;  %v3062_v0 = vmul.f32 %v3030_v31, %v2934_v4  ;;  %v2935_v6 = vmax.f32 %v2903_v24, 0.0 }
 0x2ca   : > { %v3130_v35 = vsub.s32 %v3127_v13, %v9487_v42  ;;  %v9497_v13 = vld [vmem:[#allocation21_spill] sm:$0xff] }
 0x2cb   : > { %v3078_v1 = vadd.f32 %v3077_v19, %v3062_v0  ;;  %v3063_v11 = vmul.f32 %v3030_v31, %v2935_v6  ;;  %v8023_v33 = vadd.f32 %v2935_v6, %v2934_v4  ;;  %v6460_v4 = vld [vmem:[%s6809_s16 + $0x18] sm:$0xff]  ;;  %v9488_v31 = vlaneseq  ;;  %s9489_s16 = smov 15   ;;  %v3275_v6 = vld [vmem:[%s9302_s9 + $0x8] sm:$0xff] }
 0x2cd   : > { %9486 = vst [vmem:[#allocation54_spill] sm:$0xff] %v8023_v33  ;;  %v3079_v37 = vrot.slane %v3078_v1, 4  ;;  %v3099_v21 = vadd.f32 %v3098_v20, %v3063_v11  ;;  %vm3142_vm9 = vcmp.lt.s32.totalorder %v9488_v31, 256  ;;  %v3277_v11 = vld [vmem:[%s9302_s9 + $0x18] sm:$0xff] }
 0x2cf   : > { %v3080_v12 = vadd.f32 %v3079_v37, %v3078_v1  ;;  %v3100_v62 = vrot.slane %v3099_v21, 4  ;;  %v3274_v1 = vld [vmem:[%s9302_s9] sm:$0xff]  ;;  %v3276_v37 = vld [vmem:[%s9302_s9 + $0x10] sm:$0xff] }
 0x2d1   : > { %v3081_v39 = vrot.slane %v3080_v12, 2  ;;  %v3101_v15 = vadd.f32 %v3100_v62, %v3099_v21  ;;  %v3279_v21 = vld [vmem:[%s9302_s9 + $0x28] sm:$0xff]  ;;  %v3281_v62 = vld [vmem:[%s9302_s9 + $0x38] sm:$0xff] }
 0x2d3   : > { %v3082_v9 = vadd.f32 %v3081_v39, %v3080_v12  ;;  %v3102_v38 = vrot.slane %v3101_v15, 2  ;;  %v3278_v12 = vld [vmem:[%s9302_s9 + $0x20] sm:$0xff]  ;;  %v3280_v39 = vld [vmem:[%s9302_s9 + $0x30] sm:$0xff] }
 0x2d5   : > { %v3083_v32 = vrot.slane %v3082_v9, 1  ;;  %v3103_v43 = vadd.f32 %v3102_v38, %v3101_v15  ;;  %v3283_v15 = vld [vmem:[%s9302_s9 + $0x48] sm:$0xff]  ;;  %v3285_v38 = vld [vmem:[%s9302_s9 + $0x58] sm:$0xff] }
 0x2d7   : > { %v3084_v26 = vadd.f32 %v3083_v32, %v3082_v9  ;;  %v3104_v54 = vrot.slane %v3103_v43, 1  ;;  %v3282_v9 = vld [vmem:[%s9302_s9 + $0x40] sm:$0xff]  ;;  %v3284_v32 = vld [vmem:[%s9302_s9 + $0x50] sm:$0xff] }
 0x2d9   : > { %v3108_v40 = vadd.f32 %v3107_v45, %v3084_v26  ;;  %v3105_v36 = vadd.f32 %v3104_v54, %v3103_v43  ;;  %v3287_v43 = vld [vmem:[%s9302_s9 + $0x68] sm:$0xff]  ;;  %v3289_v26 = vld [vmem:[%s9302_s9 + $0x78] sm:$0xff]  ;;  %v3288_v54 = vld [vmem:[%s9302_s9 + $0x70] sm:$0xff] }
 0x2db   : > { %v6074_v29 = vmul.f32 -1.442695, %v3108_v40  ;;  %v3109_v46 = vadd.f32 %v3107_v45, %v3105_v36  ;;  %v3286_v45 = vld [vmem:[%s9302_s9 + $0x60] sm:$0xff] }
 0x2dd   : > { %6449 = vpow2.f32 %v6074_v29  ;;  %v6075_v60 = vmul.f32 -1.442695, %v3109_v46 }
 0x2df   : > { %6451 = vpow2.f32 %v6075_v60 }
 0x2ea   : > { %v6450_v14 = vpop.eup %6449 }
 0x2eb   : > { %v3116_v18 = vadd.f32 1.0, %v6450_v14 }
 0x2ec   : > { %v6452_v2 = vpop.eup %6451 }
 0x2ed   : > { %6453 = vrcp.f32 %v3116_v18  ;;  %v3117_v10 = vadd.f32 1.0, %v6452_v2 }
 0x2ef   : > { %6455 = vrcp.f32 %v3117_v10 }
 0x2fa   : > { %v6454_v41 = vpop.eup %6453 }
 0x2fb   : > { %v3268_v3 = vadd.f32 1.0, %v6454_v41 }
 0x2fc   : > { %v6456_v8 = vpop.eup %6455 }
 0x2fd   : > { %v8028_v23 = vmul.f32 %v6457_v34, %v3268_v3  ;;  %v8031_v58 = vmul.f32 %v6458_v30, %v3268_v3  ;;  %v3124_v61 = vcombine.low %v6454_v41, %v6456_v8  ;;  %v3269_v48 = vadd.f32 1.0, %v6456_v8 }
 0x2ff   : > { %v3131_v63 = vrot.slane %v3124_v61, %v3130_v35  ;;  %v8034_v44 = vmul.f32 %v6459_v7, %v3269_v48  ;;  %v8037_v24 = vmul.f32 %v6460_v4, %v3269_v48  ;;  %3347 = vrot.lane.b32.xlu0 %v8031_v58, %s6618_s18  ;;  %3345 = vrot.lane.b32.xlu1 %v8028_v23, %s6618_s18  ;;  %v6377_v61 = vld [vmem:[#allocation6 + $0x40] sm:$0xff]   ;;  %v9498_v7 = vmov 0  }
 0x300   : > { %v4226_v19 = vpack.c.bf16 %v8031_v58, %v8028_v23 }
 0x301   : > { %v3138_v20 = vrot.slane %v3131_v63, %v3130_v35  ;;  %v4227_v0 = vpack.c.bf16 %v8037_v24, %v8034_v44 }
 0x303   : > { %3144 = vst.msk [vmem:[%s549_s24] sm:$0x3] %vm3142_vm9, %v3138_v20  ;;  %3351 = vrot.lane.b32.xlu0 %v8037_v24, %s6618_s18  ;;  %3349 = vrot.lane.b32.xlu1 %v8034_v44, %s6618_s18  ;;  %s9490_s18 = smov 1   ;;  %s9054_s24 = scalar_lea.vmem %s9307_s14, %s6225_s25 }
 0x304   : > { %s9349_s25 = sshll.u32 %s6733_s5, 4 }
 0x307   : > { %3308 = vrot.lane.b32.xlu0 %v8031_v58, %s6619_s19  ;;  %3306 = vrot.lane.b32.xlu1 %v8028_v23, %s6619_s19 }
 0x30b   : > { %3736 = vrot.lane.b32.xlu0 %v8031_v58, %s9489_s16  ;;  %3734 = vrot.lane.b32.xlu1 %v8028_v23, %s9489_s16 }
 0x30f   : > { %3312 = vrot.lane.b32.xlu0 %v8037_v24, %s6619_s19  ;;  %3310 = vrot.lane.b32.xlu1 %v8034_v44, %s6619_s19  ;;  %s9492_s19 = smov 113  }
 0x313   : > { %3740 = vrot.lane.b32.xlu0 %v8037_v24, %s9489_s16  ;;  %3738 = vrot.lane.b32.xlu1 %v8034_v44, %s9489_s16  ;;  %s9168_s16 = sand.u32 1, %s6603_s21  }
 0x314   : > { %s527_s17 = scalar_lea.vmem [#allocation8], %s9168_s16 }
 0x315   : > { %s5747_s26 = sshll.u32 %s527_s17, 4  ;;  %s9201_s26 = int_to_ptr.vmem [resolvable:$true] %s5747_s26 }
 0x317   : > { %3984 = vrot.lane.b32.xlu0 %v8031_v58, %s9490_s18  ;;  %3982 = vrot.lane.b32.xlu1 %v8028_v23, %s9490_s18 }
 0x31b   : > { %3988 = vrot.lane.b32.xlu0 %v8037_v24, %s9490_s18  ;;  %3986 = vrot.lane.b32.xlu1 %v8034_v44, %s9490_s18  ;;  %s9199_s18 = scalar_lea.hbm %s9306_s13, %s9349_s25 }
 0x31f   : > { %4456 = vrot.lane.b32.xlu0 %v8031_v58, %s9491_s28  ;;  %4454 = vrot.lane.b32.xlu1 %v8028_v23, %s9491_s28 }
 0x323   : > { %4700 = vrot.lane.b32.xlu0 %v8031_v58, %s9492_s19  ;;  %4698 = vrot.lane.b32.xlu1 %v8028_v23, %s9492_s19 }
 0x327   : > { %4460 = vrot.lane.b32.xlu0 %v8037_v24, %s9491_s28  ;;  %4458 = vrot.lane.b32.xlu1 %v8034_v44, %s9491_s28 }
 0x32b   : > { %4704 = vrot.lane.b32.xlu0 %v8037_v24, %s9492_s19  ;;  %4702 = vrot.lane.b32.xlu1 %v8034_v44, %s9492_s19  ;;  %s5723_s19 = scalar_lea.sflag [#allocation5], %s9168_s16 }
 0x32f   : > { %4948 = vrot.lane.b32.xlu0 %v8031_v58, %s9493_s30  ;;  %4946 = vrot.lane.b32.xlu1 %v8028_v23, %s9493_s30 }
 0x333   : > { %5192 = vrot.lane.b32.xlu0 %v8031_v58, %s9494_s27  ;;  %5190 = vrot.lane.b32.xlu1 %v8028_v23, %s9494_s27 }
 0x337   : > { %4952 = vrot.lane.b32.xlu0 %v8037_v24, %s9493_s30  ;;  %4950 = vrot.lane.b32.xlu1 %v8034_v44, %s9493_s30  ;;  %s6513_s30 = scalar_lea.vmem %s9201_s26, 16 }
 0x338   : > { %p6514_p10 = scmp.ne.s32.totalorder %s9201_s26, %s6513_s30 }
 0x33a   : > { %p6515_p12 = pnand %p6514_p10, %p6750_p5 }
 0x33b   : > { %5196 = vrot.lane.b32.xlu0 %v8037_v24, %s9494_s27  ;;  %5194 = vrot.lane.b32.xlu1 %v8034_v44, %s9494_s27  ;;  %s6627_s27 = smov [#allocation8]  }
 0x33c   : > { %p6516_p8 = pneg %p6515_p12  ;;  %s6517_s25 = sshll.u32 %s6627_s27, 4  ;;  %s6518_s25 = int_to_ptr.vmem [resolvable:$false] %s6517_s25 }
 0x33d   : > { %s6519_s0 = scalar_lea.vmem %s6518_s25, 32  ;;  %p6520_p11 = scmp.lt.s32.totalorder %s9201_s26, %s6518_s25 }
 0x33e   : > { %p6521_p0 = scmp.lt.s32.totalorder %s6519_s0, %s6513_s30 }
 0x33f   : > { %5428 = vperm.xlu0 %6303, %v3275_v6   ;;  %5423 = vperm.xlu1 %6304, %v3274_v1  }
 0x340   : > { %p6522_p1 = por %p6521_p0, %p6520_p11 }
 0x342   : > { %p6523_p3 = pnand %p6522_p1, %p6516_p8 }
 0x343   : > { %5438 = vperm.xlu0 %6303, %v3277_v11   ;;  %5433 = vperm.xlu1 %6304, %v3276_v37   ;;  %v9500_v11 = vld [vmem:[#allocation24_spill] sm:$0xff] }
 0x347   : > { %5448 = vperm.xlu0 %6303, %v3279_v21   ;;  %5443 = vperm.xlu1 %6304, %v3278_v12  }
 0x34b   : > { %5458 = vperm.xlu0 %6303, %v3281_v62   ;;  %5453 = vperm.xlu1 %6304, %v3280_v39   ;;  %v6378_v62 = vld [vmem:[#allocation6 + $0x48] sm:$0xff]  }
 0x34f   : > { %5468 = vperm.xlu0 %6303, %v3283_v15   ;;  %5463 = vperm.xlu1 %6304, %v3282_v9  }
 0x353   : > { %5478 = vperm.xlu0 %6303, %v3285_v38   ;;  %5473 = vperm.xlu1 %6304, %v3284_v32  }
 0x357   : > { %5488 = vperm.xlu0 %6303, %v3287_v43   ;;  %5483 = vperm.xlu1 %6304, %v3286_v45  }
 0x35b   : > { %5498 = vperm.xlu0 %6303, %v3289_v26   ;;  %5493 = vperm.xlu1 %6304, %v3288_v54  }
 0x371   : > { %v3348_v40 = vpop.permute.xlu0 %3347  ;;  %v3346_v36 = vpop.permute.xlu1 %3345 }
 0x375   : > { %v3352_v29 = vpop.permute.xlu0 %3351  ;;  %v3350_v46 = vpop.permute.xlu1 %3349 }
 0x376   : > { %v3354_v14 = vsel %vm680_vm0, %v3348_v40, %v3352_v29  ;;  %v3356_v18 = vsel %vm680_vm0, %v3352_v29, %v3348_v40  ;;  %v3353_v2 = vsel %vm680_vm0, %v3346_v36, %v3350_v46  ;;  %v3355_v10 = vsel %vm680_vm0, %v3350_v46, %v3346_v36  ;;  %v9501_v36 = vld [vmem:[#allocation25_spill] sm:$0xff]  ;;  %v9502_v46 = vld [vmem:[#allocation26_spill] sm:$0xff] }
 0x377   : > { %v3359_v28 = vmul.f32 %v3356_v18, %v9496_v50  ;;  %v3360_v41 = vmul.f32 %v3354_v14, %v9497_v13  ;;  %v3357_v3 = vmul.f32 %v3355_v10, %v9496_v50  ;;  %v3358_v42 = vmul.f32 %v3353_v2, %v9497_v13 }
 0x379   : > { %v3361_v35 = vpack.c.bf16 %v3359_v28, %v3357_v3  ;;  %v3309_v8 = vpop.permute.xlu0 %3308  ;;  %v3307_v34 = vpop.permute.xlu1 %3306  ;;  %v3362_v30 = vpack.c.bf16 %v3360_v41, %v3358_v42 }
 0x37a   : > { %3149 = vadd.xlane.f32.xlu0 %v7853_v17 }
 0x37b   : > { %3441 = vmatprep.subr.bf16.mxu1 %v3362_v30 }
 0x37c   : > { %3442 = vmatpush1.bf16.msra.mxu1 %v3361_v35 }
 0x37d   : > { %v3737_v48 = vpop.permute.xlu0 %3736  ;;  %v3735_v63 = vpop.permute.xlu1 %3734 }
 0x37e   : > { %3152 = vadd.xlane.f32.xlu0 %v7873_v57 }
 0x37f   : > { %3146 = vadd.xlane.f32.xlu1 %v7837_v49  ;;  %6084 = vmatmul.mubr.msk.bf16.vlgmr.msra.gmra.mxu1 %vm731_vm2, %v6377_v61  ;;  %v9499_v49 = vld [vmem:[#allocation23_spill] sm:$0xff] }
 0x380   : > { %3469 = vmatprep.mubr.bf16.mxu1 %v9498_v7 }
 0x381   : > { %v3313_v4 = vpop.permute.xlu0 %3312  ;;  %v3311_v31 = vpop.permute.xlu1 %3310 }
 0x382   : > { %v3315_v20 = vsel %vm603_vm1, %v3309_v8, %v3313_v4  ;;  %v3317_v17 = vsel %vm603_vm1, %v3313_v4, %v3309_v8  ;;  %v3314_v6 = vsel %vm603_vm1, %v3307_v34, %v3311_v31  ;;  %v3316_v57 = vsel %vm603_vm1, %v3311_v31, %v3307_v34  ;;  %3155 = vadd.xlane.f32.xlu0 %v7894_v5  ;;  %v6379_v8 = vld [vmem:[#allocation6] sm:$0xff]  }
 0x383   : > { %v3320_v1 = vmul.f32 %v3317_v17, %v9499_v49  ;;  %v3321_v37 = vmul.f32 %v3315_v20, %v9500_v11  ;;  %v3318_v21 = vmul.f32 %v3316_v57, %v9499_v49  ;;  %v3319_v12 = vmul.f32 %v3314_v6, %v9500_v11 }
 0x385   : > { %v3324_v39 = vmul.f32 %v3320_v1, %v9496_v50  ;;  %v3325_v15 = vmul.f32 %v3321_v37, %v9497_v13  ;;  %v3322_v9 = vmul.f32 %v3318_v21, %v9496_v50  ;;  %v3323_v38 = vmul.f32 %v3319_v12, %v9497_v13  ;;  %v3741_v32 = vpop.permute.xlu0 %3740  ;;  %v3739_v43 = vpop.permute.xlu1 %3738  ;;  %v6381_v12 = vld [vmem:[#allocation6 + $0x8] sm:$0xff]  }
 0x386   : > { %v3743_v5 = vsel %vm1071_vm3, %v3737_v48, %v3741_v32  ;;  %v3745_v45 = vsel %vm1071_vm3, %v3741_v32, %v3737_v48  ;;  %v3742_v26 = vsel %vm1071_vm3, %v3735_v63, %v3739_v43  ;;  %v3744_v54 = vsel %vm1071_vm3, %v3739_v43, %v3735_v63  ;;  %3158 = vadd.xlane.f32.xlu0 %v7911_v22  ;;  %v6380_v63 = vld [vmem:[#allocation6 + $0x50] sm:$0xff]   ;;  %v6384_v43 = vld [vmem:[#allocation6 + $0x60] sm:$0xff]  }
 0x387   : > { %v3326_v40 = vpack.c.bf16 %v3324_v39, %v3322_v9  ;;  %v3748_v29 = vmul.f32 %v3745_v45, %v9501_v36  ;;  %v3749_v14 = vmul.f32 %v3743_v5, %v9502_v46  ;;  %v3746_v18 = vmul.f32 %v3744_v54, %v9501_v36  ;;  %6085 = vmatmul.mubr.msk.bf16.gmra.mxu1 %vm731_vm2, %v6378_v62  ;;  %v6382_v39 = vld [vmem:[#allocation6 + $0x58] sm:$0xff]  }
 0x388   : > { %v3747_v2 = vmul.f32 %v3742_v26, %v9502_v46  ;;  %v3327_v10 = vpack.c.bf16 %v3325_v15, %v3323_v38  ;;  %3479 = vmatprep.mubr.bf16.mxu1 %v9498_v7  ;;  %v6383_v15 = vld [vmem:[#allocation6 + $0x10] sm:$0xff]  }
 0x389   : > { %v3752_v28 = vmul.f32 %v3748_v29, %v9496_v50  ;;  %v3753_v41 = vmul.f32 %v3749_v14, %v9497_v13  ;;  %v3750_v22 = vmul.f32 %v3746_v18, %v9496_v50  ;;  %v3985_v3 = vpop.permute.xlu0 %3984  ;;  %v3983_v42 = vpop.permute.xlu1 %3982  ;;  %v9503_v29 = vld [vmem:[#allocation28_spill] sm:$0xff] }
 0x38a   : > { %v3751_v35 = vmul.f32 %v3747_v2, %v9497_v13  ;;  %3618 = vmatprep.subr.bf16.mxu0 %v3327_v10  ;;  %3161 = vadd.xlane.f32.xlu0 %v7930_v52 }
 0x38b   : > { %3619 = vmatpush1.bf16.msra.mxu0 %v3326_v40  ;;  %v3754_v34 = vpack.c.bf16 %v3752_v28, %v3750_v22  ;;  %v6385_v28 = vld [vmem:[#allocation6 + $0x18] sm:$0xff]  }
 0x38c   : > { %v3755_v30 = vpack.c.bf16 %v3753_v41, %v3751_v35 }
 0x38d   : > { %v3989_v61 = vpop.permute.xlu0 %3988  ;;  %v3987_v48 = vpop.permute.xlu1 %3986 }
 0x38e   : > { %v3991_v4 = vsel %vm1338_vm4, %v3985_v3, %v3989_v61  ;;  %v3993_v50 = vsel %vm1338_vm4, %v3989_v61, %v3985_v3  ;;  %6100 = vmatmul.mubr.msk.bf16.vlgmr.msra.gmra.mxu0 %vm731_vm2, %v6379_v8  ;;  %3834 = vmatprep.subr.bf16.mxu1 %v3755_v30  ;;  %v3990_v13 = vsel %vm1338_vm4, %v3983_v42, %v3987_v48  ;;  %v6386_v3 = vld [vmem:[#allocation6 + $0x68] sm:$0xff]   ;;  %v6387_v30 = vld [vmem:[#allocation6 + $0x20] sm:$0xff]  }
 0x38f   : > { %v3996_v52 = vmul.f32 %v3993_v50, %v9499_v49  ;;  %v3997_v31 = vmul.f32 %v3991_v4, %v9500_v11  ;;  %v3992_v20 = vsel %vm1338_vm4, %v3987_v48, %v3983_v42  ;;  %v3995_v17 = vmul.f32 %v3990_v13, %v9500_v11  ;;  %3164 = vadd.xlane.f32.xlu0 %v7947_v55  ;;  %v6388_v13 = vld [vmem:[#allocation6 + $0x70] sm:$0xff]  }
 0x390   : > { %v3994_v6 = vmul.f32 %v3992_v20, %v9499_v49  ;;  %3835 = vmatpush1.bf16.msra.mxu1 %v3754_v34  ;;  %3646 = vmatprep.mubr.bf16.mxu0 %v9498_v7 }
 0x391   : > { %6086 = vmatmul.mubr.msk.bf16.gmra.mxu1 %vm731_vm2, %v6380_v63  ;;  %4306 = vmatprep.subr.bf16.mxu1 %v4227_v0  ;;  %v8232_v57 = vpop.permute.xlu0 %4456  ;;  %v8234_v1 = vpop.permute.xlu1 %4454  ;;  %v3999_v37 = vpack.c.bf16 %v3997_v31, %v3995_v17 }
 0x392   : > { %v3998_v21 = vpack.c.bf16 %v3996_v52, %v3994_v6  ;;  %3489 = vmatprep.mubr.bf16.mxu1 %v9498_v7 }
 0x393   : > { %3167 = vadd.xlane.f32.xlu0 %v7962_v27  ;;  %4078 = vmatprep.subr.bf16.mxu0 %v3999_v37 }
 0x394   : > { %4079 = vmatpush1.bf16.msra.mxu0 %v3998_v21  ;;  %v6389_v21 = vld [vmem:[#allocation6 + $0x28] sm:$0xff]  }
 0x395   : > { %v8238_v55 = vpop.permute.xlu0 %4700  ;;  %v8240_v62 = vpop.permute.xlu1 %4698 }
 0x396   : > { %6101 = vmatmul.mubr.msk.bf16.gmra.mxu0 %vm731_vm2, %v6381_v12 }
 0x397   : > { %3170 = vadd.xlane.f32.xlu0 %v7977_v59  ;;  %3656 = vmatprep.mubr.bf16.mxu0 %v9498_v7 }
 0x399   : > { %6087 = vmatmul.mubr.msk.bf16.gmra.mxu1 %vm731_vm2, %v6382_v39  ;;  %v8246_v44 = vpop.permute.xlu0 %4460  ;;  %v8248_v24 = vpop.permute.xlu1 %4458  ;;  %v6390_v39 = vld [vmem:[#allocation6 + $0x78] sm:$0xff]  }
 0x39a   : > { %v4465_v27 = vsel %vm1811_vm5, %v8246_v44, %v8232_v57  ;;  %v4464_v0 = vsel %vm1811_vm5, %v8248_v24, %v8234_v1  ;;  %3499 = vmatprep.mubr.bf16.mxu1 %v9498_v7 }
 0x39b   : > { %v4469_v59 = vmul.f32 %v4465_v27, %v9502_v46  ;;  %v4467_v9 = vmul.f32 %v4464_v0, %v9502_v46 }
 0x39d   : > { %v4705_v38 = vpop.permute.xlu0 %4704  ;;  %v4703_v32 = vpop.permute.xlu1 %4702  ;;  %v4471_v5 = vpack.c.bf16 %v4469_v59, %v4467_v9  ;;  %v6391_v9 = vld [vmem:[#allocation6 + $0x30] sm:$0xff]  }
 0x39e   : > { %v4707_v45 = vsel %vm2056_vm6, %v8238_v55, %v4705_v38  ;;  %6102 = vmatmul.mubr.msk.bf16.gmra.mxu0 %vm731_vm2, %v6383_v15  ;;  %v4706_v26 = vsel %vm2056_vm6, %v8240_v62, %v4703_v32  ;;  %v4709_v27 = vsel %vm2056_vm6, %v4705_v38, %v8238_v55  ;;  %v4708_v0 = vsel %vm2056_vm6, %v4703_v32, %v8240_v62  ;;  %v6392_v38 = vld [vmem:[#allocation6 + $0x80] sm:$0xff]   ;;  %v6394_v32 = vld [vmem:[#allocation6 + $0x88] sm:$0xff]  }
 0x39f   : > { %v4712_v54 = vmul.f32 %v4707_v45, %v9499_v49  ;;  %v4710_v40 = vmul.f32 %v4706_v26, %v9499_v49  ;;  %4550 = vmatprep.subr.bf16.mxu0 %v4471_v5  ;;  %3666 = vmatprep.mubr.bf16.mxu0 %v9498_v7  ;;  %v4713_v15 = vmul.f32 %v4709_v27, %v9500_v11  ;;  %v6416_v27 = vld [vmem:[#allocation6 + $0x120] sm:$0xff]  }
 0x3a0   : > { %v4711_v59 = vmul.f32 %v4708_v0, %v9500_v11  ;;  %v6393_v11 = vld [vmem:[#allocation6 + $0x38] sm:$0xff]   ;;  %v4463_v45 = vsel %vm1811_vm5, %v8232_v57, %v8246_v44  ;;  %v4462_v26 = vsel %vm1811_vm5, %v8234_v1, %v8248_v24  ;;  %v6395_v44 = vld [vmem:[#allocation6 + $0xc0] sm:$0xff]   ;;  %v6420_v0 = vld [vmem:[#allocation6 + $0x130] sm:$0xff]  }
 0x3a1   : > { %v8272_v14 = vmul.f32 %v4712_v54, %v9503_v29  ;;  %v8275_v18 = vmul.f32 %v4710_v40, %v9503_v29  ;;  %6088 = vmatmul.mubr.msk.bf16.gmra.mxu1 %vm731_vm2, %v6384_v43  ;;  %v4949_v2 = vpop.permute.xlu0 %4948  ;;  %v4947_v10 = vpop.permute.xlu1 %4946  ;;  %v9504_v43 = vld [vmem:[#allocation27_spill] sm:$0xff]  ;;  %v4466_v54 = vmul.f32 %v4462_v26, %v9501_v36  ;;  %v6396_v40 = vld [vmem:[#allocation6 + $0x90] sm:$0xff]  }
 0x3a2   : > { %3509 = vmatprep.mubr.bf16.mxu1 %v9498_v7  ;;  %v4717_v5 = vmul.f32 %v4713_v15, %v9504_v43  ;;  %v4715_v55 = vmul.f32 %v4711_v59, %v9504_v43  ;;  %v6421_v15 = vld [vmem:[#allocation6 + $0x168] sm:$0xff]   ;;  %v6422_v59 = vld [vmem:[#allocation6 + $0x138] sm:$0xff]  }
 0x3a3   : > { %v4718_v41 = vpack.c.bf16 %v8272_v14, %v8275_v18  ;;  %v6413_v14 = vld [vmem:[#allocation6 + $0x148] sm:$0xff]   ;;  %v6414_v18 = vld [vmem:[#allocation6 + $0x118] sm:$0xff]  }
 0x3a4   : > { %v4719_v62 = vpack.c.bf16 %v4717_v5, %v4715_v55 }
 0x3a5   : > { %v8281_v49 = vpop.permute.xlu0 %5192  ;;  %v8283_v22 = vpop.permute.xlu1 %5190 }
 0x3a6   : > { %6103 = vmatmul.mubr.msk.bf16.gmra.mxu0 %vm731_vm2, %v6385_v28  ;;  %v6400_v28 = vld [vmem:[#allocation6 + $0xa0] sm:$0xff]  }
 0x3a7   : > { %3676 = vmatprep.mubr.bf16.mxu0 %v9498_v7 }
 0x3a9   : > { %6089 = vmatmul.mubr.msk.bf16.gmra.mxu1 %vm731_vm2, %v6386_v3  ;;  %v4953_v42 = vpop.permute.xlu0 %4952  ;;  %v4951_v35 = vpop.permute.xlu1 %4950  ;;  %v6401_v3 = vld [vmem:[#allocation6 + $0xd8] sm:$0xff]  }
 0x3aa   : > { %v4955_v8 = vsel %vm2323_vm7, %v4949_v2, %v4953_v42  ;;  %v4954_v34 = vsel %vm2323_vm7, %v4947_v10, %v4951_v35  ;;  %3519 = vmatprep.mubr.bf16.mxu1 %v9498_v7  ;;  %v4957_v23 = vsel %vm2323_vm7, %v4953_v42, %v4949_v2  ;;  %v4956_v58 = vsel %vm2323_vm7, %v4951_v35, %v4947_v10  ;;  %v6398_v2 = vld [vmem:[#allocation6 + $0x98] sm:$0xff]   ;;  %v6399_v10 = vld [vmem:[#allocation6 + $0xd0] sm:$0xff]   ;;  %v6402_v42 = vld [vmem:[#allocation6 + $0xa8] sm:$0xff]  }
 0x3ab   : > { %v8294_v61 = vmul.f32 %v4955_v8, %v9503_v29  ;;  %v8297_v48 = vmul.f32 %v4954_v34, %v9503_v29  ;;  %v4961_v57 = vmul.f32 %v4957_v23, %v9504_v43  ;;  %v4959_v1 = vmul.f32 %v4956_v58, %v9504_v43  ;;  %v6403_v35 = vld [vmem:[#allocation6 + $0xe0] sm:$0xff]   ;;  %v6404_v8 = vld [vmem:[#allocation6 + $0xb0] sm:$0xff]   ;;  %v6405_v34 = vld [vmem:[#allocation6 + $0xe8] sm:$0xff]  }
 0x3ac   : > { %v6427_v23 = vld [vmem:[#allocation6 + $0x1c0] sm:$0xff]  }
 0x3ad   : > { %v4962_v63 = vpack.c.bf16 %v8294_v61, %v8297_v48  ;;  %v8301_v4 = vpop.permute.xlu0 %5196  ;;  %v8303_v50 = vpop.permute.xlu1 %5194  ;;  %v6417_v61 = vld [vmem:[#allocation6 + $0x158] sm:$0xff]   ;;  %v6418_v48 = vld [vmem:[#allocation6 + $0x128] sm:$0xff]  }
 0x3ae   : > { %v5199_v52 = vsel %vm2568_vm8, %v8281_v49, %v8301_v4  ;;  %6104 = vmatmul.mubr.msk.bf16.gmra.mxu0 %vm731_vm2, %v6387_v30  ;;  %v5198_v31 = vsel %vm2568_vm8, %v8283_v22, %v8303_v50  ;;  %v6406_v30 = vld [vmem:[#allocation6 + $0xb8] sm:$0xff]  }
 0x3af   : > { %v5204_v20 = vmul.f32 %v5199_v52, %v9501_v36  ;;  %v5202_v17 = vmul.f32 %v5198_v31, %v9501_v36  ;;  %3686 = vmatprep.mubr.bf16.mxu0 %v9498_v7  ;;  %v5200_v52 = vsel %vm2568_vm8, %v8303_v50, %v8283_v22  ;;  %v6410_v22 = vld [vmem:[#allocation6 + $0x108] sm:$0xff]   ;;  %v6411_v50 = vld [vmem:[#allocation6 + $0x140] sm:$0xff]  }
 0x3b1   : > { %v8318_v6 = vmul.f32 %v5204_v20, %v9503_v29  ;;  %v8321_v37 = vmul.f32 %v5202_v17, %v9503_v29  ;;  %6090 = vmatmul.mubr.msk.bf16.gmra.mxu1 %vm731_vm2, %v6388_v13  ;;  %v4963_v29 = vpack.c.bf16 %v4961_v57, %v4959_v1  ;;  %v5201_v13 = vsel %vm2568_vm8, %v8301_v4, %v8281_v49  ;;  %v6407_v17 = vld [vmem:[#allocation6 + $0xf0] sm:$0xff]  }
 0x3b2   : > { %3529 = vmatprep.mubr.bf16.mxu1 %v9498_v7  ;;  %v5205_v31 = vmul.f32 %v5201_v13, %v9502_v46  ;;  %v5203_v20 = vmul.f32 %v5200_v52, %v9502_v46  ;;  %v6409_v46 = vld [vmem:[#allocation6 + $0xf8] sm:$0xff]   ;;  %v6431_v52 = vld [vmem:[#allocation6 + $0x1d0] sm:$0xff]  }
 0x3b3   : > { %v5210_v12 = vpack.c.bf16 %v8318_v6, %v8321_v37  ;;  %v6428_v37 = vld [vmem:[#allocation6 + $0x190] sm:$0xff]  }
 0x3b4   : > { %v5209_v49 = vmul.f32 %v5205_v31, %v9504_v43  ;;  %v5207_v4 = vmul.f32 %v5203_v20, %v9504_v43  ;;  %v6424_v43 = vld [vmem:[#allocation6 + $0x180] sm:$0xff]  }
 0x3b6   : > { %6105 = vmatmul.mubr.msk.bf16.gmra.mxu0 %vm731_vm2, %v6389_v21  ;;  %v6408_v21 = vld [vmem:[#allocation6 + $0x100] sm:$0xff]   ;;  %v5211_v60 = vpack.c.bf16 %v5209_v49, %v5207_v4 }
 0x3b7   : > { %3696 = vmatprep.mubr.bf16.mxu0 %v9498_v7 }
 0x3b9   : > { %6091 = vmatmul.mubr.msk.bf16.gmra.mxu1 %vm731_vm2, %v6390_v39  ;;  %v6412_v39 = vld [vmem:[#allocation6 + $0x110] sm:$0xff]  }
 0x3ba   : > { %3852 = vmatprep.mubr.bf16.mxu1 %v9498_v7 }
 0x3be   : > { %6106 = vmatmul.mubr.msk.bf16.gmra.mxu0 %vm731_vm2, %v6391_v9  ;;  %v6423_v9 = vld [vmem:[#allocation6 + $0x170] sm:$0xff]  }
 0x3bf   : > { %3706 = vmatprep.mubr.bf16.mxu0 %v9498_v7 }
 0x3c1   : > { %6116 = vmatmul.mubr.msk.bf16.vlgmr.msra.gmra.mxu1 %vm731_vm2, %v6392_v38  ;;  %v6425_v38 = vld [vmem:[#allocation6 + $0x178] sm:$0xff]  }
 0x3c2   : > { %4307 = vmatpush1.bf16.msra.mxu1 %v4226_v19  ;;  %3862 = vmatprep.mubr.bf16.mxu1 %v9498_v7  ;;  %v4468_v19 = vmul.f32 %v4463_v45, %v9501_v36  ;;  %v6397_v36 = vld [vmem:[#allocation6 + $0xc8] sm:$0xff]  }
 0x3c3   : > { %4798 = vmatprep.subr.bf16.mxu1 %v4719_v62 }
 0x3c4   : > { %v4470_v24 = vpack.c.bf16 %v4468_v19, %v4466_v54 }
 0x3c6   : > { %6107 = vmatmul.mubr.msk.bf16.gmra.mxu0 %vm731_vm2, %v6393_v11 }
 0x3c7   : > { %4096 = vmatprep.mubr.bf16.mxu0 %v9498_v7 }
 0x3c9   : > { %6117 = vmatmul.mubr.msk.bf16.gmra.mxu1 %vm731_vm2, %v6394_v32  ;;  %v6426_v32 = vld [vmem:[#allocation6 + $0x188] sm:$0xff]  }
 0x3ca   : > { %3872 = vmatprep.mubr.bf16.mxu1 %v9498_v7 }
 0x3ce   : > { %6132 = vmatmul.mubr.msk.bf16.vlgmr.msra.gmra.mxu0 %vm731_vm2, %v6395_v44 }
 0x3cf   : > { %4551 = vmatpush1.bf16.msra.mxu0 %v4470_v24  ;;  %4106 = vmatprep.mubr.bf16.mxu0 %v9498_v7  ;;  %v6429_v24 = vld [vmem:[#allocation6 + $0x1c8] sm:$0xff]  }
 0x3d0   : > { %5042 = vmatprep.subr.bf16.mxu0 %v4963_v29 }
 0x3d1   : > { %6118 = vmatmul.mubr.msk.bf16.gmra.mxu1 %vm731_vm2, %v6396_v40 }
 0x3d2   : > { %3882 = vmatprep.mubr.bf16.mxu1 %v9498_v7 }
 0x3d6   : > { %6133 = vmatmul.mubr.msk.bf16.gmra.mxu0 %vm731_vm2, %v6397_v36 }
 0x3d7   : > { %4116 = vmatprep.mubr.bf16.mxu0 %v9498_v7 }
 0x3d9   : > { %6119 = vmatmul.mubr.msk.bf16.gmra.mxu1 %vm731_vm2, %v6398_v2 }
 0x3da   : > { %3892 = vmatprep.mubr.bf16.mxu1 %v9498_v7 }
 0x3de   : > { %6134 = vmatmul.mubr.msk.bf16.gmra.mxu0 %vm731_vm2, %v6399_v10 }
 0x3df   : > { %4126 = vmatprep.mubr.bf16.mxu0 %v9498_v7 }
 0x3e1   : > { %6120 = vmatmul.mubr.msk.bf16.gmra.mxu1 %vm731_vm2, %v6400_v28  ;;  %v6430_v28 = vld [vmem:[#allocation6 + $0x198] sm:$0xff]  }
 0x3e2   : > { %3902 = vmatprep.mubr.bf16.mxu1 %v9498_v7 }
 0x3e6   : > { %6135 = vmatmul.mubr.msk.bf16.gmra.mxu0 %vm731_vm2, %v6401_v3 }
 0x3e7   : > { %4136 = vmatprep.mubr.bf16.mxu0 %v9498_v7 }
 0x3e9   : > { %6121 = vmatmul.mubr.msk.bf16.gmra.mxu1 %vm731_vm2, %v6402_v42 }
 0x3ea   : > { %3912 = vmatprep.mubr.bf16.mxu1 %v9498_v7 }
 0x3ee   : > { %6136 = vmatmul.mubr.msk.bf16.gmra.mxu0 %vm731_vm2, %v6403_v35 }
 0x3ef   : > { %4146 = vmatprep.mubr.bf16.mxu0 %v9498_v7 }
 0x3f1   : > { %6122 = vmatmul.mubr.msk.bf16.gmra.mxu1 %vm731_vm2, %v6404_v8 }
 0x3f2   : > { %3922 = vmatprep.mubr.bf16.mxu1 %v9498_v7 }
 0x3f6   : > { %6137 = vmatmul.mubr.msk.bf16.gmra.mxu0 %vm731_vm2, %v6405_v34 }
 0x3f7   : > { %4156 = vmatprep.mubr.bf16.mxu0 %v9498_v7 }
 0x3f9   : > { %6123 = vmatmul.mubr.msk.bf16.gmra.mxu1 %vm731_vm2, %v6406_v30 }
 0x3fa   : > { %4324 = vmatprep.mubr.bf16.mxu1 %v9498_v7 }
 0x3fe   : > { %6138 = vmatmul.mubr.msk.bf16.gmra.mxu0 %vm731_vm2, %v6407_v17 }
 0x3ff   : > { %4166 = vmatprep.mubr.bf16.mxu0 %v9498_v7 }
 0x401   : > { %6148 = vmatmul.mubr.msk.bf16.vlgmr.msra.gmra.mxu1 %vm731_vm2, %v6408_v21  ;;  %v6432_v21 = vld [vmem:[#allocation6 + $0x1a0] sm:$0xff]  }
 0x402   : > { %4799 = vmatpush1.bf16.msra.mxu1 %v4718_v41  ;;  %4334 = vmatprep.mubr.bf16.mxu1 %v9498_v7  ;;  %v6415_v41 = vld [vmem:[#allocation6 + $0x150] sm:$0xff]  }
 0x403   : > { %5290 = vmatprep.subr.bf16.mxu1 %v5211_v60 }
 0x406   : > { %6139 = vmatmul.mubr.msk.bf16.gmra.mxu0 %vm731_vm2, %v6409_v46 }
 0x407   : > { %4568 = vmatprep.mubr.bf16.mxu0 %v9498_v7 }
 0x409   : > { %6149 = vmatmul.mubr.msk.bf16.gmra.mxu1 %vm731_vm2, %v6410_v22 }
 0x40a   : > { %4344 = vmatprep.mubr.bf16.mxu1 %v9498_v7 }
 0x40e   : > { %6164 = vmatmul.mubr.msk.bf16.vlgmr.msra.gmra.mxu0 %vm731_vm2, %v6411_v50 }
 0x40f   : > { %5043 = vmatpush1.bf16.msra.mxu0 %v4962_v63  ;;  %4578 = vmatprep.mubr.bf16.mxu0 %v9498_v7  ;;  %v6419_v63 = vld [vmem:[#allocation6 + $0x160] sm:$0xff]  }
 0x411   : > { %6150 = vmatmul.mubr.msk.bf16.gmra.mxu1 %vm731_vm2, %v6412_v39 }
 0x412   : > { %4354 = vmatprep.mubr.bf16.mxu1 %v9498_v7 }
 0x416   : > { %6165 = vmatmul.mubr.msk.bf16.gmra.mxu0 %vm731_vm2, %v6413_v14 }
 0x417   : > { %4588 = vmatprep.mubr.bf16.mxu0 %v9498_v7 }
 0x419   : > { %6151 = vmatmul.mubr.msk.bf16.gmra.mxu1 %vm731_vm2, %v6414_v18 }
 0x41a   : > { %4364 = vmatprep.mubr.bf16.mxu1 %v9498_v7 }
 0x41e   : > { %6166 = vmatmul.mubr.msk.bf16.gmra.mxu0 %vm731_vm2, %v6415_v41  ;;  %v6433_v41 = vld [vmem:[#allocation6 + $0x1d8] sm:$0xff]  }
 0x41f   : > { %4598 = vmatprep.mubr.bf16.mxu0 %v9498_v7 }
 0x421   : > { %6152 = vmatmul.mubr.msk.bf16.gmra.mxu1 %vm731_vm2, %v6416_v27 }
 0x422   : > { %4374 = vmatprep.mubr.bf16.mxu1 %v9498_v7 }
 0x426   : > { %6167 = vmatmul.mubr.msk.bf16.gmra.mxu0 %vm731_vm2, %v6417_v61 }
 0x427   : > { %4608 = vmatprep.mubr.bf16.mxu0 %v9498_v7 }
 0x429   : > { %6153 = vmatmul.mubr.msk.bf16.gmra.mxu1 %vm731_vm2, %v6418_v48 }
 0x42a   : > { %4384 = vmatprep.mubr.bf16.mxu1 %v9498_v7 }
 0x42e   : > { %6168 = vmatmul.mubr.msk.bf16.gmra.mxu0 %vm731_vm2, %v6419_v63 }
 0x42f   : > { %4618 = vmatprep.mubr.bf16.mxu0 %v9498_v7 }
 0x431   : > { %6154 = vmatmul.mubr.msk.bf16.gmra.mxu1 %vm731_vm2, %v6420_v0 }
 0x432   : > { %4394 = vmatprep.mubr.bf16.mxu1 %v9498_v7 }
 0x436   : > { %6169 = vmatmul.mubr.msk.bf16.gmra.mxu0 %vm731_vm2, %v6421_v15  ;;  %v6434_v15 = vld [vmem:[#allocation6 + $0x1a8] sm:$0xff]  }
 0x437   : > { %4628 = vmatprep.mubr.bf16.mxu0 %v9498_v7 }
 0x439   : > { %6155 = vmatmul.mubr.msk.bf16.gmra.mxu1 %vm731_vm2, %v6422_v59 }
 0x43a   : > { %4816 = vmatprep.mubr.bf16.mxu1 %v9498_v7 }
 0x43e   : > { %6170 = vmatmul.mubr.msk.bf16.gmra.mxu0 %vm731_vm2, %v6423_v9 }
 0x43f   : > { %v3461_v5 = vpop.f32.mrf.mxu1  ;;  %4638 = vmatprep.mubr.bf16.mxu0 %v9498_v7 }
 0x441   : > { %6180 = vmatmul.mubr.msk.bf16.vlgmr.msra.gmra.mxu1 %vm731_vm2, %v6424_v43  ;;  %v3463_v55 = vpop.f32.mrf.mxu1 }
 0x442   : > { %5291 = vmatpush1.bf16.msra.mxu1 %v5210_v12  ;;  %4826 = vmatprep.mubr.bf16.mxu1 %v9498_v7 }
 0x443   : > { %v3465_v62 = vpop.f32.mrf.mxu1 }
 0x445   : > { %v3467_v11 = vpop.f32.mrf.mxu1 }
 0x446   : > { %6171 = vmatmul.mubr.msk.bf16.gmra.mxu0 %vm731_vm2, %v6425_v38 }
 0x447   : > { %v3471_v45 = vpop.f32.mrf.mxu1  ;;  %5060 = vmatprep.mubr.bf16.mxu0 %v9498_v7 }
 0x449   : > { %6181 = vmatmul.mubr.msk.bf16.gmra.mxu1 %vm731_vm2, %v6426_v32  ;;  %v3473_v26 = vpop.f32.mrf.mxu1 }
 0x44a   : > { %4836 = vmatprep.mubr.bf16.mxu1 %v9498_v7 }
 0x44b   : > { %v3475_v58 = vpop.f32.mrf.mxu1 }
 0x44d   : > { %v3477_v6 = vpop.f32.mrf.mxu1 }
 0x44e   : > { %v3638_v12 = vpop.f32.mrf.mxu0  ;;  %6196 = vmatmul.mubr.msk.bf16.vlgmr.msra.gmra.mxu0 %vm731_vm2, %v6427_v23 }
 0x44f   : > { %v8454_v19 = vadd.f32 %v3638_v12, %v3461_v5  ;;  %5070 = vmatprep.mubr.bf16.mxu0 %v9498_v7 }
 0x450   : > { %v3640_v54 = vpop.f32.mrf.mxu0 }
 0x451   : > { %v3481_v57 = vpop.f32.mrf.mxu1  ;;  %v8457_v1 = vadd.f32 %v3640_v54, %v3463_v55  ;;  %6182 = vmatmul.mubr.msk.bf16.gmra.mxu1 %vm731_vm2, %v6428_v37 }
 0x452   : > { %v3642_v44 = vpop.f32.mrf.mxu0  ;;  %4846 = vmatprep.mubr.bf16.mxu1 %v9498_v7 }
 0x453   : > { %v3483_v40 = vpop.f32.mrf.mxu1  ;;  %v8461_v29 = vadd.f32 %v3642_v44, %v3465_v62 }
 0x454   : > { %v3644_v36 = vpop.f32.mrf.mxu0 }
 0x455   : > { %v3485_v2 = vpop.f32.mrf.mxu1  ;;  %v8463_v10 = vadd.f32 %v3644_v36, %v3467_v11  ;;  %v6435_v11 = vld [vmem:[#allocation6 + $0x1e0] sm:$0xff]   ;;  %v6437_v36 = vld [vmem:[#allocation6 + $0x1e8] sm:$0xff]  }
 0x456   : > { %v3648_v3 = vpop.f32.mrf.mxu0  ;;  %6197 = vmatmul.mubr.msk.bf16.gmra.mxu0 %vm731_vm2, %v6429_v24 }
 0x457   : > { %v3487_v42 = vpop.f32.mrf.mxu1  ;;  %v8466_v35 = vadd.f32 %v3648_v3, %v3471_v45  ;;  %5080 = vmatprep.mubr.bf16.mxu0 %v9498_v7 }
 0x458   : > { %v3650_v8 = vpop.f32.mrf.mxu0 }
 0x459   : > { %v3491_v34 = vpop.f32.mrf.mxu1  ;;  %v8469_v30 = vadd.f32 %v3650_v8, %v3473_v26  ;;  %6183 = vmatmul.mubr.msk.bf16.gmra.mxu1 %vm731_vm2, %v6430_v28 }
 0x45a   : > { %v3652_v13 = vpop.f32.mrf.mxu0  ;;  %4856 = vmatprep.mubr.bf16.mxu1 %v9498_v7 }
 0x45b   : > { %v3493_v31 = vpop.f32.mrf.mxu1  ;;  %v8473_v20 = vadd.f32 %v3652_v13, %v3475_v58 }
 0x45c   : > { %v3654_v17 = vpop.f32.mrf.mxu0 }
 0x45d   : > { %v3495_v49 = vpop.f32.mrf.mxu1  ;;  %v8475_v4 = vadd.f32 %v3654_v17, %v3477_v6  ;;  %v6436_v6 = vld [vmem:[#allocation6 + $0x1b0] sm:$0xff]  }
 0x45e   : > { %v3658_v60 = vpop.f32.mrf.mxu0  ;;  %6198 = vmatmul.mubr.msk.bf16.gmra.mxu0 %vm731_vm2, %v6431_v52 }
 0x45f   : > { %v3497_v46 = vpop.f32.mrf.mxu1  ;;  %v8478_v22 = vadd.f32 %v3658_v60, %v3481_v57  ;;  %5090 = vmatprep.mubr.bf16.mxu0 %v9498_v7 }
 0x460   : > { %v3660_v50 = vpop.f32.mrf.mxu0 }
 0x461   : > { %v3501_v39 = vpop.f32.mrf.mxu1  ;;  %v8481_v14 = vadd.f32 %v3660_v50, %v3483_v40  ;;  %6184 = vmatmul.mubr.msk.bf16.gmra.mxu1 %vm731_vm2, %v6432_v21 }
 0x462   : > { %v3662_v18 = vpop.f32.mrf.mxu0  ;;  %4866 = vmatprep.mubr.bf16.mxu1 %v9498_v7 }
 0x463   : > { %v3503_v27 = vpop.f32.mrf.mxu1  ;;  %v8485_v61 = vadd.f32 %v3662_v18, %v3485_v2 }
 0x464   : > { %v3664_v48 = vpop.f32.mrf.mxu0 }
 0x465   : > { %v3505_v63 = vpop.f32.mrf.mxu1  ;;  %v8487_v0 = vadd.f32 %v3664_v48, %v3487_v42  ;;  %v6440_v48 = vld [vmem:[#allocation6 + $0x200] sm:$0xff]  }
 0x466   : > { %v3668_v59 = vpop.f32.mrf.mxu0  ;;  %6199 = vmatmul.mubr.msk.bf16.gmra.mxu0 %vm731_vm2, %v6433_v41 }
 0x467   : > { %v3507_v9 = vpop.f32.mrf.mxu1  ;;  %v8490_v43 = vadd.f32 %v3668_v59, %v3491_v34  ;;  %5100 = vmatprep.mubr.bf16.mxu0 %v9498_v7  ;;  %v6438_v34 = vld [vmem:[#allocation6 + $0x1b8] sm:$0xff]  }
 0x468   : > { %v3670_v5 = vpop.f32.mrf.mxu0 }
 0x469   : > { %v3511_v55 = vpop.f32.mrf.mxu1  ;;  %v8493_v38 = vadd.f32 %v3670_v5, %v3493_v31  ;;  %6185 = vmatmul.mubr.msk.bf16.gmra.mxu1 %vm731_vm2, %v6434_v15 }
 0x46a   : > { %v3672_v62 = vpop.f32.mrf.mxu0  ;;  %4876 = vmatprep.mubr.bf16.mxu1 %v9498_v7 }
 0x46b   : > { %v3513_v32 = vpop.f32.mrf.mxu1  ;;  %v8497_v45 = vadd.f32 %v3672_v62, %v3495_v49 }
 0x46c   : > { %v3674_v26 = vpop.f32.mrf.mxu0 }
 0x46d   : > { %v3515_v23 = vpop.f32.mrf.mxu1  ;;  %v8499_v58 = vadd.f32 %v3674_v26, %v3497_v46  ;;  %v6439_v46 = vld [vmem:[#allocation6 + $0x1f0] sm:$0xff]  }
 0x46e   : > { %v3678_v37 = vpop.f32.mrf.mxu0  ;;  %6200 = vmatmul.mubr.msk.bf16.gmra.mxu0 %vm731_vm2, %v6435_v11 }
 0x46f   : > { %v3517_v12 = vpop.f32.mrf.mxu1  ;;  %v8502_v54 = vadd.f32 %v3678_v37, %v3501_v39  ;;  %5110 = vmatprep.mubr.bf16.mxu0 %v9498_v7 }
 0x470   : > { %v3680_v57 = vpop.f32.mrf.mxu0 }
 0x471   : > { %v3521_v44 = vpop.f32.mrf.mxu1  ;;  %v8505_v24 = vadd.f32 %v3680_v57, %v3503_v27  ;;  %6186 = vmatmul.mubr.msk.bf16.gmra.mxu1 %vm731_vm2, %v6436_v6 }
 0x472   : > { %v3682_v40 = vpop.f32.mrf.mxu0  ;;  %4886 = vmatprep.mubr.bf16.mxu1 %v9498_v7 }
 0x473   : > { %v3523_v2 = vpop.f32.mrf.mxu1  ;;  %v8509_v28 = vadd.f32 %v3682_v40, %v3505_v63 }
 0x474   : > { %v3684_v3 = vpop.f32.mrf.mxu0 }
 0x475   : > { %v3525_v42 = vpop.f32.mrf.mxu1  ;;  %v8511_v8 = vadd.f32 %v3684_v3, %v3507_v9 }
 0x476   : > { %v3688_v13 = vpop.f32.mrf.mxu0  ;;  %6201 = vmatmul.mubr.msk.bf16.gmra.mxu0 %vm731_vm2, %v6437_v36 }
 0x477   : > { %v3527_v52 = vpop.f32.mrf.mxu1  ;;  %v8514_v31 = vadd.f32 %v3688_v13, %v3511_v55  ;;  %5120 = vmatprep.mubr.bf16.mxu0 %v9498_v7 }
 0x478   : > { %v3690_v17 = vpop.f32.mrf.mxu0 }
 0x479   : > { %v3531_v49 = vpop.f32.mrf.mxu1  ;;  %v8517_v21 = vadd.f32 %v3690_v17, %v3513_v32  ;;  %6187 = vmatmul.mubr.msk.bf16.gmra.mxu1 %vm731_vm2, %v6438_v34  ;;  %v6441_v32 = vld [vmem:[#allocation6 + $0x1f8] sm:$0xff]  }
 0x47a   : > { %v3692_v60 = vpop.f32.mrf.mxu0  ;;  %5308 = vmatprep.mubr.bf16.mxu1 %v9498_v7 }
 0x47b   : > { %v3533_v50 = vpop.f32.mrf.mxu1  ;;  %v8521_v39 = vadd.f32 %v3692_v60, %v3515_v23 }
 0x47c   : > { %v3694_v18 = vpop.f32.mrf.mxu0 }
 0x47d   : > { %v3535_v41 = vpop.f32.mrf.mxu1  ;;  %v8523_v27 = vadd.f32 %v3694_v18, %v3517_v12  ;;  %v6443_v18 = vld [vmem:[#allocation6 + $0x210] sm:$0xff]  }
 0x47e   : > { %v3698_v63 = vpop.f32.mrf.mxu0  ;;  %6202 = vmatmul.mubr.msk.bf16.gmra.mxu0 %vm731_vm2, %v6439_v46 }
 0x47f   : > { %v3537_v15 = vpop.f32.mrf.mxu1  ;;  %v8526_v59 = vadd.f32 %v3698_v63, %v3521_v44  ;;  %5130 = vmatprep.mubr.bf16.mxu0 %v9498_v7  ;;  %v6442_v44 = vld [vmem:[#allocation6 + $0x208] sm:$0xff]  }
 0x480   : > { %v3700_v9 = vpop.f32.mrf.mxu0 }
 0x481   : > { %v8529_v5 = vadd.f32 %v3700_v9, %v3523_v2  ;;  %v3854_v55 = vpop.f32.mrf.mxu1  ;;  %6212 = vmatmul.mubr.msk.bf16.vlgmr.msra.gmra.mxu1 %vm731_vm2, %v6440_v48 }
 0x482   : > { %v3933_v62 = vadd.f32 %v3854_v55, %v8454_v19  ;;  %v3702_v11 = vpop.f32.mrf.mxu0  ;;  %5318 = vmatprep.mubr.bf16.mxu1 %v9498_v7 }
 0x483   : > { %v8534_v26 = vadd.f32 %v3702_v11, %v3525_v42  ;;  %v3856_v23 = vpop.f32.mrf.mxu1 }
 0x484   : > { %v3934_v6 = vadd.f32 %v3856_v23, %v8457_v1  ;;  %v3704_v37 = vpop.f32.mrf.mxu0 }
 0x485   : > { %v8537_v12 = vadd.f32 %v3704_v37, %v3527_v52  ;;  %v3858_v57 = vpop.f32.mrf.mxu1 }
 0x486   : > { %v3935_v40 = vadd.f32 %v3858_v57, %v8461_v29  ;;  %v3708_v36 = vpop.f32.mrf.mxu0  ;;  %6203 = vmatmul.mubr.msk.bf16.gmra.mxu0 %vm731_vm2, %v6441_v32 }
 0x487   : > { %v8541_v19 = vadd.f32 %v3708_v36, %v3531_v49  ;;  %v3860_v2 = vpop.f32.mrf.mxu1 }
 0x488   : > { %v3936_v3 = vadd.f32 %v3860_v2, %v8463_v10  ;;  %v3710_v42 = vpop.f32.mrf.mxu0 }
 0x489   : > { %v8544_v34 = vadd.f32 %v3710_v42, %v3533_v50  ;;  %v3864_v13 = vpop.f32.mrf.mxu1  ;;  %6213 = vmatmul.mubr.msk.bf16.gmra.mxu1 %vm731_vm2, %v6442_v44 }
 0x48a   : > { %v3937_v1 = vadd.f32 %v3864_v13, %v8466_v35  ;;  %v3712_v52 = vpop.f32.mrf.mxu0  ;;  %5328 = vmatprep.mubr.bf16.mxu1 %v9498_v7 }
 0x48b   : > { %v8549_v29 = vadd.f32 %v3712_v52, %v3535_v41  ;;  %v3866_v17 = vpop.f32.mrf.mxu1 }
 0x48c   : > { %v3938_v49 = vadd.f32 %v3866_v17, %v8469_v30  ;;  %v3714_v60 = vpop.f32.mrf.mxu0 }
 0x48d   : > { %v8552_v46 = vadd.f32 %v3714_v60, %v3537_v15  ;;  %v3868_v10 = vpop.f32.mrf.mxu1 }
 0x48e   : > { %v3939_v50 = vadd.f32 %v3868_v10, %v8473_v20  ;;  %v4098_v48 = vpop.f32.mrf.mxu0 }
 0x48f   : > { %v3870_v63 = vpop.f32.mrf.mxu1  ;;  %v8555_v9 = vadd.f32 %v4098_v48, %v3933_v62 }
 0x490   : > { %v3940_v35 = vadd.f32 %v3870_v63, %v8475_v4  ;;  %v4100_v55 = vpop.f32.mrf.mxu0  ;;  %v6444_v4 = vld [vmem:[#allocation6 + $0x218] sm:$0xff]  }
 0x491   : > { %v3874_v11 = vpop.f32.mrf.mxu1  ;;  %v8558_v41 = vadd.f32 %v4100_v55, %v3934_v6  ;;  %6214 = vmatmul.mubr.msk.bf16.gmra.mxu1 %vm731_vm2, %v6443_v18 }
 0x492   : > { %v3941_v30 = vadd.f32 %v3874_v11, %v8478_v22  ;;  %v4102_v15 = vpop.f32.mrf.mxu0  ;;  %5338 = vmatprep.mubr.bf16.mxu1 %v9498_v7 }
 0x493   : > { %v3876_v32 = vpop.f32.mrf.mxu1  ;;  %v8563_v23 = vadd.f32 %v4102_v15, %v3935_v40 }
 0x494   : > { %v3942_v20 = vadd.f32 %v3876_v32, %v8481_v14  ;;  %v4104_v62 = vpop.f32.mrf.mxu0 }
 0x495   : > { %v3878_v37 = vpop.f32.mrf.mxu1  ;;  %v8566_v57 = vadd.f32 %v4104_v62, %v3936_v3 }
 0x496   : > { %v3943_v6 = vadd.f32 %v3878_v37, %v8485_v61  ;;  %v4108_v44 = vpop.f32.mrf.mxu0 }
 0x497   : > { %v3880_v36 = vpop.f32.mrf.mxu1  ;;  %v8569_v2 = vadd.f32 %v4108_v44, %v3937_v1 }
 0x498   : > { %v3944_v22 = vadd.f32 %v3880_v36, %v8487_v0  ;;  %v4110_v42 = vpop.f32.mrf.mxu0  ;;  %v6445_v0 = vld [vmem:[#allocation6 + $0x220] sm:$0xff]  }
 0x499   : > { %v3884_v13 = vpop.f32.mrf.mxu1  ;;  %v8572_v52 = vadd.f32 %v4110_v42, %v3938_v49  ;;  %6215 = vmatmul.mubr.msk.bf16.gmra.mxu1 %vm731_vm2, %v6444_v4 }
 0x49a   : > { %v3945_v14 = vadd.f32 %v3884_v13, %v8490_v43  ;;  %v4112_v40 = vpop.f32.mrf.mxu0  ;;  %5348 = vmatprep.mubr.bf16.mxu1 %v9498_v7 }
 0x49b   : > { %v3886_v3 = vpop.f32.mrf.mxu1  ;;  %v8577_v17 = vadd.f32 %v4112_v40, %v3939_v50 }
 0x49c   : > { %v3946_v61 = vadd.f32 %v3886_v3, %v8493_v38  ;;  %v4114_v1 = vpop.f32.mrf.mxu0 }
 0x49d   : > { %v3888_v60 = vpop.f32.mrf.mxu1  ;;  %v8580_v10 = vadd.f32 %v4114_v1, %v3940_v35 }
 0x49e   : > { %v3947_v49 = vadd.f32 %v3888_v60, %v8497_v45  ;;  %v4118_v18 = vpop.f32.mrf.mxu0 }
 0x49f   : > { %v3890_v48 = vpop.f32.mrf.mxu1  ;;  %v8583_v63 = vadd.f32 %v4118_v18, %v3941_v30 }
 0x4a0   : > { %v3948_v43 = vadd.f32 %v3890_v48, %v8499_v58  ;;  %v4120_v55 = vpop.f32.mrf.mxu0  ;;  %v6446_v58 = vld [vmem:[#allocation6 + $0x228] sm:$0xff]  }
 0x4a1   : > { %v3894_v11 = vpop.f32.mrf.mxu1  ;;  %v8586_v15 = vadd.f32 %v4120_v55, %v3942_v20  ;;  %6216 = vmatmul.mubr.msk.bf16.gmra.mxu1 %vm731_vm2, %v6445_v0 }
 0x4a2   : > { %v3949_v38 = vadd.f32 %v3894_v11, %v8502_v54  ;;  %v4122_v50 = vpop.f32.mrf.mxu0  ;;  %5358 = vmatprep.mubr.bf16.mxu1 %v9498_v7 }
 0x4a3   : > { %v3896_v35 = vpop.f32.mrf.mxu1  ;;  %v8591_v32 = vadd.f32 %v4122_v50, %v3943_v6 }
 0x4a4   : > { %v3950_v45 = vadd.f32 %v3896_v35, %v8505_v24  ;;  %v4124_v30 = vpop.f32.mrf.mxu0 }
 0x4a5   : > { %v3898_v62 = vpop.f32.mrf.mxu1  ;;  %v8594_v37 = vadd.f32 %v4124_v30, %v3944_v22 }
 0x4a6   : > { %v3951_v20 = vadd.f32 %v3898_v62, %v8509_v28  ;;  %v4128_v4 = vpop.f32.mrf.mxu0 }
 0x4a7   : > { %v3900_v44 = vpop.f32.mrf.mxu1  ;;  %v8597_v36 = vadd.f32 %v4128_v4, %v3945_v14 }
 0x4a8   : > { %v3952_v54 = vadd.f32 %v3900_v44, %v8511_v8  ;;  %v4130_v42 = vpop.f32.mrf.mxu0  ;;  %v6447_v8 = vld [vmem:[#allocation6 + $0x230] sm:$0xff]  }
 0x4a9   : > { %v3904_v13 = vpop.f32.mrf.mxu1  ;;  %v8600_v40 = vadd.f32 %v4130_v42, %v3946_v61  ;;  %6217 = vmatmul.mubr.msk.bf16.gmra.mxu1 %vm731_vm2, %v6446_v58 }
 0x4aa   : > { %v3953_v24 = vadd.f32 %v3904_v13, %v8514_v31  ;;  %v4132_v6 = vpop.f32.mrf.mxu0  ;;  %5368 = vmatprep.mubr.bf16.mxu1 %v9498_v7 }
 0x4ab   : > { %v3906_v22 = vpop.f32.mrf.mxu1  ;;  %v8605_v3 = vadd.f32 %v4132_v6, %v3947_v49 }
 0x4ac   : > { %v3954_v28 = vadd.f32 %v3906_v22, %v8517_v21  ;;  %v4134_v14 = vpop.f32.mrf.mxu0 }
 0x4ad   : > { %v3908_v1 = vpop.f32.mrf.mxu1  ;;  %v8608_v60 = vadd.f32 %v4134_v14, %v3948_v43 }
 0x4ae   : > { %v3955_v61 = vadd.f32 %v3908_v1, %v8521_v39  ;;  %v4138_v0 = vpop.f32.mrf.mxu0 }
 0x4af   : > { %v3910_v18 = vpop.f32.mrf.mxu1  ;;  %v8611_v48 = vadd.f32 %v4138_v0, %v3949_v38 }
 0x4b0   : > { %v3956_v31 = vadd.f32 %v3910_v18, %v8523_v27  ;;  %v4140_v55 = vpop.f32.mrf.mxu0  ;;  %v6448_v27 = vld [vmem:[#allocation6 + $0x238] sm:$0xff]  }
 0x4b1   : > { %v3914_v11 = vpop.f32.mrf.mxu1  ;;  %v8614_v50 = vadd.f32 %v4140_v55, %v3950_v45  ;;  %6218 = vmatmul.mubr.msk.bf16.gmra.mxu1 %vm731_vm2, %v6447_v8 }
 0x4b2   : > { %v3957_v21 = vadd.f32 %v3914_v11, %v8526_v59  ;;  %v4142_v49 = vpop.f32.mrf.mxu0  ;;  %5378 = vmatprep.mubr.bf16.mxu1 %v9498_v7 }
 0x4b3   : > { %v3916_v43 = vpop.f32.mrf.mxu1  ;;  %v8619_v35 = vadd.f32 %v4142_v49, %v3951_v20 }
 0x4b4   : > { %v3958_v39 = vadd.f32 %v3916_v43, %v8529_v5  ;;  %v4144_v38 = vpop.f32.mrf.mxu0 }
 0x4b5   : > { %v3918_v30 = vpop.f32.mrf.mxu1  ;;  %v8622_v62 = vadd.f32 %v4144_v38, %v3952_v54 }
 0x4b6   : > { %v3959_v45 = vadd.f32 %v3918_v30, %v8534_v26  ;;  %v4148_v58 = vpop.f32.mrf.mxu0 }
 0x4b7   : > { %v3920_v4 = vpop.f32.mrf.mxu1  ;;  %v8625_v44 = vadd.f32 %v4148_v58, %v3953_v24 }
 0x4b8   : > { %v3960_v59 = vadd.f32 %v3920_v4, %v8537_v12  ;;  %v4150_v42 = vpop.f32.mrf.mxu0 }
 0x4b9   : > { %v3924_v7 = vpop.f32.mrf.mxu1  ;;  %v8628_v13 = vadd.f32 %v4150_v42, %v3954_v28  ;;  %6219 = vmatmul.mubr.msk.bf16.gmra.mxu1 %vm731_vm2, %v6448_v27 }
 0x4ba   : > { %v3961_v5 = vadd.f32 %v3924_v7, %v8541_v19  ;;  %v4152_v20 = vpop.f32.mrf.mxu0 }
 0x4bb   : > { %v3926_v54 = vpop.f32.mrf.mxu1  ;;  %v8632_v6 = vadd.f32 %v4152_v20, %v3955_v61 }
 0x4bc   : > { %v3962_v26 = vadd.f32 %v3926_v54, %v8544_v34  ;;  %v4154_v22 = vpop.f32.mrf.mxu0 }
 0x4bd   : > { %v3928_v14 = vpop.f32.mrf.mxu1  ;;  %v8635_v24 = vadd.f32 %v4154_v22, %v3956_v31 }
 0x4be   : > { %v3963_v12 = vadd.f32 %v3928_v14, %v8549_v29  ;;  %v4158_v1 = vpop.f32.mrf.mxu0 }
 0x4bf   : > { %v3930_v8 = vpop.f32.mrf.mxu1  ;;  %v8638_v28 = vadd.f32 %v4158_v1, %v3957_v21 }
 0x4c0   : > { %v3964_v0 = vadd.f32 %v3930_v8, %v8552_v46  ;;  %v4160_v18 = vpop.f32.mrf.mxu0 }
 0x4c1   : > { %v8641_v19 = vadd.f32 %v4160_v18, %v3958_v39  ;;  %v4326_v55 = vpop.f32.mrf.mxu1 }
 0x4c2   : > { %v8644_v61 = vadd.f32 %v4326_v55, %v8555_v9  ;;  %v4162_v34 = vpop.f32.mrf.mxu0 }
 0x4c3   : > { %v8646_v11 = vadd.f32 %v4162_v34, %v3959_v45  ;;  %v4328_v31 = vpop.f32.mrf.mxu1 }
 0x4c4   : > { %v8649_v49 = vadd.f32 %v4328_v31, %v8558_v41  ;;  %v4164_v29 = vpop.f32.mrf.mxu0 }
 0x4c5   : > { %v8651_v43 = vadd.f32 %v4164_v29, %v3960_v59  ;;  %v4330_v21 = vpop.f32.mrf.mxu1 }
 0x4c6   : > { %v8654_v46 = vadd.f32 %v4330_v21, %v8563_v23  ;;  %v4168_v39 = vpop.f32.mrf.mxu0 }
 0x4c7   : > { %v8656_v38 = vadd.f32 %v4168_v39, %v3961_v5  ;;  %v4332_v30 = vpop.f32.mrf.mxu1 }
 0x4c8   : > { %v8659_v9 = vadd.f32 %v4332_v30, %v8566_v57  ;;  %v4170_v27 = vpop.f32.mrf.mxu0 }
 0x4c9   : > { %v8661_v45 = vadd.f32 %v4170_v27, %v3962_v26  ;;  %v4336_v58 = vpop.f32.mrf.mxu1 }
 0x4ca   : > { %v8664_v41 = vadd.f32 %v4336_v58, %v8569_v2  ;;  %v4172_v4 = vpop.f32.mrf.mxu0 }
 0x4cb   : > { %v8666_v59 = vadd.f32 %v4172_v4, %v3963_v12  ;;  %v4338_v42 = vpop.f32.mrf.mxu1 }
 0x4cc   : > { %v8669_v23 = vadd.f32 %v4338_v42, %v8572_v52  ;;  %v4174_v7 = vpop.f32.mrf.mxu0 }
 0x4cd   : > { %v8671_v5 = vadd.f32 %v4174_v7, %v3964_v0  ;;  %v4340_v20 = vpop.f32.mrf.mxu1 }
 0x4ce   : > { %v8674_v57 = vadd.f32 %v4340_v20, %v8577_v17  ;;  %v8676_v54 = vpop.f32.mrf.mxu0 }
 0x4cf   : > { %v4342_v26 = vpop.f32.mrf.mxu1 }
 0x4d0   : > { %v8679_v2 = vadd.f32 %v4342_v26, %v8580_v10  ;;  %v8681_v22 = vpop.f32.mrf.mxu0 }
 0x4d1   : > { %v4346_v14 = vpop.f32.mrf.mxu1 }
 0x4d2   : > { %v8684_v12 = vadd.f32 %v4346_v14, %v8583_v63  ;;  %v8686_v52 = vpop.f32.mrf.mxu0 }
 0x4d3   : > { %v4348_v1 = vpop.f32.mrf.mxu1 }
 0x4d4   : > { %v8689_v8 = vadd.f32 %v4348_v1, %v8586_v15  ;;  %v8691_v17 = vpop.f32.mrf.mxu0 }
 0x4d5   : > { %v4350_v0 = vpop.f32.mrf.mxu1 }
 0x4d6   : > { %v8694_v18 = vadd.f32 %v4350_v0, %v8591_v32  ;;  %v8696_v10 = vpop.f32.mrf.mxu0 }
 0x4d7   : > { %v4352_v55 = vpop.f32.mrf.mxu1 }
 0x4d8   : > { %v8699_v34 = vadd.f32 %v4352_v55, %v8594_v37  ;;  %v8701_v63 = vpop.f32.mrf.mxu0 }
 0x4d9   : > { %v4356_v31 = vpop.f32.mrf.mxu1 }
 0x4da   : > { %v8704_v29 = vadd.f32 %v4356_v31, %v8597_v36  ;;  %v8706_v15 = vpop.f32.mrf.mxu0 }
 0x4db   : > { %v4358_v21 = vpop.f32.mrf.mxu1 }
 0x4dc   : > { %v8709_v39 = vadd.f32 %v4358_v21, %v8600_v40  ;;  %v8711_v32 = vpop.f32.mrf.mxu0 }
 0x4dd   : > { %v4360_v30 = vpop.f32.mrf.mxu1 }
 0x4de   : > { %v8714_v27 = vadd.f32 %v4360_v30, %v8605_v3  ;;  %v8716_v37 = vpop.f32.mrf.mxu0 }
 0x4df   : > { %v4362_v58 = vpop.f32.mrf.mxu1 }
 0x4e0   : > { %9505 = vst [vmem:[#allocation65_spill] sm:$0xff] %v8714_v27  ;;  %v8719_v4 = vadd.f32 %v4362_v58, %v8608_v60  ;;  %v8721_v36 = vpop.f32.mrf.mxu0 }
 0x4e1   : > { %v4366_v42 = vpop.f32.mrf.mxu1 }
 0x4e2   : > { %9506 = vst [vmem:[#allocation78_spill] sm:$0xff] %v8719_v4  ;;  %v8724_v7 = vadd.f32 %v4366_v42, %v8611_v48  ;;  %v8726_v40 = vpop.f32.mrf.mxu0 }
 0x4e3   : > { %v4368_v20 = vpop.f32.mrf.mxu1 }
 0x4e4   : > { %9507 = vst [vmem:[#allocation30_spill] sm:$0xff] %v8724_v7  ;;  %v8729_v26 = vadd.f32 %v4368_v20, %v8614_v50  ;;  %v8731_v3 = vpop.f32.mrf.mxu0 }
 0x4e5   : > { %v4370_v14 = vpop.f32.mrf.mxu1 }
 0x4e6   : > { %9508 = vst [vmem:[#allocation31_spill] sm:$0xff] %v8729_v26  ;;  %v8734_v1 = vadd.f32 %v4370_v14, %v8619_v35  ;;  %v8736_v60 = vpop.f32.mrf.mxu0 }
 0x4e7   : > { %v4372_v0 = vpop.f32.mrf.mxu1 }
 0x4e8   : > { %9509 = vst [vmem:[#allocation57_spill] sm:$0xff] %v8734_v1  ;;  %v8739_v55 = vadd.f32 %v4372_v0, %v8622_v62  ;;  %v8741_v48 = vpop.f32.mrf.mxu0 }
 0x4e9   : > { %9511 = vst [vmem:[#allocation68_spill] sm:$0xff] %v8741_v48  ;;  %v4376_v31 = vpop.f32.mrf.mxu1 }
 0x4ea   : > { %9510 = vst [vmem:[#allocation55_spill] sm:$0xff] %v8739_v55  ;;  %v8744_v21 = vadd.f32 %v4376_v31, %v8625_v44  ;;  %v8746_v50 = vpop.f32.mrf.mxu0 }
 0x4eb   : > { %9513 = vst [vmem:[#allocation71_spill] sm:$0xff] %v8746_v50  ;;  %v4378_v30 = vpop.f32.mrf.mxu1 }
 0x4ec   : > { %9512 = vst [vmem:[#allocation56_spill] sm:$0xff] %v8744_v21  ;;  %v8749_v58 = vadd.f32 %v4378_v30, %v8628_v13  ;;  %v8751_v35 = vpop.f32.mrf.mxu0 }
 0x4ed   : > { %9515 = vst [vmem:[#allocation33_spill] sm:$0xff] %v8751_v35  ;;  %v4380_v42 = vpop.f32.mrf.mxu1 }
 0x4ee   : > { %9514 = vst [vmem:[#allocation32_spill] sm:$0xff] %v8749_v58  ;;  %v8754_v20 = vadd.f32 %v4380_v42, %v8632_v6  ;;  %v8756_v62 = vpop.f32.mrf.mxu0 }
 0x4ef   : > { %9517 = vst [vmem:[#allocation39_spill] sm:$0xff] %v8756_v62  ;;  %v4382_v14 = vpop.f32.mrf.mxu1 }
 0x4f0   : > { %9516 = vst [vmem:[#allocation75_spill] sm:$0xff] %v8754_v20  ;;  %v8759_v0 = vadd.f32 %v4382_v14, %v8635_v24  ;;  %v8761_v44 = vpop.f32.mrf.mxu0 }
 0x4f1   : > { %9519 = vst [vmem:[#allocation79_spill] sm:$0xff] %v8761_v44  ;;  %v4386_v31 = vpop.f32.mrf.mxu1 }
 0x4f2   : > { %9518 = vst [vmem:[#allocation58_spill] sm:$0xff] %v8759_v0  ;;  %v8764_v33 = vadd.f32 %v4386_v31, %v8638_v28  ;;  %v8766_v13 = vpop.f32.mrf.mxu0 }
 0x4f3   : > { %9521 = vst [vmem:[#allocation42_spill] sm:$0xff] %v8766_v13  ;;  %v4388_v30 = vpop.f32.mrf.mxu1 }
 0x4f4   : > { %9520 = vst [vmem:[#allocation34_spill] sm:$0xff] %v8764_v33  ;;  %v8769_v58 = vadd.f32 %v4388_v30, %v8641_v19  ;;  %v8771_v6 = vpop.f32.mrf.mxu0 }
 0x4f5   : > { %9523 = vst [vmem:[#allocation35_spill] sm:$0xff] %v8771_v6  ;;  %v4390_v42 = vpop.f32.mrf.mxu1 }
 0x4f6   : > { %9522 = vst [vmem:[#allocation59_spill] sm:$0xff] %v8769_v58  ;;  %v8774_v20 = vadd.f32 %v4390_v42, %v8646_v11  ;;  %v8776_v24 = vpop.f32.mrf.mxu0 }
 0x4f7   : > { %9525 = vst [vmem:[#allocation36_spill] sm:$0xff] %v8776_v24  ;;  %v4392_v14 = vpop.f32.mrf.mxu1 }
 0x4f8   : > { %9524 = vst [vmem:[#allocation61_spill] sm:$0xff] %v8774_v20  ;;  %v8779_v0 = vadd.f32 %v4392_v14, %v8651_v43  ;;  %v8781_v28 = vpop.f32.mrf.mxu0 }
 0x4f9   : > { %9527 = vst [vmem:[#allocation37_spill] sm:$0xff] %v8781_v28  ;;  %v4396_v31 = vpop.f32.mrf.mxu1 }
 0x4fa   : > { %9526 = vst [vmem:[#allocation60_spill] sm:$0xff] %v8779_v0  ;;  %v8784_v33 = vadd.f32 %v4396_v31, %v8656_v38  ;;  %v8786_v19 = vpop.f32.mrf.mxu0 }
 0x4fb   : > { %9529 = vst [vmem:[#allocation41_spill] sm:$0xff] %v8786_v19  ;;  %v4398_v30 = vpop.f32.mrf.mxu1 }
 0x4fc   : > { %9528 = vst [vmem:[#allocation63_spill] sm:$0xff] %v8784_v33  ;;  %v8789_v58 = vadd.f32 %v4398_v30, %v8661_v45  ;;  %v8791_v11 = vpop.f32.mrf.mxu0 }
 0x4fd   : > { %9531 = vst [vmem:[#allocation64_spill] sm:$0xff] %v8791_v11  ;;  %v4400_v42 = vpop.f32.mrf.mxu1 }
 0x4fe   : > { %9530 = vst [vmem:[#allocation43_spill] sm:$0xff] %v8789_v58  ;;  %v8794_v20 = vadd.f32 %v4400_v42, %v8666_v59  ;;  %v8796_v43 = vpop.f32.mrf.mxu0 }
 0x4ff   : > { %9533 = vst [vmem:[#allocation66_spill] sm:$0xff] %v8796_v43  ;;  %v4402_v14 = vpop.f32.mrf.mxu1 }
 0x500   : > { %9532 = vst [vmem:[#allocation44_spill] sm:$0xff] %v8794_v20  ;;  %v8799_v0 = vadd.f32 %v4402_v14, %v8671_v5  ;;  %v8801_v38 = vpop.f32.mrf.mxu0 }
 0x501   : > { %9535 = vst [vmem:[#allocation49_spill] sm:$0xff] %v8801_v38  ;;  %v4818_v31 = vpop.f32.mrf.mxu1 }
 0x502   : > { %9534 = vst [vmem:[#allocation48_spill] sm:$0xff] %v8799_v0  ;;  %v8803_v33 = vpop.f32.mrf.mxu0 }
 0x503   : > { %9536 = vst [vmem:[#allocation67_spill] sm:$0xff] %v8803_v33  ;;  %v4820_v19 = vpop.f32.mrf.mxu1 }
 0x504   : > { %v8805_v45 = vpop.f32.mrf.mxu0 }
 0x505   : > { %9537 = vst [vmem:[#allocation69_spill] sm:$0xff] %v8805_v45  ;;  %v4822_v30 = vpop.f32.mrf.mxu1 }
 0x506   : > { %v8807_v58 = vpop.f32.mrf.mxu0 }
 0x507   : > { %9538 = vst [vmem:[#allocation45_spill] sm:$0xff] %v8807_v58  ;;  %v8809_v11 = vpop.f32.mrf.mxu1 }
 0x508   : > { %v8811_v59 = vpop.f32.mrf.mxu0 }
 0x509   : > { %9539 = vst [vmem:[#allocation50_spill] sm:$0xff] %v8811_v59  ;;  %v8813_v42 = vpop.f32.mrf.mxu1 }
 0x50a   : > { %v8815_v20 = vpop.f32.mrf.mxu0 }
 0x50b   : > { %9540 = vst [vmem:[#allocation46_spill] sm:$0xff] %v8815_v20  ;;  %v8817_v5 = vpop.f32.mrf.mxu1 }
 0x50c   : > { %v8819_v14 = vpop.f32.mrf.mxu0 }
 0x50d   : > { %9541 = vst [vmem:[#allocation51_spill] sm:$0xff] %v8819_v14  ;;  %v8821_v0 = vpop.f32.mrf.mxu1 }
 0x50e   : > { %v5062_v33 = vpop.f32.mrf.mxu0 }
 0x50f   : > { %v8823_v38 = vpop.f32.mrf.mxu1 }
 0x510   : > { %v5064_v45 = vpop.f32.mrf.mxu0 }
 0x511   : > { %v8825_v43 = vpop.f32.mrf.mxu1 }
 0x512   : > { %v5066_v58 = vpop.f32.mrf.mxu0 }
 0x513   : > { %v8827_v28 = vpop.f32.mrf.mxu1 }
 0x514   : > { %v5068_v59 = vpop.f32.mrf.mxu0 }
 0x515   : > { %v8829_v53 = vpop.f32.mrf.mxu1 }
 0x516   : > { %v5072_v24 = vpop.f32.mrf.mxu0 }
 0x517   : > { %v8831_v20 = vpop.f32.mrf.mxu1 }
 0x518   : > { %v8833_v21 = vpop.f32.mrf.mxu0 }
 0x519   : > { %v8835_v14 = vpop.f32.mrf.mxu1 }
 0x51a   : > { %9542 = vst [vmem:[#allocation70_spill] sm:$0xff] %v8835_v14  ;;  %v8837_v6 = vpop.f32.mrf.mxu0 }
 0x51b   : > { %v8839_v55 = vpop.f32.mrf.mxu1 }
 0x51c   : > { %9543 = vst [vmem:[#allocation73_spill] sm:$0xff] %v8839_v55  ;;  %v8841_v56 = vpop.f32.mrf.mxu0 }
 0x51d   : > { %v8843_v13 = vpop.f32.mrf.mxu1 }
 0x51e   : > { %9544 = vst [vmem:[#allocation72_spill] sm:$0xff] %v8843_v13  ;;  %v8847_v44 = vpop.f32.mrf.mxu0 }
 0x51f   : > { %v8845_v1 = vpop.f32.mrf.mxu1 }
 0x520   : > { %9545 = vst [vmem:[#allocation47_spill] sm:$0xff] %v8845_v1  ;;  %v8851_v25 = vpop.f32.mrf.mxu0 }
 0x521   : > { %v8849_v26 = vpop.f32.mrf.mxu1 }
 0x522   : > { %9546 = vst [vmem:[#allocation52_spill] sm:$0xff] %v8849_v26  ;;  %v8857_v35 = vpop.f32.mrf.mxu0 }
 0x523   : > { %v8853_v62 = vpop.f32.mrf.mxu1 }
 0x524   : > { %9547 = vst [vmem:[#allocation53_spill] sm:$0xff] %v8853_v62  ;;  %v8863_v55 = vpop.f32.mrf.mxu0 }
 0x525   : > { %v8855_v7 = vpop.f32.mrf.mxu1  ;;  %9551 = vst [vmem:[#allocation80_spill] sm:$0xff] %v8863_v55 }
 0x526   : > { %9548 = vst [vmem:[#allocation74_spill] sm:$0xff] %v8855_v7  ;;  %v8869_v50 = vpop.f32.mrf.mxu0 }
 0x527   : > { %v8859_v4 = vpop.f32.mrf.mxu1  ;;  %9554 = vst [vmem:[#allocation22_spill] sm:$0xff] %v8869_v50 }
 0x528   : > { %9549 = vst [vmem:[#allocation76_spill] sm:$0xff] %v8859_v4  ;;  %v8875_v62 = vpop.f32.mrf.mxu0 }
 0x529   : > { %v8861_v51 = vpop.f32.mrf.mxu1  ;;  %9557 = vst [vmem:[#allocation24_spill] sm:$0xff] %v8875_v62 }
 0x52a   : > { %9550 = vst [vmem:[#allocation77_spill] sm:$0xff] %v8861_v51  ;;  %v8881_v4 = vpop.f32.mrf.mxu0 }
 0x52b   : > { %v8865_v13 = vpop.f32.mrf.mxu1  ;;  %9560 = vst [vmem:[#allocation28_spill] sm:$0xff] %v8881_v4 }
 0x52c   : > { %9552 = vst [vmem:[#allocation19_spill] sm:$0xff] %v8865_v13  ;;  %v8887_v13 = vpop.f32.mrf.mxu0 }
 0x52d   : > { %v8867_v1 = vpop.f32.mrf.mxu1  ;;  %9563 = vst [vmem:[#allocation82_spill] sm:$0xff] %v8887_v13 }
 0x52e   : > { %9553 = vst [vmem:[#allocation20_spill] sm:$0xff] %v8867_v1 }
 0x52f   : > { %v8871_v26 = vpop.f32.mrf.mxu1 }
 0x530   : > { %9555 = vst [vmem:[#allocation21_spill] sm:$0xff] %v8871_v26  ;;  %v4649_v26 = vadd.f32 %v8676_v54, %v8644_v61  ;;  %v4652_v61 = vadd.f32 %v8691_v17, %v8659_v9  ;;  %v5429_v17 = vpop.permute.xlu0 %5428 }
 0x531   : > { %v8873_v27 = vpop.f32.mrf.mxu1 }
 0x532   : > { %9556 = vst [vmem:[#allocation23_spill] sm:$0xff] %v8873_v27  ;;  %v4897_v62 = vadd.f32 %v4818_v31, %v4649_v26  ;;  %v4900_v31 = vadd.f32 %v8809_v11, %v4652_v61 }
 0x533   : > { %v8877_v7 = vpop.f32.mrf.mxu1 }
 0x534   : > { %9558 = vst [vmem:[#allocation25_spill] sm:$0xff] %v8877_v7  ;;  %v4650_v7 = vadd.f32 %v8681_v22, %v8649_v49  ;;  %v5141_v13 = vadd.f32 %v5062_v33, %v4897_v62  ;;  %v4653_v49 = vadd.f32 %v8696_v10, %v8664_v41  ;;  %v4654_v33 = vadd.f32 %v8701_v63, %v8669_v23 }
 0x535   : > { %v8879_v14 = vpop.f32.mrf.mxu1  ;;  %v4655_v41 = vadd.f32 %v8706_v15, %v8674_v57  ;;  %v4656_v63 = vadd.f32 %v8711_v32, %v8679_v2 }
 0x536   : > { %9559 = vst [vmem:[#allocation26_spill] sm:$0xff] %v8879_v14  ;;  %v8897_v14 = vpop.f32.mrf.mxu0  ;;  %v4902_v10 = vadd.f32 %v8817_v5, %v4654_v33 }
 0x537   : > { %v8883_v51 = vpop.f32.mrf.mxu1  ;;  %v4903_v11 = vadd.f32 %v8821_v0, %v4655_v41  ;;  %v4661_v41 = vadd.f32 %v8736_v60, %v8704_v29 }
 0x538   : > { %9561 = vst [vmem:[#allocation27_spill] sm:$0xff] %v8883_v51  ;;  %v4898_v51 = vadd.f32 %v4820_v19, %v4650_v7  ;;  %v8907_v22 = vpop.f32.mrf.mxu0  ;;  %v4901_v7 = vadd.f32 %v8813_v42, %v4653_v49 }
 0x539   : > { %v8885_v55 = vpop.f32.mrf.mxu1  ;;  %v5147_v42 = vadd.f32 %v8837_v6, %v4903_v11 }
 0x53a   : > { %9562 = vst [vmem:[#allocation81_spill] sm:$0xff] %v8885_v55  ;;  %v4651_v55 = vadd.f32 %v8686_v52, %v8654_v46  ;;  %v5145_v62 = vadd.f32 %v5072_v24, %v4901_v7  ;;  %v4657_v24 = vadd.f32 %v8716_v37, %v8684_v12 }
 0x53b   : > { %v8889_v1 = vpop.f32.mrf.mxu1 }
 0x53c   : > { %9564 = vst [vmem:[#allocation83_spill] sm:$0xff] %v8889_v1  ;;  %v5424_v1 = vpop.permute.xlu1 %5423  ;;  %v4899_v54 = vadd.f32 %v4822_v30, %v4651_v55  ;;  %v4905_v49 = vadd.f32 %v8825_v43, %v4657_v24  ;;  %v9573_v24 = vld [vmem:[#allocation22_spill] sm:$0xff] }
 0x53d   : > { %v8893_v27 = vpop.f32.mrf.mxu1 }
 0x53e   : > { %9565 = vst [vmem:[#allocation84_spill] sm:$0xff] %v8893_v27  ;;  %v5142_v27 = vadd.f32 %v5064_v45, %v4898_v51  ;;  %v5144_v51 = vadd.f32 %v5068_v59, %v4900_v31  ;;  %v5146_v45 = vadd.f32 %v8833_v21, %v4902_v10  ;;  %v4904_v59 = vadd.f32 %v8823_v38, %v4656_v63  ;;  %v5439_v31 = vpop.permute.xlu0 %5438 }
 0x53f   : > { %v8899_v4 = vpop.f32.mrf.mxu1  ;;  %v4658_v21 = vadd.f32 %v8721_v36, %v8689_v8  ;;  %v5149_v33 = vadd.f32 %v8847_v44, %v4905_v49 }
 0x540   : > { %9566 = vst [vmem:[#allocation85_spill] sm:$0xff] %v8899_v4  ;;  %v5143_v4 = vadd.f32 %v5066_v58, %v4899_v54  ;;  %v5148_v12 = vadd.f32 %v8841_v56, %v4904_v59  ;;  %v4660_v56 = vadd.f32 %v8731_v3, %v8699_v34 }
 0x541   : > { %v5310_v50 = vpop.f32.mrf.mxu1 }
 0x542   : > { %v5389_v48 = vadd.f32 %v5310_v50, %v5141_v13  ;;  %v8916_v13 = vpop.f32.mrf.mxu0  ;;  %v4908_v10 = vadd.f32 %v8831_v20, %v4660_v56  ;;  %v5449_v60 = vpop.permute.xlu0 %5448  ;;  %v9569_v20 = vld [vmem:[#allocation80_spill] sm:$0xff] }
 0x543   : > { %v5312_v26 = vpop.f32.mrf.mxu1  ;;  %v9582_v56 = vld [vmem:[#allocation28_spill] sm:$0xff] }
 0x544   : > { %v5501_v46 = vadd.f32 %v5424_v1, %v5389_v48  ;;  %v5390_v52 = vadd.f32 %v5312_v26, %v5142_v27  ;;  %v8926_v5 = vpop.f32.mrf.mxu0  ;;  %v5152_v63 = vadd.f32 %v9569_v20, %v4908_v10  ;;  %v9584_v10 = vld [vmem:[#allocation31_spill] sm:$0xff]  ;;  %v9589_v20 = vld [vmem:[#allocation42_spill] sm:$0xff] }
 0x545   : > { %v5314_v9 = vpop.f32.mrf.mxu1 }
 0x546   : > { %v5502_v55 = vadd.f32 %v5424_v1, %v5390_v52  ;;  %v5391_v50 = vadd.f32 %v5314_v9, %v5143_v4  ;;  %v5533_v27 = vmax.f32 %v5501_v46, 0.0  ;;  %v5434_v4 = vpop.permute.xlu1 %5433  ;;  %v4659_v46 = vadd.f32 %v8726_v40, %v8694_v18  ;;  %v8936_v7 = vpop.f32.mrf.mxu0 }
 0x547   : > { %v5316_v48 = vpop.f32.mrf.mxu1  ;;  %v4906_v52 = vadd.f32 %v8827_v28, %v4658_v21  ;;  %v9576_v21 = vld [vmem:[#allocation33_spill] sm:$0xff] }
 0x548   : > { %v5534_v58 = vmax.f32 %v5502_v55, 0.0  ;;  %v5503_v19 = vadd.f32 %v5429_v17, %v5391_v50  ;;  %v5392_v23 = vadd.f32 %v5316_v48, %v5144_v51  ;;  %v4907_v51 = vadd.f32 %v8829_v53, %v4659_v46 }
 0x549   : > { %v5320_v1 = vpop.f32.mrf.mxu1  ;;  %v5150_v28 = vadd.f32 %v8851_v25, %v4906_v52  ;;  %v9567_v25 = vld [vmem:[#allocation68_spill] sm:$0xff] }
 0x54a   : > { %v5504_v57 = vadd.f32 %v5429_v17, %v5392_v23  ;;  %v5393_v15 = vadd.f32 %v5320_v1, %v5145_v62  ;;  %v5565_v30 = vadd.f32 %v5534_v58, %v5533_v27  ;;  %v5535_v2 = vmax.f32 %v5503_v19, 0.0  ;;  %v5444_v40 = vpop.permute.xlu1 %5443  ;;  %v8947_v62 = vpop.f32.mrf.mxu0  ;;  %v9568_v19 = vld [vmem:[#allocation70_spill] sm:$0xff] }
 0x54b   : > { %v5322_v61 = vpop.f32.mrf.mxu1  ;;  %v4662_v58 = vadd.f32 %v9567_v25, %v8709_v39  ;;  %v4909_v23 = vadd.f32 %v9568_v19, %v4661_v41  ;;  %v9583_v41 = vld [vmem:[#allocation38_spill] sm:$0xff] }
 0x54c   : > { %v5536_v32 = vmax.f32 %v5504_v57, 0.0  ;;  %v5505_v0 = vadd.f32 %v5434_v4, %v5393_v15  ;;  %v5394_v54 = vadd.f32 %v5322_v61, %v5146_v45  ;;  %5566 = vadd.xlane.f32.xlu0 %v5565_v30  ;;  %v9571_v45 = vld [vmem:[#allocation71_spill] sm:$0xff]  ;;  %v9572_v15 = vld [vmem:[#allocation73_spill] sm:$0xff]  ;;  %v8958_v59 = vpop.f32.mrf.mxu0  ;;  %v9587_v25 = vld [vmem:[#allocation82_spill] sm:$0xff] }
 0x54d   : > { %v5324_v26 = vpop.f32.mrf.mxu1  ;;  %v4910_v30 = vadd.f32 %v9572_v15, %v4662_v58 }
 0x54e   : > { %v5506_v37 = vadd.f32 %v5434_v4, %v5394_v54  ;;  %v5395_v38 = vadd.f32 %v5324_v26, %v5147_v42  ;;  %v5568_v6 = vadd.f32 %v5536_v32, %v5535_v2  ;;  %v5537_v8 = vmax.f32 %v5505_v0, 0.0  ;;  %v9570_v4 = vld [vmem:[#allocation65_spill] sm:$0xff]  ;;  %v9575_v54 = vld [vmem:[#allocation78_spill] sm:$0xff]  ;;  %v9577_v26 = vld [vmem:[#allocation72_spill] sm:$0xff] }
 0x54f   : > { %v5326_v9 = vpop.f32.mrf.mxu1  ;;  %v4663_v57 = vadd.f32 %v9571_v45, %v9570_v4  ;;  %v9574_v0 = vld [vmem:[#allocation29_spill] sm:$0xff]  ;;  %v4664_v49 = vadd.f32 %v9576_v21, %v9575_v54 }
 0x550   : > { %v5538_v36 = vmax.f32 %v5506_v37, 0.0  ;;  %v5507_v43 = vadd.f32 %v5439_v31, %v5395_v38  ;;  %v5396_v17 = vadd.f32 %v5326_v9, %v5148_v12  ;;  %3173 = vadd.xlane.f32.xlu0 %v7989_v47  ;;  %5569 = vadd.xlane.f32.xlu1 %v5568_v6  ;;  %v5151_v47 = vadd.f32 %v8857_v35, %v4907_v51  ;;  %v5454_v37 = vpop.permute.xlu1 %5453  ;;  %v9578_v38 = vld [vmem:[#allocation24_spill] sm:$0xff]  ;;  %v9579_v9 = vld [vmem:[#allocation30_spill] sm:$0xff] }
 0x551   : > { %v5330_v18 = vpop.f32.mrf.mxu1  ;;  %v5154_v6 = vadd.f32 %v9578_v38, %v4910_v30  ;;  %v9597_v38 = vld [vmem:[#allocation76_spill] sm:$0xff] }
 0x552   : > { %v5508_v44 = vadd.f32 %v5439_v31, %v5396_v17  ;;  %v5397_v55 = vadd.f32 %v5330_v18, %v5149_v33  ;;  %v5571_v50 = vadd.f32 %v5538_v36, %v5537_v8  ;;  %v5539_v34 = vmax.f32 %v5507_v43, 0.0  ;;  %v9580_v8 = vld [vmem:[#allocation39_spill] sm:$0xff]  ;;  %v8969_v18 = vpop.f32.mrf.mxu0 }
 0x553   : > { %v5332_v48 = vpop.f32.mrf.mxu1  ;;  %v4911_v31 = vadd.f32 %v9577_v26, %v4663_v57  ;;  %v4665_v36 = vadd.f32 %v9580_v8, %v9579_v9  ;;  %v9581_v43 = vld [vmem:[#allocation47_spill] sm:$0xff] }
 0x554   : > { %v5540_v3 = vmax.f32 %v5508_v44, 0.0  ;;  %v5509_v53 = vadd.f32 %v5444_v40, %v5397_v55  ;;  %v5398_v27 = vadd.f32 %v5332_v48, %v5150_v28  ;;  %3176 = vadd.xlane.f32.xlu0 %v8002_v16  ;;  %5572 = vadd.xlane.f32.xlu1 %v5571_v50  ;;  %v5153_v16 = vadd.f32 %v9573_v24, %v4909_v23  ;;  %v8980_v4 = vpop.f32.mrf.mxu0  ;;  %v5464_v54 = vpop.permute.xlu1 %5463 }
 0x555   : > { %v5334_v29 = vpop.f32.mrf.mxu1  ;;  %v4912_v17 = vadd.f32 %v9581_v43, %v4664_v49  ;;  %v5155_v51 = vadd.f32 %v9582_v56, %v4911_v31  ;;  %v9595_v31 = vld [vmem:[#allocation56_spill] sm:$0xff]  ;;  %v9600_v56 = vld [vmem:[#allocation37_spill] sm:$0xff] }
 0x556   : > { %v5510_v35 = vadd.f32 %v5444_v40, %v5398_v27  ;;  %v5399_v11 = vadd.f32 %v5334_v29, %v5151_v47  ;;  %v5574_v1 = vadd.f32 %v5540_v3, %v5539_v34  ;;  %v5541_v39 = vmax.f32 %v5509_v53, 0.0  ;;  %v9585_v47 = vld [vmem:[#allocation79_spill] sm:$0xff]  ;;  %v9586_v34 = vld [vmem:[#allocation52_spill] sm:$0xff]  ;;  %v5459_v27 = vpop.permute.xlu0 %5458 }
 0x557   : > { %v5336_v42 = vpop.f32.mrf.mxu1  ;;  %v4666_v48 = vadd.f32 %v9585_v47, %v9584_v10  ;;  %v4913_v3 = vadd.f32 %v9586_v34, %v4665_v36  ;;  %v5156_v58 = vadd.f32 %v9587_v25, %v4912_v17  ;;  %v9598_v17 = vld [vmem:[#allocation40_spill] sm:$0xff]  ;;  %v9602_v47 = vld [vmem:[#allocation75_spill] sm:$0xff] }
 0x558   : > { %v5542_v61 = vmax.f32 %v5510_v35, 0.0  ;;  %v5511_v2 = vadd.f32 %v5449_v60, %v5399_v11  ;;  %v5400_v32 = vadd.f32 %v5336_v42, %v5152_v63  ;;  %3179 = vadd.xlane.f32.xlu0 %v9574_v0  ;;  %5575 = vadd.xlane.f32.xlu1 %v5574_v1  ;;  %v9590_v35 = vld [vmem:[#allocation53_spill] sm:$0xff]  ;;  %v9592_v42 = vld [vmem:[#allocation55_spill] sm:$0xff] }
 0x559   : > { %v5340_v12 = vpop.f32.mrf.mxu1  ;;  %v4914_v11 = vadd.f32 %v9590_v35, %v4666_v48  ;;  %v5157_v1 = vadd.f32 %v8897_v14, %v4913_v3  ;;  %v9603_v48 = vld [vmem:[#allocation41_spill] sm:$0xff]  ;;  %v9604_v3 = vld [vmem:[#allocation19_spill] sm:$0xff] }
 0x55a   : > { %v5512_v46 = vadd.f32 %v5449_v60, %v5400_v32  ;;  %v5401_v52 = vadd.f32 %v5340_v12, %v5153_v16  ;;  %v5577_v33 = vadd.f32 %v5542_v61, %v5541_v39  ;;  %v5543_v28 = vmax.f32 %v5511_v2, 0.0  ;;  %v9588_v60 = vld [vmem:[#allocation57_spill] sm:$0xff]  ;;  %v9591_v16 = vld [vmem:[#allocation62_spill] sm:$0xff]  ;;  %v9593_v39 = vld [vmem:[#allocation35_spill] sm:$0xff] }
 0x55b   : > { %v5342_v40 = vpop.f32.mrf.mxu1  ;;  %v4667_v63 = vadd.f32 %v9589_v20, %v9588_v60  ;;  %v4668_v61 = vadd.f32 %v9593_v39, %v9592_v42  ;;  %v9594_v2 = vld [vmem:[#allocation74_spill] sm:$0xff]  ;;  %v5158_v21 = vadd.f32 %v8907_v22, %v4914_v11  ;;  %v9596_v12 = vld [vmem:[#allocation36_spill] sm:$0xff]  ;;  %v4671_v34 = vadd.f32 %v9603_v48, %v9602_v47 }
 0x55c   : > { %v5544_v44 = vmax.f32 %v5512_v46, 0.0  ;;  %v5513_v55 = vadd.f32 %v5454_v37, %v5401_v52  ;;  %v5402_v50 = vadd.f32 %v5342_v40, %v5154_v6  ;;  %3182 = vadd.xlane.f32.xlu0 %v9583_v41  ;;  %5578 = vadd.xlane.f32.xlu1 %v5577_v33  ;;  %v8991_v52 = vpop.f32.mrf.mxu0  ;;  %v9599_v22 = vld [vmem:[#allocation32_spill] sm:$0xff]  ;;  %v9601_v40 = vld [vmem:[#allocation77_spill] sm:$0xff]  ;;  %v9605_v20 = vld [vmem:[#allocation54_spill] sm:$0xff] }
 0x55d   : > { %v5344_v53 = vpop.f32.mrf.mxu1  ;;  %v4915_v32 = vadd.f32 %v9594_v2, %v4667_v63  ;;  %v4916_v6 = vadd.f32 %v9597_v38, %v4668_v61  ;;  %v9607_v63 = vld [vmem:[#allocation64_spill] sm:$0xff]  ;;  %v9610_v42 = vld [vmem:[#allocation66_spill] sm:$0xff]  ;;  %v9611_v61 = vld [vmem:[#allocation21_spill] sm:$0xff] }
 0x55e   : > { %v5514_v19 = vadd.f32 %v5454_v37, %v5402_v50  ;;  %v5403_v23 = vadd.f32 %v5344_v53, %v5155_v51  ;;  %v5580_v29 = vadd.f32 %v5544_v44, %v5543_v28  ;;  %v5545_v57 = vmax.f32 %v5513_v55, 0.0  ;;  %v5469_v55 = vpop.permute.xlu0 %5468  ;;  %v5126_v25 = vpop.f32.mrf.mxu0  ;;  %v9608_v11 = vld [vmem:[#allocation20_spill] sm:$0xff]  ;;  %v9620_v47 = vld [vmem:[#allocation26_spill] sm:$0xff] }
 0x55f   : > { %v5346_v45 = vpop.f32.mrf.mxu1  ;;  %v4669_v37 = vadd.f32 %v9596_v12, %v9595_v31  ;;  %v5159_v46 = vadd.f32 %v8916_v13, %v4915_v32  ;;  %v4670_v51 = vadd.f32 %v9600_v56, %v9599_v22  ;;  %v5160_v50 = vadd.f32 %v8926_v5, %v4916_v6  ;;  %v9606_v5 = vld [vmem:[#allocation58_spill] sm:$0xff]  ;;  %v9612_v31 = vld [vmem:[#allocation59_spill] sm:$0xff]  ;;  %v9613_v12 = vld [vmem:[#allocation49_spill] sm:$0xff] }
 0x560   : > { %v5546_v15 = vmax.f32 %v5514_v19, 0.0  ;;  %v5515_v30 = vadd.f32 %v5459_v27, %v5403_v23  ;;  %v5404_v24 = vadd.f32 %v5346_v45, %v5156_v58  ;;  %3185 = vadd.xlane.f32.xlu0 %v9591_v16  ;;  %5581 = vadd.xlane.f32.xlu1 %v5580_v29  ;;  %v4672_v35 = vadd.f32 %v9607_v63, %v9606_v5  ;;  %v9609_v16 = vld [vmem:[#allocation34_spill] sm:$0xff]  ;;  %v9617_v22 = vld [vmem:[#allocation25_spill] sm:$0xff] }
 0x561   : > { %v5350_v0 = vpop.f32.mrf.mxu1  ;;  %v4917_v28 = vadd.f32 %v9601_v40, %v4669_v37  ;;  %v4918_v53 = vadd.f32 %v9604_v3, %v4670_v51  ;;  %v4673_v39 = vadd.f32 %v9610_v42, %v9609_v16  ;;  %v9614_v37 = vld [vmem:[#allocation23_spill] sm:$0xff] }
 0x562   : > { %v5516_v14 = vadd.f32 %v5459_v27, %v5404_v24  ;;  %v5405_v49 = vadd.f32 %v5350_v0, %v5157_v1  ;;  %v5583_v26 = vadd.f32 %v5546_v15, %v5545_v57  ;;  %v5547_v9 = vmax.f32 %v5515_v30, 0.0  ;;  %v5474_v57 = vpop.permute.xlu1 %5473  ;;  %v5128_v0 = vpop.f32.mrf.mxu0 }
 0x563   : > { %v5352_v33 = vpop.f32.mrf.mxu1  ;;  %v5161_v27 = vadd.f32 %v8936_v7, %v4917_v28  ;;  %v4919_v1 = vadd.f32 %v9608_v11, %v4671_v34  ;;  %v5162_v15 = vadd.f32 %v8947_v62, %v4918_v53  ;;  %v4920_v2 = vadd.f32 %v9611_v61, %v4672_v35 }
 0x564   : > { %v5548_v8 = vmax.f32 %v5516_v14, 0.0  ;;  %v5517_v36 = vadd.f32 %v5464_v54, %v5405_v49  ;;  %v5406_v43 = vadd.f32 %v5352_v33, %v5158_v21  ;;  %3188 = vadd.xlane.f32.xlu0 %v9598_v17  ;;  %5584 = vadd.xlane.f32.xlu1 %v5583_v26  ;;  %v4674_v62 = vadd.f32 %v9613_v12, %v9612_v31  ;;  %v5132_v40 = vpop.f32.mrf.mxu0 }
 0x565   : > { %v5354_v44 = vpop.f32.mrf.mxu1  ;;  %v5163_v32 = vadd.f32 %v8958_v59, %v4919_v1  ;;  %v4921_v38 = vadd.f32 %v9614_v37, %v4673_v39  ;;  %v5164_v33 = vadd.f32 %v8969_v18, %v4920_v2  ;;  %v9615_v59 = vld [vmem:[#allocation61_spill] sm:$0xff] }
 0x566   : > { %v5518_v13 = vadd.f32 %v5464_v54, %v5406_v43  ;;  %v5407_v41 = vadd.f32 %v5354_v44, %v5159_v46  ;;  %v5586_v10 = vadd.f32 %v5548_v8, %v5547_v9  ;;  %v5549_v19 = vmax.f32 %v5517_v36, 0.0  ;;  %v5479_v46 = vpop.permute.xlu0 %5478  ;;  %v9616_v43 = vld [vmem:[#allocation67_spill] sm:$0xff]  ;;  %v5484_v3 = vpop.permute.xlu1 %5483 }
 0x567   : > { %v5356_v58 = vpop.f32.mrf.mxu1  ;;  %v4675_v17 = vadd.f32 %v9616_v43, %v9615_v59  ;;  %v4922_v56 = vadd.f32 %v9617_v22, %v4674_v62  ;;  %v5165_v51 = vadd.f32 %v8980_v4, %v4921_v38  ;;  %v9621_v4 = vld [vmem:[#allocation63_spill] sm:$0xff]  ;;  %v5134_v63 = vpop.f32.mrf.mxu0 }
 0x568   : > { %v5550_v23 = vmax.f32 %v5518_v13, 0.0  ;;  %v5519_v29 = vadd.f32 %v5469_v55, %v5407_v41  ;;  %v5408_v60 = vadd.f32 %v5356_v58, %v5160_v50  ;;  %3191 = vadd.xlane.f32.xlu0 %v9605_v20  ;;  %5587 = vadd.xlane.f32.xlu1 %v5586_v10  ;;  %v9618_v41 = vld [vmem:[#allocation60_spill] sm:$0xff]  ;;  %v9619_v10 = vld [vmem:[#allocation69_spill] sm:$0xff] }
 0x569   : > { %v5360_v45 = vpop.f32.mrf.mxu1  ;;  %v4676_v18 = vadd.f32 %v9619_v10, %v9618_v41  ;;  %v4923_v48 = vadd.f32 %v9620_v47, %v4675_v17  ;;  %v5166_v53 = vadd.f32 %v8991_v52, %v4922_v56  ;;  %v9626_v52 = vld [vmem:[#allocation81_spill] sm:$0xff]  ;;  %v5136_v31 = vpop.f32.mrf.mxu0 }
 0x56a   : > { %v5520_v30 = vadd.f32 %v5469_v55, %v5408_v60  ;;  %v5409_v7 = vadd.f32 %v5360_v45, %v5161_v27  ;;  %v5589_v24 = vadd.f32 %v5550_v23, %v5549_v19  ;;  %v5551_v21 = vmax.f32 %v5519_v29, 0.0  ;;  %v9622_v23 = vld [vmem:[#allocation45_spill] sm:$0xff]  ;;  %v9623_v60 = vld [vmem:[#allocation27_spill] sm:$0xff]  ;;  %v5489_v42 = vpop.permute.xlu0 %5488  ;;  %v5494_v59 = vpop.permute.xlu1 %5493 }
 0x56b   : > { %v5362_v54 = vpop.f32.mrf.mxu1  ;;  %v4677_v29 = vadd.f32 %v9622_v23, %v9621_v4  ;;  %v4924_v20 = vadd.f32 %v9623_v60, %v4676_v18  ;;  %v5167_v5 = vadd.f32 %v5126_v25, %v4923_v48  ;;  %v9628_v25 = vld [vmem:[#allocation46_spill] sm:$0xff] }
 0x56c   : > { %v5552_v14 = vmax.f32 %v5520_v30, 0.0  ;;  %v5521_v49 = vadd.f32 %v5474_v57, %v5409_v7  ;;  %v5410_v26 = vadd.f32 %v5362_v54, %v5162_v15  ;;  %5590 = vadd.xlane.f32.xlu1 %v5589_v24  ;;  %v9624_v15 = vld [vmem:[#allocation43_spill] sm:$0xff]  ;;  %v9625_v30 = vld [vmem:[#allocation50_spill] sm:$0xff]  ;;  %v9627_v54 = vld [vmem:[#allocation44_spill] sm:$0xff] }
 0x56d   : > { %v5364_v6 = vpop.f32.mrf.mxu1  ;;  %v4678_v7 = vadd.f32 %v9625_v30, %v9624_v15  ;;  %v4925_v24 = vadd.f32 %v9626_v52, %v4677_v29  ;;  %v5168_v39 = vadd.f32 %v5128_v0, %v4924_v20  ;;  %v9632_v0 = vld [vmem:[#allocation84_spill] sm:$0xff]  ;;  %v3193_v30 = vld [vmem:[%s9299_s6] sm:$0xff] }
 0x56e   : > { %v5522_v9 = vadd.f32 %v5474_v57, %v5410_v26  ;;  %v5411_v8 = vadd.f32 %v5364_v6, %v5163_v32  ;;  %v5592_v36 = vadd.f32 %v5552_v14, %v5551_v21  ;;  %v5553_v44 = vmax.f32 %v5521_v49, 0.0  ;;  %v9629_v14 = vld [vmem:[#allocation83_spill] sm:$0xff] }
 0x56f   : > { %v5366_v28 = vpop.f32.mrf.mxu1  ;;  %v4679_v21 = vadd.f32 %v9628_v25, %v9627_v54  ;;  %v4926_v49 = vadd.f32 %v9629_v14, %v4678_v7  ;;  %v5169_v26 = vadd.f32 %v5132_v40, %v4925_v24  ;;  %v3147_v7 = vpop.xlane.xlu1 %3146  ;;  %v3194_v52 = vld [vmem:[%s9299_s6 + $0x8] sm:$0xff] }
 0x570   : > { %v5554_v55 = vmax.f32 %v5522_v9, 0.0  ;;  %v5523_v50 = vadd.f32 %v5479_v46, %v5411_v8  ;;  %v5412_v13 = vadd.f32 %v5366_v28, %v5164_v33  ;;  %5593 = vadd.xlane.f32.xlu1 %v5592_v36  ;;  %v9631_v33 = vld [vmem:[#allocation51_spill] sm:$0xff] }
 0x571   : > { %v5370_v34 = vpop.f32.mrf.mxu1  ;;  %v4927_v8 = vadd.f32 %v9632_v0, %v4679_v21  ;;  %v5170_v43 = vadd.f32 %v5134_v63, %v4926_v49  ;;  %v3197_v49 = vld [vmem:[%s9299_s6 + $0x20] sm:$0xff] }
 0x572   : > { %v5524_v27 = vadd.f32 %v5479_v46, %v5412_v13  ;;  %v5413_v58 = vadd.f32 %v5370_v34, %v5165_v51  ;;  %v5595_v19 = vadd.f32 %v5554_v55, %v5553_v44  ;;  %v5555_v11 = vmax.f32 %v5523_v50, 0.0  ;;  %v9630_v46 = vld [vmem:[#allocation48_spill] sm:$0xff]  ;;  %v9633_v51 = vld [vmem:[#allocation85_spill] sm:$0xff]  ;;  %v5138_v44 = vpop.f32.mrf.mxu0 }
 0x573   : > { %v5372_v35 = vpop.f32.mrf.mxu1  ;;  %v4680_v9 = vadd.f32 %v9631_v33, %v9630_v46  ;;  %v5171_v28 = vadd.f32 %v5136_v31, %v4927_v8  ;;  %v3199_v46 = vld [vmem:[%s9299_s6 + $0x30] sm:$0xff] }
 0x574   : > { %v5556_v1 = vmax.f32 %v5524_v27, 0.0  ;;  %v5525_v45 = vadd.f32 %v5484_v3, %v5413_v58  ;;  %v5414_v57 = vadd.f32 %v5372_v35, %v5166_v53  ;;  %5596 = vadd.xlane.f32.xlu1 %v5595_v19  ;;  %v5499_v53 = vpop.permute.xlu0 %5498 }
 0x575   : > { %v5374_v16 = vpop.f32.mrf.mxu1  ;;  %v4928_v40 = vadd.f32 %v9633_v51, %v4680_v9 }
 0x576   : > { %v5526_v61 = vadd.f32 %v5484_v3, %v5414_v57  ;;  %v5415_v2 = vadd.f32 %v5374_v16, %v5167_v5  ;;  %v5598_v32 = vadd.f32 %v5556_v1, %v5555_v11  ;;  %v5557_v62 = vmax.f32 %v5525_v45, 0.0 }
 0x577   : > { %v5376_v12 = vpop.f32.mrf.mxu1  ;;  %v5172_v47 = vadd.f32 %v5138_v44, %v4928_v40  ;;  %v3209_v16 = vmul.f32 %v3193_v30, %v3147_v7 }
 0x578   : > { %v5558_v37 = vmax.f32 %v5526_v61, 0.0  ;;  %v5527_v38 = vadd.f32 %v5489_v42, %v5415_v2  ;;  %v5416_v6 = vadd.f32 %v5376_v12, %v5168_v39  ;;  %5599 = vadd.xlane.f32.xlu1 %v5598_v32  ;;  %v3150_v35 = vpop.xlane.xlu0 %3149  ;;  %v3195_v39 = vld [vmem:[%s9299_s6 + $0x10] sm:$0xff]  ;;  %v3196_v2 = vld [vmem:[%s9299_s6 + $0x18] sm:$0xff] }
 0x579   : > { %v5380_v36 = vpop.f32.mrf.mxu1  ;;  %v3226_v61 = vsel %vm3225_vm10, %v3209_v16, 0.0 }
 0x57a   : > { %v5528_v17 = vadd.f32 %v5489_v42, %v5416_v6  ;;  %v5417_v22 = vadd.f32 %v5380_v36, %v5169_v26  ;;  %v5601_v56 = vadd.f32 %v5558_v37, %v5557_v62  ;;  %v5559_v50 = vmax.f32 %v5527_v38, 0.0  ;;  %v3198_v37 = vld [vmem:[%s9299_s6 + $0x28] sm:$0xff] }
 0x57b   : > { %v5382_v55 = vpop.f32.mrf.mxu1  ;;  %v3210_v42 = vmul.f32 %v3194_v52, %v3150_v35 }
 0x57c   : > { %v5560_v13 = vmax.f32 %v5528_v17, 0.0  ;;  %v5529_v41 = vadd.f32 %v5494_v59, %v5417_v22  ;;  %v5418_v10 = vadd.f32 %v5382_v55, %v5170_v43  ;;  %5602 = vadd.xlane.f32.xlu1 %v5601_v56  ;;  %v3153_v11 = vpop.xlane.xlu0 %3152  ;;  %v3201_v22 = vld [vmem:[%s9299_s6 + $0x40] sm:$0xff] }
 0x57d   : > { %v5384_v18 = vpop.f32.mrf.mxu1  ;;  %v3227_v54 = vsel %vm3225_vm10, %v3210_v42, 0.0  ;;  %v3211_v25 = vmul.f32 %v3195_v39, %v3153_v11  ;;  %v3207_v39 = vld [vmem:[%s9299_s6 + $0x70] sm:$0xff] }
 0x57e   : > { %v5530_v48 = vadd.f32 %v5494_v59, %v5418_v10  ;;  %v5419_v34 = vadd.f32 %v5384_v18, %v5171_v28  ;;  %v5604_v3 = vadd.f32 %v5560_v13, %v5559_v50  ;;  %v5561_v58 = vmax.f32 %v5529_v41, 0.0  ;;  %v3200_v59 = vld [vmem:[%s9299_s6 + $0x38] sm:$0xff]  ;;  %v3202_v50 = vld [vmem:[%s9299_s6 + $0x48] sm:$0xff]  ;;  %v3203_v18 = vld [vmem:[%s9299_s6 + $0x50] sm:$0xff] }
 0x57f   : > { %v5386_v27 = vpop.f32.mrf.mxu1  ;;  %v3228_v21 = vadd.f32 %v3227_v54, %v3226_v61  ;;  %v3229_v31 = vsel %vm3225_vm10, %v3211_v25, 0.0 }
 0x580   : > { %v5562_v19 = vmax.f32 %v5530_v48, 0.0  ;;  %v5531_v4 = vadd.f32 %v5499_v53, %v5419_v34  ;;  %v5420_v23 = vadd.f32 %v5386_v27, %v5172_v47  ;;  %5605 = vadd.xlane.f32.xlu1 %v5604_v3  ;;  %v3156_v1 = vpop.xlane.xlu0 %3155 }
 0x581   : > { %v3212_v14 = vmul.f32 %v3196_v2, %v3156_v1  ;;  %v3230_v62 = vadd.f32 %v3229_v31, %v3228_v21  ;;  %v3206_v1 = vld [vmem:[%s9299_s6 + $0x68] sm:$0xff] }
 0x582   : > { %v5532_v29 = vadd.f32 %v5499_v53, %v5420_v23  ;;  %v5607_v60 = vadd.f32 %v5562_v19, %v5561_v58  ;;  %v5563_v20 = vmax.f32 %v5531_v4, 0.0  ;;  %v3204_v58 = vld [vmem:[%s9299_s6 + $0x58] sm:$0xff] }
 0x583   : > { %v3231_v38 = vsel %vm3225_vm10, %v3212_v14, 0.0 }
 0x584   : > { %v5564_v5 = vmax.f32 %v5532_v29, 0.0  ;;  %5608 = vadd.xlane.f32.xlu1 %v5607_v60  ;;  %v3159_v45 = vpop.xlane.xlu0 %3158  ;;  %v3232_v36 = vadd.f32 %v3231_v38, %v3230_v62  ;;  %v3205_v29 = vld [vmem:[%s9299_s6 + $0x60] sm:$0xff]  ;;  %v5647_v62 = vld [vmem:[%s9303_s10 + $0x8] sm:$0xff] }
 0x585   : > { %v3213_v6 = vmul.f32 %v3197_v49, %v3159_v45 }
 0x586   : > { %v5610_v63 = vadd.f32 %v5564_v5, %v5563_v20 }
 0x587   : > { %v3233_v43 = vsel %vm3225_vm10, %v3213_v6, 0.0 }
 0x588   : > { %5611 = vadd.xlane.f32.xlu1 %v5610_v63  ;;  %v3162_v57 = vpop.xlane.xlu0 %3161  ;;  %v3234_v55 = vadd.f32 %v3233_v43, %v3232_v36 }
 0x589   : > { %v3214_v0 = vmul.f32 %v3198_v37, %v3162_v57 }
 0x58b   : > { %v3235_v40 = vsel %vm3225_vm10, %v3214_v0, 0.0  ;;  %v5648_v0 = vld [vmem:[%s9303_s10 + $0x10] sm:$0xff] }
 0x58c   : > { %v3165_v15 = vpop.xlane.xlu0 %3164  ;;  %v3236_v10 = vadd.f32 %v3235_v40, %v3234_v55  ;;  %v5650_v55 = vld [vmem:[%s9303_s10 + $0x20] sm:$0xff] }
 0x58d   : > { %v3215_v17 = vmul.f32 %v3199_v46, %v3165_v15 }
 0x58f   : > { %v3237_v13 = vsel %vm3225_vm10, %v3215_v17, 0.0  ;;  %v5649_v17 = vld [vmem:[%s9303_s10 + $0x18] sm:$0xff] }
 0x590   : > { %v3168_v24 = vpop.xlane.xlu0 %3167  ;;  %v3238_v27 = vadd.f32 %v3237_v13, %v3236_v10 }
 0x591   : > { %v3216_v28 = vmul.f32 %v3200_v59, %v3168_v24 }
 0x593   : > { %v3239_v34 = vsel %vm3225_vm10, %v3216_v28, 0.0 }
 0x594   : > { %v3171_v32 = vpop.xlane.xlu0 %3170  ;;  %v3240_v23 = vadd.f32 %v3239_v34, %v3238_v27 }
 0x595   : > { %v3217_v41 = vmul.f32 %v3201_v22, %v3171_v32 }
 0x597   : > { %v3241_v19 = vsel %vm3225_vm10, %v3217_v41, 0.0  ;;  %v5651_v41 = vld [vmem:[%s9303_s10 + $0x28] sm:$0xff] }
 0x598   : > { %v3242_v11 = vadd.f32 %v3241_v19, %v3240_v23  ;;  %v5653_v23 = vld [vmem:[%s9303_s10 + $0x38] sm:$0xff] }
 0x5d5   : > { %v5567_v26 = vpop.xlane.xlu0 %5566 }
 0x5d6   : > { %v9060_v12 = vmul.f32 0.00390625, %v5567_v26  ;;  %v3208_v26 = vld [vmem:[%s9299_s6 + $0x78] sm:$0xff] }
 0x5d8   : > { %5630 = vst.msk [vmem:[%s9054_s24] sm:$0xff] %vm5629_vm11, %v9060_v12 }
 0x5d9   : > { %v3174_v33 = vpop.xlane.xlu0 %3173  ;;  %v5570_v9 = vpop.xlane.xlu1 %5569 }
 0x5da   : > { %v9072_v8 = vmul.f32 0.00390625, %v5570_v9  ;;  %v3218_v3 = vmul.f32 %v3202_v50, %v3174_v33  ;;  %v5646_v9 = vld [vmem:[%s9303_s10] sm:$0xff] }
 0x5dc   : > { %5631 = vst.msk [vmem:[%s9054_s24 + $0x8] sm:$0xff] %vm5629_vm11, %v9072_v8  ;;  %v3243_v5 = vsel %vm3225_vm10, %v3218_v3, 0.0  ;;  %v5663_v59 = vmul.f32 %v5647_v62, %v9072_v8  ;;  %v5652_v3 = vld [vmem:[%s9303_s10 + $0x30] sm:$0xff] }
 0x5dd   : > { %v3177_v56 = vpop.xlane.xlu0 %3176  ;;  %v5573_v51 = vpop.xlane.xlu1 %5572  ;;  %v3244_v15 = vadd.f32 %v3243_v5, %v3242_v11  ;;  %v5654_v11 = vld [vmem:[%s9303_s10 + $0x40] sm:$0xff] }
 0x5de   : > { %v9085_v44 = vmul.f32 0.00390625, %v5573_v51  ;;  %v3219_v4 = vmul.f32 %v3203_v18, %v3177_v56  ;;  %v5662_v51 = vmul.f32 %v5646_v9, %v9060_v12  ;;  %v5679_v50 = vsel %vm3225_vm10, %v5663_v59, 0.0 }
 0x5e0   : > { %5632 = vst.msk [vmem:[%s9054_s24 + $0x10] sm:$0xff] %vm5629_vm11, %v9085_v44  ;;  %v3245_v45 = vsel %vm3225_vm10, %v3219_v4, 0.0  ;;  %v5664_v40 = vmul.f32 %v5648_v0, %v9085_v44  ;;  %v5678_v44 = vsel %vm3225_vm10, %v5662_v51, 0.0 }
 0x5e1   : > { %v3180_v47 = vpop.xlane.xlu0 %3179  ;;  %v5576_v48 = vpop.xlane.xlu1 %5575  ;;  %v3246_v42 = vadd.f32 %v3245_v45, %v3244_v15  ;;  %v5680_v34 = vadd.f32 %v5679_v50, %v5678_v44 }
 0x5e2   : > { %v5616_v53 = vmul.f32 0.00390625, %v5576_v48  ;;  %v3220_v63 = vmul.f32 %v3204_v58, %v3180_v47  ;;  %v5681_v18 = vsel %vm3225_vm10, %v5664_v40, 0.0 }
 0x5e3   : > { %v5682_v19 = vadd.f32 %v5681_v18, %v5680_v34 }
 0x5e4   : > { %5633 = vst.msk [vmem:[%s9054_s24 + $0x18] sm:$0xff] %vm5629_vm11, %v5616_v53  ;;  %v3247_v52 = vsel %vm3225_vm10, %v3220_v63, 0.0  ;;  %v5665_v13 = vmul.f32 %v5649_v17, %v5616_v53 }
 0x5e5   : > { %v3183_v60 = vpop.xlane.xlu0 %3182  ;;  %v5579_v20 = vpop.xlane.xlu1 %5578  ;;  %v3248_v2 = vadd.f32 %v3247_v52, %v3246_v42 }
 0x5e6   : > { %v5617_v35 = vmul.f32 0.00390625, %v5579_v20  ;;  %v3221_v57 = vmul.f32 %v3205_v29, %v3183_v60  ;;  %v5683_v27 = vsel %vm3225_vm10, %v5665_v13, 0.0 }
 0x5e7   : > { %v5684_v63 = vadd.f32 %v5683_v27, %v5682_v19 }
 0x5e8   : > { %5634 = vst.msk [vmem:[%s9054_s24 + $0x20] sm:$0xff] %vm5629_vm11, %v5617_v35  ;;  %v3249_v61 = vsel %vm3225_vm10, %v3221_v57, 0.0  ;;  %v5666_v47 = vmul.f32 %v5650_v55, %v5617_v35 }
 0x5e9   : > { %v3186_v30 = vpop.xlane.xlu0 %3185  ;;  %v5582_v7 = vpop.xlane.xlu1 %5581  ;;  %v3250_v49 = vadd.f32 %v3249_v61, %v3248_v2  ;;  %v5656_v2 = vld [vmem:[%s9303_s10 + $0x50] sm:$0xff] }
 0x5ea   : > { %v3222_v24 = vmul.f32 %v3206_v1, %v3186_v30  ;;  %v5618_v16 = vmul.f32 0.00390625, %v5582_v7  ;;  %v5685_v60 = vsel %vm3225_vm10, %v5666_v47, 0.0  ;;  %v5655_v30 = vld [vmem:[%s9303_s10 + $0x48] sm:$0xff] }
 0x5eb   : > { %v5686_v57 = vadd.f32 %v5685_v60, %v5684_v63 }
 0x5ec   : > { %5635 = vst.msk [vmem:[%s9054_s24 + $0x28] sm:$0xff] %vm5629_vm11, %v5618_v16  ;;  %v3251_v25 = vsel %vm3225_vm10, %v3222_v24, 0.0  ;;  %v5667_v58 = vmul.f32 %v5651_v41, %v5618_v16  ;;  %v3264_v24 = vld [vmem:[%s9300_s7] sm:$0x1] }
 0x5ed   : > { %v3189_v32 = vpop.xlane.xlu0 %3188  ;;  %v5585_v54 = vpop.xlane.xlu1 %5584  ;;  %v3252_v37 = vadd.f32 %v3251_v25, %v3250_v49 }
 0x5ee   : > { %v3223_v21 = vmul.f32 %v3207_v39, %v3189_v32  ;;  %v5619_v14 = vmul.f32 0.00390625, %v5585_v54  ;;  %v5687_v1 = vsel %vm3225_vm10, %v5667_v58, 0.0 }
 0x5ef   : > { %v5688_v39 = vadd.f32 %v5687_v1, %v5686_v57 }
 0x5f0   : > { %v3253_v31 = vsel %vm3225_vm10, %v3223_v21, 0.0  ;;  %5636 = vst.msk [vmem:[%s9054_s24 + $0x30] sm:$0xff] %vm5629_vm11, %v5619_v14  ;;  %v5668_v20 = vmul.f32 %v5652_v3, %v5619_v14  ;;  %v5657_v14 = vld [vmem:[%s9303_s10 + $0x58] sm:$0xff] }
 0x5f1   : > { %v3192_v38 = vpop.xlane.xlu0 %3191  ;;  %v5588_v6 = vpop.xlane.xlu1 %5587  ;;  %v3254_v36 = vadd.f32 %v3253_v31, %v3252_v37 }
 0x5f2   : > { %v3224_v46 = vmul.f32 %v3208_v26, %v3192_v38  ;;  %v5620_v33 = vmul.f32 0.00390625, %v5588_v6  ;;  %v5689_v52 = vsel %vm3225_vm10, %v5668_v20, 0.0  ;;  %v5658_v38 = vld [vmem:[%s9303_s10 + $0x60] sm:$0xff] }
 0x5f3   : > { %v5690_v25 = vadd.f32 %v5689_v52, %v5688_v39 }
 0x5f4   : > { %v3255_v43 = vsel %vm3225_vm10, %v3224_v46, 0.0  ;;  %5637 = vst.msk [vmem:[%s9054_s24 + $0x38] sm:$0xff] %vm5629_vm11, %v5620_v33  ;;  %v5669_v45 = vmul.f32 %v5653_v23, %v5620_v33 }
 0x5f5   : > { %v3256_v22 = vadd.f32 %v3255_v43, %v3254_v36  ;;  %v5591_v56 = vpop.xlane.xlu1 %5590 }
 0x5f6   : > { %v5621_v28 = vmul.f32 0.00390625, %v5591_v56  ;;  %v5691_v32 = vsel %vm3225_vm10, %v5669_v45, 0.0 }
 0x5f7   : > { %v3257_v8 = vrot.slane %v3256_v22, 4  ;;  %v5692_v37 = vadd.f32 %v5691_v32, %v5690_v25 }
 0x5f8   : > { %5638 = vst.msk [vmem:[%s9054_s24 + $0x40] sm:$0xff] %vm5629_vm11, %v5621_v28  ;;  %v5670_v16 = vmul.f32 %v5654_v11, %v5621_v28 }
 0x5f9   : > { %v3258_v10 = vadd.f32 %v3257_v8, %v3256_v22  ;;  %v5594_v12 = vpop.xlane.xlu1 %5593 }
 0x5fa   : > { %v5622_v48 = vmul.f32 0.00390625, %v5594_v12  ;;  %v5693_v26 = vsel %vm3225_vm10, %v5670_v16, 0.0 }
 0x5fb   : > { %v3259_v53 = vrot.slane %v3258_v10, 2 }
 0x5fc   : > { %5639 = vst.msk [vmem:[%s9054_s24 + $0x48] sm:$0xff] %vm5629_vm11, %v5622_v48  ;;  %v5671_v54 = vmul.f32 %v5655_v30, %v5622_v48 }
 0x5fd   : > { %v3260_v4 = vadd.f32 %v3259_v53, %v3258_v10  ;;  %v5597_v29 = vpop.xlane.xlu1 %5596 }
 0x5fe   : > { %v5623_v5 = vmul.f32 0.00390625, %v5597_v29  ;;  %v5695_v6 = vsel %vm3225_vm10, %v5671_v54, 0.0 }
 0x5ff   : > { %v3261_v35 = vrot.slane %v3260_v4, 1 }
 0x600   : > { %5640 = vst.msk [vmem:[%s9054_s24 + $0x50] sm:$0xff] %vm5629_vm11, %v5623_v5  ;;  %v5672_v31 = vmul.f32 %v5656_v2, %v5623_v5 }
 0x601   : > { %v3262_v15 = vadd.f32 %v3261_v35, %v3260_v4  ;;  %v5600_v7 = vpop.xlane.xlu1 %5599 }
 0x602   : > { %v5624_v42 = vmul.f32 0.00390625, %v5600_v7 }
 0x603   : > { %v3263_v61 = vmul.f32 0.00390625, %v3262_v15 }
 0x604   : > { %5641 = vst.msk [vmem:[%s9054_s24 + $0x58] sm:$0xff] %vm5629_vm11, %v5624_v42  ;;  %v5673_v46 = vmul.f32 %v5657_v14, %v5624_v42 }
 0x605   : > { %v3265_v21 = vadd.f32 %v3264_v24, %v3263_v61  ;;  %v5603_v49 = vpop.xlane.xlu1 %5602 }
 0x606   : > { %v5625_v62 = vmul.f32 0.00390625, %v5603_v49 }
 0x607   : > { %3267 = vst.msk [vmem:[%s527_s17] sm:$0x1] %vm3266_vm12, %v3265_v21 }
 0x608   : > { %5642 = vst.msk [vmem:[%s9054_s24 + $0x60] sm:$0xff] %vm5629_vm11, %v5625_v62 }
 0x609   : > { %6526 = shalt.err (!%p6523_p3)
}
 0x60a   : > { %s6527_s17 = scalar_lea.hbm %s9199_s18, 16  ;;  %s6531_s27 = scalar_lea.hbm %s9306_s13, 32 }
 0x60b   : > { %p6528_p2 = scmp.ne.s32.totalorder %s9199_s18, %s6527_s17  ;;  %p6532_p7 = scmp.lt.s32.totalorder %s9199_s18, %s9306_s13 }
 0x60c   : > { %p6533_p6 = scmp.lt.s32.totalorder %s6531_s27, %s6527_s17 }
 0x60d   : > { %p6529_p4 = pnand %p6528_p2, %p6750_p5 }
 0x60e   : > { %p6534_p9 = por %p6533_p6, %p6532_p7 }
 0x60f   : > { %p6530_p13 = pneg %p6529_p4 }
 0x611   : > { %p6535_p10 = pnand %p6534_p9, %p6530_p13 }
 0x613   : > { %6538 = shalt.err (!%p6535_p10)
}
 0x614   : > { %6234 = dma.vmem_to_hbm [thread:$0]  (%p6750_p5), %s9201_s26, 16, %s9199_s18, %s5723_s19   ;;  %v5694_v33 = vadd.f32 %v5693_v26, %v5692_v37  ;;  %v5659_v9 = vld [vmem:[%s9303_s10 + $0x68] sm:$0xff]  ;;  %v5606_v0 = vpop.xlane.xlu1 %5605  ;;  %v5697_v36 = vsel %vm3225_vm10, %v5672_v31, 0.0  ;;  %v5674_v59 = vmul.f32 %v5658_v38, %v5625_v62  ;;  %v5699_v22 = vsel %vm3225_vm10, %v5673_v46, 0.0  ;;  %v5660_v40 = vld [vmem:[%s9303_s10 + $0x70] sm:$0xff]  ;;  %v5661_v12 = vld [vmem:[%s9303_s10 + $0x78] sm:$0xff] }
 0x615   : > { %v5626_v43 = vmul.f32 0.00390625, %v5606_v0  ;;  %v5715_v60 = vld [vmem:[%s9304_s11] sm:$0x1]  ;;  %s540_s17 = scalar_lea.vmem [#allocation9], %s9168_s16  ;;  %s5732_s25 = scalar_lea.sflag [#allocation10], %s9168_s16 }
 0x616   : > { %v5696_v17 = vadd.f32 %v5695_v6, %v5694_v33  ;;  %v5701_v55 = vsel %vm3225_vm10, %v5674_v59, 0.0  ;;  %s5763_s22 = sshll.u32 %s540_s17, 4  ;;  %s6628_s2 = smov [#allocation9]   ;;  %s5764_s22 = int_to_ptr.vmem [resolvable:$true] %s5763_s22 }
 0x617   : > { %5643 = vst.msk [vmem:[%s9054_s24 + $0x68] sm:$0xff] %vm5629_vm11, %v5626_v43  ;;  %v5675_v56 = vmul.f32 %v5659_v9, %v5626_v43  ;;  %s6539_s1 = scalar_lea.vmem %s5764_s22, 16  ;;  %s6543_s26 = sshll.u32 %s6628_s2, 4  ;;  %s6544_s26 = int_to_ptr.vmem [resolvable:$false] %s6543_s26 }
 0x618   : > { %v5698_v51 = vadd.f32 %v5697_v36, %v5696_v17  ;;  %v5609_v28 = vpop.xlane.xlu1 %5608  ;;  %p6540_p12 = scmp.ne.s32.totalorder %s5764_s22, %s6539_s1  ;;  %s6545_s18 = scalar_lea.vmem %s6544_s26, 32 }
 0x619   : > { %v5627_v8 = vmul.f32 0.00390625, %v5609_v28  ;;  %v5703_v13 = vsel %vm3225_vm10, %v5675_v56, 0.0  ;;  %p6546_p0 = scmp.lt.s32.totalorder %s5764_s22, %s6544_s26  ;;  %p6547_p1 = scmp.lt.s32.totalorder %s6545_s18, %s6539_s1 }
 0x61a   : > { %v5700_v50 = vadd.f32 %v5699_v22, %v5698_v51  ;;  %p6541_p8 = pnand %p6540_p12, %p6750_p5 }
 0x61b   : > { %5644 = vst.msk [vmem:[%s9054_s24 + $0x70] sm:$0xff] %vm5629_vm11, %v5627_v8  ;;  %v5676_v41 = vmul.f32 %v5660_v40, %v5627_v8  ;;  %p6548_p3 = por %p6547_p1, %p6546_p0 }
 0x61c   : > { %v5702_v10 = vadd.f32 %v5701_v55, %v5700_v50  ;;  %v5612_v44 = vpop.xlane.xlu1 %5611  ;;  %p6542_p11 = pneg %p6541_p8 }
 0x61d   : > { %v5705_v18 = vsel %vm3225_vm10, %v5676_v41, 0.0  ;;  %v5628_v47 = vmul.f32 0.00390625, %v5612_v44 }
 0x61e   : > { %v5704_v48 = vadd.f32 %v5703_v13, %v5702_v10  ;;  %p6549_p2 = pnand %p6548_p3, %p6542_p11 }
 0x61f   : > { %5645 = vst.msk [vmem:[%s9054_s24 + $0x78] sm:$0xff] %vm5629_vm11, %v5628_v47  ;;  %v5677_v34 = vmul.f32 %v5661_v12, %v5628_v47  ;;  %s9634_s24 = sshll.u32 %s6733_s5, 4 }
 0x620   : > { %v5706_v3 = vadd.f32 %v5705_v18, %v5704_v48  ;;  %s5761_s0 = scalar_lea.hbm %s9308_s15, %s9634_s24 }
 0x621   : > { %v5707_v53 = vsel %vm3225_vm10, %v5677_v34, 0.0 }
 0x622   : > { %v5708_v27 = vadd.f32 %v5707_v53, %v5706_v3 }
 0x624   : > { %v5709_v58 = vrot.slane %v5708_v27, 4 }
 0x626   : > { %v5710_v19 = vadd.f32 %v5709_v58, %v5708_v27 }
 0x628   : > { %v5711_v4 = vrot.slane %v5710_v19, 2 }
 0x62a   : > { %v5712_v23 = vadd.f32 %v5711_v4, %v5710_v19 }
 0x62c   : > { %v5713_v29 = vrot.slane %v5712_v23, 1 }
 0x62e   : > { %v5714_v20 = vadd.f32 %v5713_v29, %v5712_v23 }
 0x630   : > { %v5716_v5 = vadd.f32 %v5715_v60, %v5714_v20 }
 0x632   : > { %5717 = vst.msk [vmem:[%s540_s17] sm:$0x1] %vm3266_vm12, %v5716_v5 }
 0x633   : > { %6552 = shalt.err (!%p6549_p2)
}
 0x634   : > { %s6553_s5 = scalar_lea.hbm %s5761_s0, 16  ;;  %s6557_s30 = scalar_lea.hbm %s9308_s15, 32 }
 0x635   : > { %p6554_p4 = scmp.ne.s32.totalorder %s5761_s0, %s6553_s5  ;;  %p6558_p6 = scmp.lt.s32.totalorder %s5761_s0, %s9308_s15 }
 0x636   : > { %p6559_p9 = scmp.lt.s32.totalorder %s6557_s30, %s6553_s5 }
 0x637   : > { %p6555_p13 = pnand %p6554_p4, %p6750_p5 }
 0x638   : > { %p6560_p10 = por %p6559_p9, %p6558_p6 }
 0x639   : > { %p6556_p7 = pneg %p6555_p13 }
 0x63b   : > { %p6561_p12 = pnand %p6560_p10, %p6556_p7 }
 0x63d   : > { %6564 = shalt.err (!%p6561_p12)
}
 0x63e   : > { %6235 = dma.vmem_to_hbm [thread:$0]  (%p6750_p5), %s5764_s22, 16, %s5761_s0, %s5732_s25  }
 0x63f PF: > { %s9635_s28 = sld [smem:[#allocation18_spill]]  ;;  %p6256_p8 = scmp.ge.s32.totalorder %s6611_s23, 2 }
 0x640   : > { %s5782_s27 = sand.u32 1, %s6599_s20  }
 0x641   : > { %s5783_s1 = scalar_lea.sflag [#allocation5], %s5782_s27 }
 0x645   : > { %p9636_p11 = scmp.ne.s32.totalorder %s9635_s28, 0 }
 0x647   : > { %p6246_p0 = pnand %p6256_p8, %p9636_p11 }
 0x649   : > { %p6247_p1 = pneg %p6246_p0 }
 0x64b   : > { %6590 = dma.done.wait (%p6247_p1), %s5783_s1, 16  }
 0x64c   : > { %6592 = vsyncadd (%p6247_p1), %s5783_s1, 4294967280  ;;  %s5799_s2 = scalar_lea.sflag [#allocation10], %s5782_s27 }
 0x64d   : > { %6594 = dma.done.wait (%p6247_p1), %s5799_s2, 16  }
 0x64e   : > { %6596 = vsyncadd (%p6247_p1), %s5799_s2, 4294967280  ;;  %s9637_s23 = sld [smem:[#allocation16_spill]]  ;;  %s9640_s20 = smov %s6603_s21 }
 0x64f   : > { %s9638_s26 = sld [smem:[#allocation15_spill]] }
 0x650   : > { %s9639_s22 = sld [smem:[#allocation17_spill]] }
 0x654   : > { %p32_p5 = scmp.ge.s32.totalorder %s9637_s23, 4  }
 0x655   : > { %s9641_s21 = smov %s9638_s26 }
 0x656   :  { %34 = sbr.rel (!%p32_p5) target bundleno = 12 (0xc), region = 169 }
 0x65b   :  { %5803 = vsyncpa [#allocation4], 1 }
 0x65c   :  { %5805 = vsyncpa [#allocation4 + $0x1], 1 }
 0x65d   :  { %5806 = vsyncpa [#allocation7], 1 }
 0x65e   :  { %5807 = vsyncpa [#allocation5], 1 }
 0x65f   :  { %5809 = vsyncpa [#allocation5 + $0x1], 1 }
 0x660   :  { %5810 = vsyncpa [#allocation10], 1 }
 0x661   :  { %5812 = vsyncpa [#allocation10 + $0x1], 1 }

</bundles_post_ra>
